<compile_context>
chip_gen: v5e
topology: v5e:2x2
jax: 0.10.0
libtpu: 0.0.40
codegen_flags: <defaults>
</compile_context>

<pallas_src>
import jax
import jax.numpy as jnp
from jax import lax
from jax.experimental import pallas as pl
from jax.experimental.pallas import tpu as pltpu

BN_EPS = 1e-5


# ----------------------------- in-kernel helpers -----------------------------

def _make_taps(xp, H, W):
    """xp: (H+2, W+2, C) zero-padded tile -> (H*W, 9*C) im2col matrix in VMEM.

    Columns are tap-major: col = tap*C + c with tap = dy*3 + dx, matching the
    row ordering of the folded 3x3 weights produced by _prep_* below.
    """
    C = xp.shape[-1]
    cols = [xp[dy:dy + H, dx:dx + W, :] for dy in range(3) for dx in range(3)]
    return jnp.concatenate(cols, axis=-1).reshape(H * W, 9 * C)


# ----------------------------- Pallas kernels -----------------------------

def _conv_a_kernel(x2_ref, x1_ref, wx2_ref, wx1_ref, b_ref, y_ref, stats_ref):
    """Stage A: (grouped-3x3 -> 1x1) pre-folded into a single weight, concat-free.

    x2_ref : (H+2, W+2, C2)  zero-padded skip tensor
    x1_ref : (H+2, W+2, C1)  zero-padded upsampled tensor
    wx2    : (9*C2, Cmid)    folded (3x3 @ 1x1) weight rows for x2's channels
    wx1    : (9*C1, Cmid)    folded weight rows for x1's channels
    b      : (1, Cmid)       folded bias (b3 @ W1 + b1)
    y_ref  : (P, Cmid)       raw pre-BN activations for this batch element
    stats  : (2, Cmid)       per-batch partial [sum, sum-of-squares]
    """
    Hp, Wp, _ = x2_ref.shape
    H, W = Hp - 2, Wp - 2

    y = jnp.dot(_make_taps(x2_ref[...], H, W), wx2_ref[...],
                preferred_element_type=jnp.float32)
    y = y + jnp.dot(_make_taps(x1_ref[...], H, W), wx1_ref[...],
                    preferred_element_type=jnp.float32)
    y = y + b_ref[...]

    y_ref[...] = y
    stats_ref[0:1, :] = jnp.sum(y, axis=0, keepdims=True)
    stats_ref[1:2, :] = jnp.sum(y * y, axis=0, keepdims=True)


def _conv_b_kernel(xp_ref, scale_ref, shift_ref, w3_ref, b3_ref, w1_ref, b1_ref,
                   y_ref, stats_ref):
    """Stage B with fused BN(A)+ReLU on the loaded tile.

    xp_ref : (H+2, W+2, C)  spatially zero-padded RAW stage-A output
    scale  : (1, 1, C), shift: (1, 1, C)  precomputed batch-BN affine
    w3     : (9*C, C)  folded dense 3x3 weight; w1: (C, Cout) pointwise weight
    """
    Hp, Wp, _ = xp_ref.shape
    H, W = Hp - 2, Wp - 2

    # Fused BatchNorm (batch statistics, precomputed scale/shift) + ReLU.
    a = jnp.maximum(xp_ref[...] * scale_ref[...] + shift_ref[...], 0.0)
    # Restore exact-zero conv padding on the spatial border (BN would have
    # turned the zero pad into ReLU(shift)).
    row = lax.broadcasted_iota(jnp.int32, (Hp, Wp, 1), 0)
    col = lax.broadcasted_iota(jnp.int32, (Hp, Wp, 1), 1)
    interior = (row >= 1) & (row <= H) & (col >= 1) & (col <= W)
    a = jnp.where(interior, a, 0.0)

    acc = jnp.dot(_make_taps(a, H, W), w3_ref[...],
                  preferred_element_type=jnp.float32) + b3_ref[...]
    y = jnp.dot(acc, w1_ref[...], preferred_element_type=jnp.float32) + b1_ref[...]
    y_ref[...] = y
    stats_ref[0:1, :] = jnp.sum(y, axis=0, keepdims=True)
    stats_ref[1:2, :] = jnp.sum(y * y, axis=0, keepdims=True)


def _bn_relu_kernel(x_ref, scale_ref, shift_ref, o_ref):
    """Final elementwise BatchNorm (precomputed scale/shift) + ReLU."""
    o_ref[...] = jnp.maximum(x_ref[...] * scale_ref[...] + shift_ref[...], 0.0)


# ----------------------------- Pallas wrappers -----------------------------

def conv_stage_a(x2p, x1p, wx2, wx1, b):
    N, Hp, Wp, C2 = x2p.shape
    C1 = x1p.shape[-1]
    H, W = Hp - 2, Wp - 2
    P = H * W
    Cmid = wx2.shape[1]
    y, stats = pl.pallas_call(
        _conv_a_kernel,
        out_shape=(jax.ShapeDtypeStruct((N, P, Cmid), jnp.float32),
                   jax.ShapeDtypeStruct((N, 2, Cmid), jnp.float32)),
        grid=(N,),
        in_specs=[
            pl.BlockSpec((None, Hp, Wp, C2), lambda n: (n, 0, 0, 0)),
            pl.BlockSpec((None, Hp, Wp, C1), lambda n: (n, 0, 0, 0)),
            pl.BlockSpec((9 * C2, Cmid), lambda n: (0, 0)),
            pl.BlockSpec((9 * C1, Cmid), lambda n: (0, 0)),
            pl.BlockSpec((1, Cmid), lambda n: (0, 0)),
        ],
        out_specs=(
            pl.BlockSpec((None, P, Cmid), lambda n: (n, 0, 0)),
            pl.BlockSpec((None, 2, Cmid), lambda n: (n, 0, 0)),
        ),
        compiler_params=pltpu.CompilerParams(
            dimension_semantics=("parallel",),
            vmem_limit_bytes=32 * 1024 * 1024),
    )(x2p, x1p, wx2, wx1, b)
    return y, stats


def conv_stage_b(yap, scale, shift, w3, b3, w1, b1):
    N, Hp, Wp, C = yap.shape
    H, W = Hp - 2, Wp - 2
    P = H * W
    Cout = w1.shape[1]
    y, stats = pl.pallas_call(
        _conv_b_kernel,
        out_shape=(jax.ShapeDtypeStruct((N, P, Cout), jnp.float32),
                   jax.ShapeDtypeStruct((N, 2, Cout), jnp.float32)),
        grid=(N,),
        in_specs=[
            pl.BlockSpec((None, Hp, Wp, C), lambda n: (n, 0, 0, 0)),
            pl.BlockSpec((1, 1, C), lambda n: (0, 0, 0)),
            pl.BlockSpec((1, 1, C), lambda n: (0, 0, 0)),
            pl.BlockSpec((9 * C, C), lambda n: (0, 0)),
            pl.BlockSpec((1, C), lambda n: (0, 0)),
            pl.BlockSpec((C, Cout), lambda n: (0, 0)),
            pl.BlockSpec((1, Cout), lambda n: (0, 0)),
        ],
        out_specs=(
            pl.BlockSpec((None, P, Cout), lambda n: (n, 0, 0)),
            pl.BlockSpec((None, 2, Cout), lambda n: (n, 0, 0)),
        ),
        compiler_params=pltpu.CompilerParams(
            dimension_semantics=("parallel",),
            vmem_limit_bytes=32 * 1024 * 1024),
    )(yap, scale.reshape(1, 1, C), shift.reshape(1, 1, C), w3, b3, w1, b1)
    return y, stats


def bn_relu(x, scale, shift):
    """x: (N, P, C) -> ReLU(x * scale + shift)."""
    N, P, C = x.shape
    return pl.pallas_call(
        _bn_relu_kernel,
        out_shape=jax.ShapeDtypeStruct((N, P, C), jnp.float32),
        grid=(N,),
        in_specs=[
            pl.BlockSpec((None, P, C), lambda n: (n, 0, 0)),
            pl.BlockSpec((1, C), lambda n: (0, 0)),
            pl.BlockSpec((1, C), lambda n: (0, 0)),
        ],
        out_specs=pl.BlockSpec((None, P, C), lambda n: (n, 0, 0)),
        compiler_params=pltpu.CompilerParams(
            dimension_semantics=("parallel",)),
    )(x, scale.reshape(1, C), shift.reshape(1, C))


# ----------------------------- JAX glue -----------------------------

def upsample_bilinear_x2_align_corners(x):
    """x: (N, H, W, C) -> (N, 2H, 2W, C), bilinear, align_corners=True."""
    # TODO(synk): the gather/lerp upsample stays in plain JAX (data-dependent
    # gather has no clean rectangular BlockSpec form at this size).
    N, H, W, C = x.shape
    Ho, Wo = 2 * H, 2 * W

    def coords(n_in, n_out):
        if n_in == 1:
            z = jnp.zeros((n_out,), jnp.int32)
            return z, z, jnp.zeros((n_out,), jnp.float32)
        s = jnp.arange(n_out, dtype=jnp.float32) * (n_in - 1) / (n_out - 1)
        i0 = jnp.clip(jnp.floor(s).astype(jnp.int32), 0, n_in - 2)
        return i0, i0 + 1, s - i0.astype(jnp.float32)

    y0, y1, wy = coords(H, Ho)
    x0, x1, wx = coords(W, Wo)
    rows = (x[:, y0] * (1.0 - wy)[None, :, None, None]
            + x[:, y1] * wy[None, :, None, None])
    out = (rows[:, :, x0] * (1.0 - wx)[None, None, :, None]
           + rows[:, :, x1] * wx[None, None, :, None])
    return out


def _seg_groups(in_ch, channels_per_seg=128):
    # group logic from depthwise_pointwise_conv.__init__
    if in_ch == 3 and channels_per_seg != 1:
        C = 3
    else:
        C = min(in_ch, channels_per_seg)
    return in_ch // C


def _grouped3x3_to_dense(w):
    """PyTorch grouped conv weight (O, I/g, 3, 3) -> dense HWIO (3, 3, I, O)."""
    O, I_g, kH, kW = w.shape
    groups = O // I_g
    I = I_g * groups
    O_g = O // groups
    dense = jnp.zeros((kH, kW, I, O), w.dtype)
    for g in range(groups):
        blk = jnp.transpose(w[g * O_g:(g + 1) * O_g], (2, 3, 1, 0))  # (kH,kW,I_g,O_g)
        dense = dense.at[:, :, g * I_g:(g + 1) * I_g, g * O_g:(g + 1) * O_g].set(blk)
    return dense


def _prep_block_a(w3, b3, w1, b1, c2):
    """Fold the 1x1 conv into the 3x3 weight (exact: both linear, no activation
    between), then split rows by concat source so the concat is never built.

    Fold is a win for stage A because Cmid = Cin // 2 < Cin: one matmul with
    N = Cmid instead of (3x3 -> Cin) + (1x1 -> Cmid).
    """
    dense = _grouped3x3_to_dense(w3)                   # (3, 3, Cin, Cin) HWIO
    Cin = dense.shape[2]
    w3t = dense.reshape(9, Cin, Cin)                   # (tap, in, out)
    w1m = jnp.transpose(w1[:, :, 0, 0], (1, 0))        # (Cin, Cmid)
    wf = jnp.einsum('tio,om->tim', w3t, w1m)           # (tap, in, Cmid)
    bf = b3 @ w1m + b1                                 # (Cmid,)
    wx2 = wf[:, :c2, :].reshape(9 * c2, -1)
    wx1 = wf[:, c2:, :].reshape(9 * (Cin - c2), -1)
    return wx2, wx1, bf.reshape(1, -1)


def _prep_block(w3, b3, w1, b1):
    """Stage B keeps the two-matmul form (Cout >= Cmid here, so folding the 1x1
    into the 3x3 would *increase* MXU work)."""
    dense = _grouped3x3_to_dense(w3)                   # (3, 3, C, C)
    C = dense.shape[2]
    w3k = dense.reshape(9, C, C).reshape(9 * C, C)     # rows: tap*C + c
    w1k = jnp.transpose(w1[:, :, 0, 0], (1, 0))        # (C, Cout)
    return w3k, b3.reshape(1, -1), w1k, b1.reshape(1, -1)


def _bn_scale_shift(stats, gamma, beta, count):
    mean = stats[0] / count
    var = jnp.maximum(stats[1] / count - mean * mean, 0.0)  # biased, as PyTorch BN
    scale = gamma / jnp.sqrt(var + BN_EPS)
    shift = beta - mean * scale
    return scale, shift


def init_up_params(key, in_channels, out_channels):
    mid = in_channels // 2
    g1 = _seg_groups(in_channels)
    g2 = _seg_groups(mid)
    ks = jax.random.split(key, 8)

    def w(k, o, i, kh, kw, s=0.3):
        return s * jax.random.normal(k, (o, i, kh, kw), jnp.float32)

    return {
        'w3a': w(ks[0], in_channels, in_channels // g1, 3, 3),
        'b3a': 0.1 * jax.random.normal(ks[1], (in_channels,), jnp.float32),
        'w1a': w(ks[2], mid, in_channels, 1, 1),
        'b1a': 0.1 * jax.random.normal(ks[3], (mid,), jnp.float32),
        'gammaA': jnp.ones((mid,), jnp.float32),
        'betaA': jnp.zeros((mid,), jnp.float32),
        'w3b': w(ks[4], mid, mid // g2, 3, 3),
        'b3b': 0.1 * jax.random.normal(ks[5], (mid,), jnp.float32),
        'w1b': w(ks[6], out_channels, mid, 1, 1),
        'b1b': 0.1 * jax.random.normal(ks[7], (out_channels,), jnp.float32),
        'gammaB': jnp.ones((out_channels,), jnp.float32),
        'betaB': jnp.zeros((out_channels,), jnp.float32),
    }


# ----------------------------- Up.forward -----------------------------

def up_forward(params, x1_nchw, x2_nchw):
    x1 = jnp.transpose(x1_nchw, (0, 2, 3, 1)).astype(jnp.float32)
    x2 = jnp.transpose(x2_nchw, (0, 2, 3, 1)).astype(jnp.float32)

    # Upsample x1 and pad it to x2's spatial size (module semantics).
    x1 = upsample_bilinear_x2_align_corners(x1)
    diffY = x2.shape[1] - x1.shape[1]
    diffX = x2.shape[2] - x1.shape[2]
    x1 = jnp.pad(x1, ((0, 0),
                      (diffY // 2, diffY - diffY // 2),
                      (diffX // 2, diffX - diffX // 2),
                      (0, 0)))

    N, H, W, C2 = x2.shape
    P = H * W
    count = float(N * P)
    pad_sp = ((0, 0), (1, 1), (1, 1), (0, 0))   # conv padding=1

    # --- stage A: folded (3x3 -> 1x1) conv, concat-free; raw output + partial stats ---
    wx2, wx1, ba = _prep_block_a(
        params['w3a'], params['b3a'], params['w1a'], params['b1a'], C2)
    Cmid = wx2.shape[1]
    ya, sA = conv_stage_a(jnp.pad(x2, pad_sp), jnp.pad(x1, pad_sp), wx2, wx1, ba)
    scaleA, shiftA = _bn_scale_shift(jnp.sum(sA, axis=0),
                                     params['gammaA'], params['betaA'], count)

    # --- stage B: BN(A)+ReLU fused into the conv kernel ---
    w3b, b3b, w1b, b1b = _prep_block(params['w3b'], params['b3b'],
                                     params['w1b'], params['b1b'])
    yap = jnp.pad(ya.reshape(N, H, W, Cmid), pad_sp)     # raw, zero spatial border
    yb, sB = conv_stage_b(yap, scaleA, shiftA, w3b, b3b, w1b, b1b)
    scaleB, shiftB = _bn_scale_shift(jnp.sum(sB, axis=0),
                                     params['gammaB'], params['betaB'], count)

    # --- final BN + ReLU (no downstream consumer to fuse into) ---
    out = bn_relu(yb, scaleB, shiftB).reshape(N, H, W, -1)
    return jnp.transpose(out, (0, 3, 1, 2))  # back to NCHW


# ----------------------------- pure-JAX reference -----------------------------

def _ref_bn_relu(x, gamma, beta):
    mean = jnp.mean(x, axis=(0, 1, 2))
    var = jnp.mean((x - mean) ** 2, axis=(0, 1, 2))
    y = (x - mean) / jnp.sqrt(var + BN_EPS) * gamma + beta
    return jnp.maximum(y, 0.0)


def ref_forward(params, x1_nchw, x2_nchw):
    x1 = jnp.transpose(x1_nchw, (0, 2, 3, 1)).astype(jnp.float32)
    x2 = jnp.transpose(x2_nchw, (0, 2, 3, 1)).astype(jnp.float32)
    x1 = upsample_bilinear_x2_align_corners(x1)
    diffY = x2.shape[1] - x1.shape[1]
    diffX = x2.shape[2] - x1.shape[2]
    x1 = jnp.pad(x1, ((0, 0),
                      (diffY // 2, diffY - diffY // 2),
                      (diffX // 2, diffX - diffX // 2),
                      (0, 0)))
    x = jnp.concatenate([x2, x1], axis=-1)

    def stage(x, w3, b3, w1, b1, gamma, beta):
        y = lax.conv_general_dilated(
            x, _grouped3x3_to_dense(w3), (1, 1), ((1, 1), (1, 1)),
            dimension_numbers=('NHWC', 'HWIO', 'NHWC'))
        y = y + b3
        y = jnp.einsum('nhwc,cd->nhwd', y, w1[:, :, 0, 0].T) + b1
        return _ref_bn_relu(y, gamma, beta)

    y = stage(x, params['w3a'], params['b3a'], params['w1a'], params['b1a'],
              params['gammaA'], params['betaA'])
    y = stage(y, params['w3b'], params['b3b'], params['w1b'], params['b1b'],
              params['gammaB'], params['betaB'])
    return jnp.transpose(y, (0, 3, 1, 2))


# ----------------------------- main -----------------------------

if __name__ == "__main__":
    key = jax.random.PRNGKey(0)
    k1, k2, kp = jax.random.split(key, 3)

    in_channels, out_channels = 8, 8
    N = 2
    # x1 comes from the deeper (coarser) stage: half channels, half spatial.
    x1 = jax.random.normal(k1, (N, in_channels // 2, 8, 8), jnp.float32)
    x2 = jax.random.normal(k2, (N, in_channels // 2, 16, 16), jnp.float32)
    params = init_up_params(kp, in_channels, out_channels)

    out = jax.block_until_ready(up_forward(params, x1, x2))
    ref = jax.block_until_ready(ref_forward(params, x1, x2))

    assert out.shape == (N, out_channels, 16, 16), out.shape
    assert bool(jnp.all(jnp.isfinite(out)))
    assert bool(jnp.allclose(out, ref, rtol=1e-3, atol=1e-3)), \
        float(jnp.max(jnp.abs(out - ref)))
    print("KERNEL_OK")
</pallas_src>

<mosaic_0001>
module attributes {stable_mosaic.version = 11 : i64} {
  func.func @_conv_a_kernel(%arg0: i32, %arg1: memref<1x18x18x4xf32, #tpu.memory_space<vmem>>, %arg2: memref<1x18x18x4xf32, #tpu.memory_space<vmem>>, %arg3: memref<36x4xf32, #tpu.memory_space<vmem>>, %arg4: memref<36x4xf32, #tpu.memory_space<vmem>>, %arg5: memref<1x4xf32, #tpu.memory_space<vmem>>, %arg6: memref<1x256x4xf32, #tpu.memory_space<vmem>>, %arg7: memref<1x2x4xf32, #tpu.memory_space<vmem>>) attributes {dimension_semantics = [#tpu.dimension_semantics<parallel>], iteration_bounds = array<i64: 2>, scalar_prefetch = 0 : i64, scratch_operands = 0 : i64, tpu.core_type = #tpu.core_type<tc>, window_params = [{transform_indices = @transform_0, window_bounds = array<i64: 1, 18, 18, 4>}, {transform_indices = @transform_1, window_bounds = array<i64: 1, 18, 18, 4>}, {pipeline_mode = #tpu.pipeline_mode<synchronous>, transform_indices = @transform_2, window_bounds = array<i64: 36, 4>}, {pipeline_mode = #tpu.pipeline_mode<synchronous>, transform_indices = @transform_3, window_bounds = array<i64: 36, 4>}, {pipeline_mode = #tpu.pipeline_mode<synchronous>, transform_indices = @transform_4, window_bounds = array<i64: 1, 4>}, {transform_indices = @transform_5, window_bounds = array<i64: 1, 256, 4>}, {transform_indices = @transform_6, window_bounds = array<i64: 1, 2, 4>}]} {
    %c0 = arith.constant 0 : index
    %c0_0 = arith.constant 0 : index
    %c0_1 = arith.constant 0 : index
    %c0_2 = arith.constant 0 : index
    %0 = vector.load %arg1[%c0, %c0_0, %c0_1, %c0_2] : memref<1x18x18x4xf32, #tpu.memory_space<vmem>>, vector<1x18x18x4xf32>
    %1 = vector.shape_cast %0 : vector<1x18x18x4xf32> to vector<18x18x4xf32>
    %2 = vector.extract_strided_slice %1 {offsets = [0, 0, 0], sizes = [16, 16, 4], strides = [1, 1, 1]} : vector<18x18x4xf32> to vector<16x16x4xf32>
    %3 = vector.extract_strided_slice %1 {offsets = [0, 1, 0], sizes = [16, 16, 4], strides = [1, 1, 1]} : vector<18x18x4xf32> to vector<16x16x4xf32>
    %4 = vector.extract_strided_slice %1 {offsets = [0, 2, 0], sizes = [16, 16, 4], strides = [1, 1, 1]} : vector<18x18x4xf32> to vector<16x16x4xf32>
    %5 = vector.extract_strided_slice %1 {offsets = [1, 0, 0], sizes = [16, 16, 4], strides = [1, 1, 1]} : vector<18x18x4xf32> to vector<16x16x4xf32>
    %6 = vector.extract_strided_slice %1 {offsets = [1, 1, 0], sizes = [16, 16, 4], strides = [1, 1, 1]} : vector<18x18x4xf32> to vector<16x16x4xf32>
    %7 = vector.extract_strided_slice %1 {offsets = [1, 2, 0], sizes = [16, 16, 4], strides = [1, 1, 1]} : vector<18x18x4xf32> to vector<16x16x4xf32>
    %8 = vector.extract_strided_slice %1 {offsets = [2, 0, 0], sizes = [16, 16, 4], strides = [1, 1, 1]} : vector<18x18x4xf32> to vector<16x16x4xf32>
    %9 = vector.extract_strided_slice %1 {offsets = [2, 1, 0], sizes = [16, 16, 4], strides = [1, 1, 1]} : vector<18x18x4xf32> to vector<16x16x4xf32>
    %10 = vector.extract_strided_slice %1 {offsets = [2, 2, 0], sizes = [16, 16, 4], strides = [1, 1, 1]} : vector<18x18x4xf32> to vector<16x16x4xf32>
    %11 = tpu.concatenate %2, %3, %4, %5, %6, %7, %8, %9, %10 in 2 : vector<16x16x4xf32>, vector<16x16x4xf32>, vector<16x16x4xf32>, vector<16x16x4xf32>, vector<16x16x4xf32>, vector<16x16x4xf32>, vector<16x16x4xf32>, vector<16x16x4xf32>, vector<16x16x4xf32> -> vector<16x16x36xf32>
    %12 = vector.shape_cast %11 : vector<16x16x36xf32> to vector<256x36xf32>
    %c0_3 = arith.constant 0 : index
    %c0_4 = arith.constant 0 : index
    %13 = vector.load %arg3[%c0_3, %c0_4] : memref<36x4xf32, #tpu.memory_space<vmem>>, vector<36x4xf32>
    %cst = arith.constant dense<0.000000e+00> : vector<256x4xf32>
    %14 = tpu.matmul %12, %13, %cst {dimension_numbers = #tpu.dot_dimension_numbers<[1], [0], [0], [1], [0, 0, 1, 1], [], []>} : vector<256x36xf32>, vector<36x4xf32>, vector<256x4xf32> -> vector<256x4xf32>
    %c0_5 = arith.constant 0 : index
    %c0_6 = arith.constant 0 : index
    %c0_7 = arith.constant 0 : index
    %c0_8 = arith.constant 0 : index
    %15 = vector.load %arg2[%c0_5, %c0_6, %c0_7, %c0_8] : memref<1x18x18x4xf32, #tpu.memory_space<vmem>>, vector<1x18x18x4xf32>
    %16 = vector.shape_cast %15 : vector<1x18x18x4xf32> to vector<18x18x4xf32>
    %17 = vector.extract_strided_slice %16 {offsets = [0, 0, 0], sizes = [16, 16, 4], strides = [1, 1, 1]} : vector<18x18x4xf32> to vector<16x16x4xf32>
    %18 = vector.extract_strided_slice %16 {offsets = [0, 1, 0], sizes = [16, 16, 4], strides = [1, 1, 1]} : vector<18x18x4xf32> to vector<16x16x4xf32>
    %19 = vector.extract_strided_slice %16 {offsets = [0, 2, 0], sizes = [16, 16, 4], strides = [1, 1, 1]} : vector<18x18x4xf32> to vector<16x16x4xf32>
    %20 = vector.extract_strided_slice %16 {offsets = [1, 0, 0], sizes = [16, 16, 4], strides = [1, 1, 1]} : vector<18x18x4xf32> to vector<16x16x4xf32>
    %21 = vector.extract_strided_slice %16 {offsets = [1, 1, 0], sizes = [16, 16, 4], strides = [1, 1, 1]} : vector<18x18x4xf32> to vector<16x16x4xf32>
    %22 = vector.extract_strided_slice %16 {offsets = [1, 2, 0], sizes = [16, 16, 4], strides = [1, 1, 1]} : vector<18x18x4xf32> to vector<16x16x4xf32>
    %23 = vector.extract_strided_slice %16 {offsets = [2, 0, 0], sizes = [16, 16, 4], strides = [1, 1, 1]} : vector<18x18x4xf32> to vector<16x16x4xf32>
    %24 = vector.extract_strided_slice %16 {offsets = [2, 1, 0], sizes = [16, 16, 4], strides = [1, 1, 1]} : vector<18x18x4xf32> to vector<16x16x4xf32>
    %25 = vector.extract_strided_slice %16 {offsets = [2, 2, 0], sizes = [16, 16, 4], strides = [1, 1, 1]} : vector<18x18x4xf32> to vector<16x16x4xf32>
    %26 = tpu.concatenate %17, %18, %19, %20, %21, %22, %23, %24, %25 in 2 : vector<16x16x4xf32>, vector<16x16x4xf32>, vector<16x16x4xf32>, vector<16x16x4xf32>, vector<16x16x4xf32>, vector<16x16x4xf32>, vector<16x16x4xf32>, vector<16x16x4xf32>, vector<16x16x4xf32> -> vector<16x16x36xf32>
    %27 = vector.shape_cast %26 : vector<16x16x36xf32> to vector<256x36xf32>
    %c0_9 = arith.constant 0 : index
    %c0_10 = arith.constant 0 : index
    %28 = vector.load %arg4[%c0_9, %c0_10] : memref<36x4xf32, #tpu.memory_space<vmem>>, vector<36x4xf32>
    %cst_11 = arith.constant dense<0.000000e+00> : vector<256x4xf32>
    %29 = tpu.matmul %27, %28, %cst_11 {dimension_numbers = #tpu.dot_dimension_numbers<[1], [0], [0], [1], [0, 0, 1, 1], [], []>} : vector<256x36xf32>, vector<36x4xf32>, vector<256x4xf32> -> vector<256x4xf32>
    %30 = arith.addf %14, %29 : vector<256x4xf32>
    %c0_12 = arith.constant 0 : index
    %c0_13 = arith.constant 0 : index
    %31 = vector.load %arg5[%c0_12, %c0_13] : memref<1x4xf32, #tpu.memory_space<vmem>>, vector<1x4xf32>
    %32 = vector.broadcast %31 : vector<1x4xf32> to vector<256x4xf32>
    %33 = arith.addf %30, %32 : vector<256x4xf32>
    %c0_14 = arith.constant 0 : index
    %c0_15 = arith.constant 0 : index
    %c0_16 = arith.constant 0 : index
    %34 = vector.load %arg6[%c0_14, %c0_15, %c0_16] : memref<1x256x4xf32, #tpu.memory_space<vmem>>, vector<1x256x4xf32>
    %35 = vector.shape_cast %34 : vector<1x256x4xf32> to vector<256x4xf32>
    %36 = vector.shape_cast %33 : vector<256x4xf32> to vector<1x256x4xf32>
    tpu.vector_store %arg6[%c0_14, %c0_15, %c0_16], %36 {strides = array<i32>} : memref<1x256x4xf32, #tpu.memory_space<vmem>>, vector<1x256x4xf32>,
    %cst_17 = arith.constant dense<0.000000e+00> : vector<4xf32>
    %37 = vector.multi_reduction <add>, %33, %cst_17 [0] : vector<256x4xf32> to vector<4xf32>
    %38 = vector.shape_cast %37 : vector<4xf32> to vector<1x4xf32>
    %c0_18 = arith.constant 0 : index
    %c0_19 = arith.constant 0 : index
    %c0_20 = arith.constant 0 : index
    %39 = vector.load %arg7[%c0_18, %c0_19, %c0_20] : memref<1x2x4xf32, #tpu.memory_space<vmem>>, vector<1x1x4xf32>
    %40 = vector.shape_cast %39 : vector<1x1x4xf32> to vector<1x4xf32>
    %41 = vector.shape_cast %38 : vector<1x4xf32> to vector<1x1x4xf32>
    tpu.vector_store %arg7[%c0_18, %c0_19, %c0_20], %41 {strides = array<i32>} : memref<1x2x4xf32, #tpu.memory_space<vmem>>, vector<1x1x4xf32>,
    %42 = arith.mulf %33, %33 : vector<256x4xf32>
    %cst_21 = arith.constant dense<0.000000e+00> : vector<4xf32>
    %43 = vector.multi_reduction <add>, %42, %cst_21 [0] : vector<256x4xf32> to vector<4xf32>
    %44 = vector.shape_cast %43 : vector<4xf32> to vector<1x4xf32>
    %c0_22 = arith.constant 0 : index
    %c1 = arith.constant 1 : index
    %c0_23 = arith.constant 0 : index
    %45 = vector.load %arg7[%c0_22, %c1, %c0_23] : memref<1x2x4xf32, #tpu.memory_space<vmem>>, vector<1x1x4xf32>
    %46 = vector.shape_cast %45 : vector<1x1x4xf32> to vector<1x4xf32>
    %47 = vector.shape_cast %44 : vector<1x4xf32> to vector<1x1x4xf32>
    tpu.vector_store %arg7[%c0_22, %c1, %c0_23], %47 {strides = array<i32>} : memref<1x2x4xf32, #tpu.memory_space<vmem>>, vector<1x1x4xf32>,
    return
  }
  func.func @transform_0(%arg0: i32) -> (i32, i32, i32, i32) {
    %c0_i32 = arith.constant 0 : i32
    %c0_i32_0 = arith.constant 0 : i32
    %c0_i32_1 = arith.constant 0 : i32
    %c0_i32_2 = arith.constant 0 : i32
    return %arg0, %c0_i32, %c0_i32_0, %c0_i32_1 : i32, i32, i32, i32
  }
  func.func @transform_1(%arg0: i32) -> (i32, i32, i32, i32) {
    %c0_i32 = arith.constant 0 : i32
    %c0_i32_0 = arith.constant 0 : i32
    %c0_i32_1 = arith.constant 0 : i32
    %c0_i32_2 = arith.constant 0 : i32
    return %arg0, %c0_i32, %c0_i32_0, %c0_i32_1 : i32, i32, i32, i32
  }
  func.func @transform_2(%arg0: i32) -> (i32, i32) {
    %c0_i32 = arith.constant 0 : i32
    %c0_i32_0 = arith.constant 0 : i32
    %c0_i32_1 = arith.constant 0 : i32
    return %c0_i32, %c0_i32_0 : i32, i32
  }
  func.func @transform_3(%arg0: i32) -> (i32, i32) {
    %c0_i32 = arith.constant 0 : i32
    %c0_i32_0 = arith.constant 0 : i32
    %c0_i32_1 = arith.constant 0 : i32
    return %c0_i32, %c0_i32_0 : i32, i32
  }
  func.func @transform_4(%arg0: i32) -> (i32, i32) {
    %c0_i32 = arith.constant 0 : i32
    %c0_i32_0 = arith.constant 0 : i32
    %c0_i32_1 = arith.constant 0 : i32
    return %c0_i32, %c0_i32_0 : i32, i32
  }
  func.func @transform_5(%arg0: i32) -> (i32, i32, i32) {
    %c0_i32 = arith.constant 0 : i32
    %c0_i32_0 = arith.constant 0 : i32
    %c0_i32_1 = arith.constant 0 : i32
    return %arg0, %c0_i32, %c0_i32_0 : i32, i32, i32
  }
  func.func @transform_6(%arg0: i32) -> (i32, i32, i32) {
    %c0_i32 = arith.constant 0 : i32
    %c0_i32_0 = arith.constant 0 : i32
    %c0_i32_1 = arith.constant 0 : i32
    return %arg0, %c0_i32, %c0_i32_0 : i32, i32, i32
  }
}

</mosaic_0001>

<bundles_post_ra>
// kernel: tpu_custom_call.1
= control target key start
LH: loop header
LB: loop body
LE: loop exit
PB: predicated region body
PF: predicated region fallthrough
CT: control target
= control target key end

     0   :  { %12 = vsyncpa [#allocation3], 0  ;;  %s8289_s0 = inlined_call_operand.vmem [shape: f32[2,18,18,4], index: 0, kind: input, shape index: {}]   ;;  %s8290_s1 = inlined_call_operand.vmem [shape: f32[2,18,18,4], index: 1, kind: input, shape index: {}]   ;;  %s8291_s2 = inlined_call_operand.vmem [shape: f32[36,4], index: 2, kind: input, shape index: {}]   ;;  %s8292_s3 = inlined_call_operand.vmem [shape: f32[36,4], index: 3, kind: input, shape index: {}]   ;;  %s8293_s4 = inlined_call_operand.vmem [shape: f32[1,4], index: 4, kind: input, shape index: {}]   ;;  %s8294_s5 = inlined_call_operand.vmem [shape: f32[2,256,4], index: 5, kind: output, shape index: {0}]   ;;  %s8295_s6 = inlined_call_operand.hbm [shape: f32[2,2,4], index: 6, kind: output, shape index: {1}]  }
   0x1   :  { %14 = vsyncpa [#allocation3 + $0x1], 0  ;;  %s4033_s21 = smov 0   ;;  %s4035_s22 = smov 0  }
   0x2   :  { %s4037_s23 = smov 0   ;;  %s4039_s24 = smov 0  }
   0x3 LB: > { %s4054_s25 = sadd.s32 4294967295, %s3988_s24   ;;  %s3714_s26 = sadd.s32 4294967294, %s3988_s24   ;;  %s3988_s24 = sphi %s4039_s24, %s9404_s24   ;;  %s3984_s23 = sphi %s4037_s23, %s9403_s23   ;;  %s3980_s22 = sphi %s4035_s22, %s9402_s22   ;;  %s3976_s21 = sphi %s4033_s21, %s9401_s21  }
   0x4   : > { %s4058_s27 = sadd.s32 1, %s3988_s24   ;;  %s168_s28 = sadd.s32 1, %s3984_s23 }
   0x5   : > { %s165_s29 = ssub.s32 %s3988_s24, %s4058_s27  ;;  %p178_p0 = scmp.ne.s32.totalorder %s3984_s23, %s3980_s22 }
   0x6   : > { %p166_p1 = scmp.eq.s32.totalorder %s165_s29, 0  ;;  %p179_p2 = scmp.eq.s32.totalorder %s4054_s25, 1 }
   0x7   : > { %p184_p3 = scmp.ne.s32.totalorder %s3980_s22, %s3976_s21  ;;  %p185_p4 = scmp.eq.s32.totalorder %s3714_s26, 1 }
   0x8   : > { %s4069_s30 = scalar_select %p166_p1, %s3984_s23, %s168_s28  }
   0x9   : > { %p4071_p5 = por %p179_p2, %p178_p0  ;;  %p4075_p6 = por %p185_p4, %p184_p3 }
   0xa   : > { %p3717_p7 = scmp.ge.s32.totalorder %s3988_s24, 1  ;;  %p228_p8 = scmp.lt.s32.totalorder %s3988_s24, 3 }
   0xc   : > { %p229_p9 = pnand %p3717_p7, %p228_p8 }
   0xe   : > { %232 = sbr.rel (%p229_p9) target bundleno = 1665 (0x681), region = 40 }
  0x13   : > { %p268_p10 = scmp.lt.s32.totalorder %s4054_s25, 1  ;;  %vm385_vm0 = vcmask 1046528   ;;  %s3990_s14 = smov 4   ;;  %vm562_vm1 = vcmask 1045504   ;;  %vm3024_vm2 = vcmask 1043456   ;;  %vm1341_vm3 = vcmask 31744  }
  0x14   : > { %s3991_s15 = smov 8   ;;  %s3992_s16 = smov 12   ;;  %vm1374_vm4 = vcmask 64512   ;;  %vm1407_vm5 = vcmask 97280   ;;  %vm1473_vm6 = vcmask 162816   ;;  %vm1440_vm7 = vcmask 130048  }
  0x15   : > { %s4083_s9 = scalar_select %p268_p10, %s4054_s25, 1  ;;  %vm1506_vm8 = vcmask 195584   ;;  %vm1572_vm9 = vcmask 261120   ;;  %vm1539_vm10 = vcmask 228352   ;;  %vm2927_vm11 = vcmask 293888  }
  0x16   : > { %s3993_s17 = smov 16   ;;  %s3994_s18 = smov 20   ;;  %vm3490_vm12 = vcmask 24576  }
  0x17   : > { %s3804_s10 = smul.u32 432, %s4083_s9  ;;  %s8378_s19 = smov 24  }
  0x18   : > { %s8376_s20 = smov 28   ;;  %s3997_s26 = smov 32  }
  0x19   : > { %s4091_s13 = scalar_lea.vmem %s8289_s0, %s3804_s10  ;;  %s5509_s28 = scalar_lea.vmem %s8290_s1, %s3804_s10 }
  0x1a   : > { %v4094_v0 = vld [vmem:[%s4091_s13 + $0x30] sm:$0xff]  ;;  %v4097_v1 = vld [vmem:[%s4091_s13 + $0x38] sm:$0xff]  ;;  %v4105_v5 = vld [vmem:[%s4091_s13 + $0x20] sm:$0xff]  ;;  %s9240_s10 = smov 24  }
  0x1b   : > { %v4100_v2 = vld [vmem:[%s4091_s13 + $0x18] sm:$0xff]  ;;  %v396_v3 = vrot.slane %v4094_v0, 1  ;;  %v397_v4 = vrot.slane %v4097_v1, 1  ;;  %v4109_v7 = vld [vmem:[%s4091_s13] sm:$0xff]  ;;  %v4112_v8 = vld [vmem:[%s4091_s13 + $0x8] sm:$0xff]  ;;  %v392_v9 = vrot.slane %v4105_v5, 1 }
  0x1c   : > { %v391_v6 = vrot.slane %v4100_v2, 1  ;;  %v386_v10 = vrot.slane %v4109_v7, 1  ;;  %v387_v11 = vrot.slane %v4112_v8, 1  ;;  %v4118_v12 = vld [vmem:[%s4091_s13 + $0x40] sm:$0x3]  ;;  %v4152_v25 = vld [vmem:[%s4091_s13 + $0x68] sm:$0xff] }
  0x1d   : > { %v4121_v13 = vsel %vm385_vm0, %v396_v3, %v397_v4  ;;  %v4124_v14 = vld [vmem:[%s4091_s13 + $0x28] sm:$0x3]  ;;  %v4127_v15 = vld [vmem:[%s4091_s13 + $0x10] sm:$0x3]  ;;  %v399_v18 = vrot.slane %v4118_v12, 1  ;;  %v4149_v24 = vld [vmem:[%s4091_s13 + $0x60] sm:$0xff] }
  0x1e   : > { %474 = vrot.lane.b32.xlu2 %v4121_v13, %s3990_s14  ;;  %v4132_v16 = vsel %vm385_vm0, %v391_v6, %v392_v9  ;;  %v388_v17 = vsel %vm385_vm0, %v386_v10, %v387_v11  ;;  %v394_v19 = vrot.slane %v4124_v14, 1  ;;  %v389_v20 = vrot.slane %v4127_v15, 1  ;;  %v4155_v26 = vld [vmem:[%s4091_s13 + $0x50] sm:$0xff]  ;;  %v4158_v27 = vld [vmem:[%s4091_s13 + $0x58] sm:$0x3]  ;;  %v4161_v28 = vld [vmem:[%s4091_s13 + $0x48] sm:$0xff] }
  0x1f   : > { %470 = vrot.lane.b32.xlu1 %v4132_v16, %s3990_s14  ;;  %466 = vrot.lane.b32.xlu0 %v388_v17, %s3990_s14  ;;  %v4142_v21 = vsel %vm385_vm0, %v397_v4, %v399_v18  ;;  %v406_v29 = vrot.slane %v4149_v24, 1  ;;  %v407_v30 = vrot.slane %v4152_v25, 1  ;;  %v402_v31 = vrot.slane %v4155_v26, 1  ;;  %v4183_v37 = vld [vmem:[%s4091_s13 + $0x80] sm:$0xff]  ;;  %v4186_v38 = vld [vmem:[%s4091_s13 + $0x88] sm:$0x3] }
  0x20   : > { %v4145_v22 = vsel %vm385_vm0, %v392_v9, %v394_v19  ;;  %v390_v23 = vsel %vm385_vm0, %v387_v11, %v389_v20  ;;  %v404_v32 = vrot.slane %v4158_v27, 1  ;;  %v401_v33 = vrot.slane %v4161_v28, 1  ;;  %v4189_v39 = vld [vmem:[%s4091_s13 + $0x78] sm:$0xff]  ;;  %v4192_v40 = vld [vmem:[%s4091_s13 + $0x70] sm:$0x3]  ;;  %v4214_v48 = vld [vmem:[%s4091_s13 + $0xa8] sm:$0xff] }
  0x21   : > { %v4174_v34 = vsel %vm385_vm0, %v406_v29, %v407_v30  ;;  %v412_v41 = vrot.slane %v4183_v37, 1  ;;  %v414_v42 = vrot.slane %v4186_v38, 1  ;;  %v411_v43 = vrot.slane %v4189_v39, 1  ;;  %v4217_v49 = vld [vmem:[%s4091_s13 + $0xb0] sm:$0xff]  ;;  %v4220_v50 = vld [vmem:[%s4091_s13 + $0x98] sm:$0xff]  ;;  %v4249_v61 = vld [vmem:[%s4091_s13 + $0xc8] sm:$0xff] }
  0x22   : > { %8515 = vst [vmem:[#allocation5_spill] sm:$0xff] %v4174_v34  ;;  %v4177_v35 = vsel %vm385_vm0, %v402_v31, %v404_v32  ;;  %v4180_v36 = vsel %vm385_vm0, %v401_v33, %v402_v31  ;;  %v409_v44 = vrot.slane %v4192_v40, 1  ;;  %v4223_v51 = vld [vmem:[%s4091_s13 + $0xa0] sm:$0x3]  ;;  %v4226_v52 = vld [vmem:[%s4091_s13 + $0x90] sm:$0xff]  ;;  %v421_v53 = vrot.slane %v4214_v48, 1 }
  0x23   : > { %v4205_v45 = vsel %vm385_vm0, %v412_v41, %v414_v42  ;;  %v4208_v46 = vsel %vm385_vm0, %v411_v43, %v412_v41  ;;  %v422_v54 = vrot.slane %v4217_v49, 1  ;;  %v417_v55 = vrot.slane %v4220_v50, 1  ;;  %v4252_v62 = vld [vmem:[%s4091_s13 + $0xd0] sm:$0x3]  ;;  %v4255_v63 = vld [vmem:[%s4091_s13 + $0xc0] sm:$0xff]  ;;  %v4283_v20 = vld [vmem:[%s4091_s13 + $0xf8] sm:$0xff] }
  0x24   : > { %8516 = vst [vmem:[#allocation6_spill] sm:$0xff] %v4205_v45  ;;  %v4211_v47 = vsel %vm385_vm0, %v407_v30, %v409_v44  ;;  %v419_v56 = vrot.slane %v4223_v51, 1  ;;  %v416_v57 = vrot.slane %v4226_v52, 1  ;;  %v4258_v3 = vld [vmem:[%s4091_s13 + $0xb8] sm:$0x3]  ;;  %v427_v4 = vrot.slane %v4249_v61, 1 }
  0x25   : > { %8517 = vst [vmem:[#allocation7_spill] sm:$0xff] %v4208_v46  ;;  %v4240_v58 = vsel %vm385_vm0, %v421_v53, %v422_v54  ;;  %v429_v6 = vrot.slane %v4252_v62, 1  ;;  %v426_v9 = vrot.slane %v4255_v63, 1  ;;  %v424_v10 = vrot.slane %v4258_v3, 1  ;;  %v4280_v19 = vld [vmem:[%s4091_s13 + $0xf0] sm:$0xff]  ;;  %v4292_v30 = vld [vmem:[%s4091_s13 + $0xd8] sm:$0xff] }
  0x26   : > { %476 = vrot.lane.b32.xlu2 %v4142_v21, %s3990_s14  ;;  %8518 = vst [vmem:[#allocation8_spill] sm:$0xff] %v4211_v47  ;;  %v4243_v59 = vsel %vm385_vm0, %v417_v55, %v419_v56  ;;  %v4246_v60 = vsel %vm385_vm0, %v416_v57, %v417_v55  ;;  %v4289_v29 = vld [vmem:[%s4091_s13 + $0xe8] sm:$0x3]  ;;  %v436_v31 = vrot.slane %v4280_v19, 1  ;;  %v437_v32 = vrot.slane %v4283_v20, 1 }
  0x27   : > { %472 = vrot.lane.b32.xlu1 %v4145_v22, %s3990_s14  ;;  %468 = vrot.lane.b32.xlu0 %v390_v23, %s3990_s14  ;;  %8519 = vst [vmem:[#allocation9_spill] sm:$0xff] %v4240_v58  ;;  %v4271_v11 = vsel %vm385_vm0, %v427_v4, %v429_v6  ;;  %v4274_v17 = vsel %vm385_vm0, %v426_v9, %v427_v4  ;;  %v4286_v23 = vld [vmem:[%s4091_s13 + $0xe0] sm:$0xff]  ;;  %v434_v41 = vrot.slane %v4289_v29, 1  ;;  %v431_v42 = vrot.slane %v4292_v30, 1  ;;  %v4318_v55 = vld [vmem:[%s4091_s13 + $0x118] sm:$0x3] }
  0x28   : > { %8520 = vst [vmem:[#allocation10_spill] sm:$0xff] %v4243_v59  ;;  %v4277_v18 = vsel %vm385_vm0, %v422_v54, %v424_v10  ;;  %v432_v33 = vrot.slane %v4286_v23, 1  ;;  %v4306_v43 = vsel %vm385_vm0, %v436_v31, %v437_v32  ;;  %v4315_v54 = vld [vmem:[%s4091_s13 + $0x110] sm:$0xff]  ;;  %v4321_v56 = vld [vmem:[%s4091_s13 + $0x108] sm:$0xff]  ;;  %v4324_v57 = vld [vmem:[%s4091_s13 + $0x100] sm:$0x3] }
  0x29   : > { %8521 = vst [vmem:[#allocation11_spill] sm:$0xff] %v4246_v60  ;;  %v442_v4 = vrot.slane %v4315_v54, 1  ;;  %v444_v6 = vrot.slane %v4318_v55, 1  ;;  %v441_v9 = vrot.slane %v4321_v56, 1  ;;  %v439_v10 = vrot.slane %v4324_v57, 1 }
  0x2a   : > { %8522 = vst [vmem:[#allocation12_spill] sm:$0xff] %v4271_v11  ;;  %v4309_v44 = vsel %vm385_vm0, %v432_v33, %v434_v41  ;;  %v4312_v53 = vsel %vm385_vm0, %v431_v42, %v432_v33  ;;  %v4346_v42 = vld [vmem:[%s4091_s13 + $0x138] sm:$0xff] }
  0x2b   : > { %8523 = vst [vmem:[#allocation13_spill] sm:$0xff] %v4274_v17  ;;  %v4337_v31 = vsel %vm385_vm0, %v442_v4, %v444_v6  ;;  %v4340_v33 = vsel %vm385_vm0, %v441_v9, %v442_v4  ;;  %v4343_v41 = vsel %vm385_vm0, %v437_v32, %v439_v10  ;;  %v4358_v6 = vld [vmem:[%s4091_s13 + $0x120] sm:$0xff]  ;;  %v451_v32 = vrot.slane %v4346_v42, 1 }
  0x2c   : > { %8524 = vst [vmem:[#allocation14_spill] sm:$0xff] %v4277_v18 }
  0x2d   : > { %8525 = vst [vmem:[#allocation15_spill] sm:$0xff] %v4306_v43 }
  0x2e   : > { %482 = vrot.lane.b32.xlu2 %v4174_v34, %s3990_s14  ;;  %8526 = vst [vmem:[#allocation16_spill] sm:$0xff] %v4309_v44  ;;  %v4418_v34 = vld [vmem:[%s4091_s13 + $0x168] sm:$0xff] }
  0x2f   : > { %480 = vrot.lane.b32.xlu1 %v4177_v35, %s3990_s14  ;;  %478 = vrot.lane.b32.xlu0 %v4180_v36, %s3990_s14  ;;  %8527 = vst [vmem:[#allocation17_spill] sm:$0xff] %v4312_v53 }
  0x30   : > { %8528 = vst [vmem:[#allocation18_spill] sm:$0xff] %v4337_v31 }
  0x31   : > { %8529 = vst [vmem:[#allocation19_spill] sm:$0xff] %v4340_v33 }
  0x32   : > { %8530 = vst [vmem:[#allocation20_spill] sm:$0xff] %v4343_v41 }
  0x36   : > { %488 = vrot.lane.b32.xlu2 %v4205_v45, %s3990_s14  ;;  %v4390_v45 = vld [vmem:[%s4091_s13 + $0x148] sm:$0x3] }
  0x37   : > { %486 = vrot.lane.b32.xlu1 %v4208_v46, %s3990_s14  ;;  %484 = vrot.lane.b32.xlu0 %v4211_v47, %s3990_s14 }
  0x3e   : > { %494 = vrot.lane.b32.xlu2 %v4240_v58, %s3990_s14 }
  0x3f   : > { %492 = vrot.lane.b32.xlu1 %v4243_v59, %s3990_s14  ;;  %490 = vrot.lane.b32.xlu0 %v4246_v60, %s3990_s14 }
  0x46   : > { %500 = vrot.lane.b32.xlu2 %v4271_v11, %s3990_s14  ;;  %v4352_v11 = vld [vmem:[%s4091_s13 + $0x128] sm:$0xff] }
  0x47   : > { %498 = vrot.lane.b32.xlu1 %v4274_v17, %s3990_s14  ;;  %496 = vrot.lane.b32.xlu0 %v4277_v18, %s3990_s14  ;;  %v447_v9 = vrot.slane %v4352_v11, 1  ;;  %v4384_v18 = vld [vmem:[%s4091_s13 + $0x160] sm:$0x3]  ;;  %v4387_v17 = vld [vmem:[%s4091_s13 + $0x150] sm:$0xff] }
  0x4e   : > { %506 = vrot.lane.b32.xlu2 %v4306_v43, %s3990_s14  ;;  %v4349_v43 = vld [vmem:[%s4091_s13 + $0x140] sm:$0xff] }
  0x4f   : > { %504 = vrot.lane.b32.xlu1 %v4309_v44, %s3990_s14  ;;  %502 = vrot.lane.b32.xlu0 %v4312_v53, %s3990_s14  ;;  %v4355_v53 = vld [vmem:[%s4091_s13 + $0x130] sm:$0x3]  ;;  %v452_v4 = vrot.slane %v4349_v43, 1  ;;  %v446_v44 = vrot.slane %v4358_v6, 1 }
  0x50   : > { %v449_v10 = vrot.slane %v4355_v53, 1 }
  0x51   : > { %v4372_v58 = vsel %vm385_vm0, %v451_v32, %v452_v4  ;;  %v459_v32 = vrot.slane %v4384_v18, 1 }
  0x52   : > { %8531 = vst [vmem:[#allocation21_spill] sm:$0xff] %v4372_v58 }
  0x56   : > { %512 = vrot.lane.b32.xlu2 %v4337_v31, %s3990_s14  ;;  %v4375_v31 = vsel %vm385_vm0, %v447_v9, %v449_v10  ;;  %v454_v10 = vrot.slane %v4390_v45, 1 }
  0x57   : > { %510 = vrot.lane.b32.xlu1 %v4340_v33, %s3990_s14  ;;  %508 = vrot.lane.b32.xlu0 %v4343_v41, %s3990_s14  ;;  %8532 = vst [vmem:[#allocation22_spill] sm:$0xff] %v4375_v31  ;;  %v4378_v33 = vsel %vm385_vm0, %v446_v44, %v447_v9  ;;  %v4381_v41 = vld [vmem:[%s4091_s13 + $0x158] sm:$0xff]  ;;  %v456_v9 = vrot.slane %v4387_v17, 1 }
  0x58   : > { %8533 = vst [vmem:[#allocation23_spill] sm:$0xff] %v4378_v33  ;;  %v457_v44 = vrot.slane %v4381_v41, 1 }
  0x5a   : > { %v4403_v60 = vsel %vm385_vm0, %v457_v44, %v459_v32  ;;  %v4406_v59 = vsel %vm385_vm0, %v456_v9, %v457_v44  ;;  %v563_v44 = vrot.slane %v4109_v7, 2  ;;  %v569_v7 = vrot.slane %v4105_v5, 2 }
  0x5b   : > { %8534 = vst [vmem:[#allocation24_spill] sm:$0xff] %v4403_v60 }
  0x5c   : > { %8535 = vst [vmem:[#allocation25_spill] sm:$0xff] %v4406_v59 }
  0x5e   : > { %518 = vrot.lane.b32.xlu2 %v4372_v58, %s3990_s14  ;;  %v4409_v58 = vsel %vm385_vm0, %v452_v4, %v454_v10  ;;  %v564_v4 = vrot.slane %v4112_v8, 2  ;;  %v461_v10 = vrot.slane %v4418_v34, 1  ;;  %v571_v8 = vrot.slane %v4124_v14, 2 }
  0x5f   : > { %516 = vrot.lane.b32.xlu1 %v4375_v31, %s3990_s14  ;;  %514 = vrot.lane.b32.xlu0 %v4378_v33, %s3990_s14  ;;  %8536 = vst [vmem:[#allocation26_spill] sm:$0xff] %v4409_v58  ;;  %v4412_v31 = vld [vmem:[%s4091_s13 + $0x170] sm:$0xff]  ;;  %v4415_v33 = vld [vmem:[%s4091_s13 + $0x178] sm:$0x3]  ;;  %v578_v14 = vrot.slane %v4161_v28, 2 }
  0x60   : > { %v462_v32 = vrot.slane %v4412_v31, 1  ;;  %v464_v9 = vrot.slane %v4415_v33, 1  ;;  %v565_v47 = vsel %vm562_vm1, %v563_v44, %v564_v4  ;;  %v568_v44 = vrot.slane %v4100_v2, 2 }
  0x66   : > { %524 = vrot.lane.b32.xlu2 %v4403_v60, %s3990_s14  ;;  %v4433_v60 = vsel %vm385_vm0, %v462_v32, %v464_v9  ;;  %v566_v9 = vrot.slane %v4127_v15, 2  ;;  %v579_v15 = vrot.slane %v4155_v26, 2 }
  0x67   : > { %522 = vrot.lane.b32.xlu1 %v4406_v59, %s3990_s14  ;;  %520 = vrot.lane.b32.xlu0 %v4409_v58, %s3990_s14  ;;  %8537 = vst [vmem:[#allocation27_spill] sm:$0xff] %v4433_v60  ;;  %v4436_v59 = vsel %vm385_vm0, %v461_v10, %v462_v32  ;;  %v4448_v32 = vsel %vm562_vm1, %v569_v7, %v571_v8  ;;  %v574_v8 = vrot.slane %v4097_v1, 2 }
  0x68   : > { %8538 = vst [vmem:[#allocation28_spill] sm:$0xff] %v4436_v59  ;;  %v4451_v10 = vsel %vm562_vm1, %v568_v44, %v569_v7  ;;  %v576_v7 = vrot.slane %v4118_v12, 2  ;;  %v4467_v44 = vsel %vm562_vm1, %v578_v14, %v579_v15  ;;  %v584_v12 = vrot.slane %v4152_v25, 2 }
  0x69   : > { %8539 = vst [vmem:[#allocation29_spill] sm:$0xff] %v4448_v32  ;;  %v586_v14 = vrot.slane %v4192_v40, 2  ;;  %v594_v40 = vrot.slane %v4220_v50, 2 }
  0x6a   : > { %8541 = vst [vmem:[#allocation31_spill] sm:$0xff] %v4467_v44 }
  0x6e   : > { %643 = vrot.lane.b32.xlu2 %v565_v47, %s3991_s15  ;;  %v567_v47 = vsel %vm562_vm1, %v564_v4, %v566_v9  ;;  %v573_v4 = vrot.slane %v4094_v0, 2  ;;  %v4470_v9 = vsel %vm562_vm1, %v574_v8, %v576_v7  ;;  %v583_v7 = vrot.slane %v4149_v24, 2 }
  0x6f   : > { %528 = vrot.lane.b32.xlu1 %v4433_v60, %s3990_s14  ;;  %526 = vrot.lane.b32.xlu0 %v4436_v59, %s3990_s14  ;;  %8542 = vst [vmem:[#allocation32_spill] sm:$0xff] %v4470_v9 }
  0x76   : > { %649 = vrot.lane.b32.xlu2 %v4448_v32, %s3991_s15 }
  0x77   : > { %647 = vrot.lane.b32.xlu1 %v4451_v10, %s3991_s15  ;;  %645 = vrot.lane.b32.xlu0 %v567_v47, %s3991_s15  ;;  %v4473_v47 = vsel %vm562_vm1, %v573_v4, %v574_v8  ;;  %v581_v8 = vrot.slane %v4158_v27, 2  ;;  %v4488_v4 = vsel %vm562_vm1, %v584_v12, %v586_v14  ;;  %v593_v27 = vrot.slane %v4226_v52, 2 }
  0x78   : > { %v4461_v59 = vpop.permute.xlu2 %474  ;;  %8544 = vst [vmem:[#allocation34_spill] sm:$0xff] %v4488_v4 }
  0x79   : > { %8540 = vst [vmem:[#allocation30_spill] sm:$0xff] %v4461_v59  ;;  %v4494_v32 = vsel %vm562_vm1, %v579_v15, %v581_v8  ;;  %v591_v15 = vrot.slane %v4186_v38, 2  ;;  %v4510_v8 = vsel %vm562_vm1, %v593_v27, %v594_v40  ;;  %v599_v38 = vrot.slane %v4217_v49, 2 }
  0x7a   : > { %8546 = vst [vmem:[#allocation36_spill] sm:$0xff] %v4494_v32  ;;  %v601_v27 = vrot.slane %v4258_v3, 2  ;;  %v609_v3 = vrot.slane %v4286_v23, 2 }
  0x7b   : > { %8548 = vst [vmem:[#allocation38_spill] sm:$0xff] %v4510_v8 }
  0x7e   : > { %655 = vrot.lane.b32.xlu2 %v4467_v44, %s3991_s15  ;;  %v4491_v44 = vsel %vm562_vm1, %v583_v7, %v584_v12  ;;  %v589_v12 = vrot.slane %v4183_v37, 2  ;;  %v588_v7 = vrot.slane %v4189_v39, 2 }
  0x7f   : > { %653 = vrot.lane.b32.xlu1 %v4470_v9, %s3991_s15  ;;  %651 = vrot.lane.b32.xlu0 %v4473_v47, %s3991_s15  ;;  %8545 = vst [vmem:[#allocation35_spill] sm:$0xff] %v4491_v44 }
  0x80   : > { %v4483_v59 = vpop.permute.xlu2 %476 }
  0x81   : > { %8543 = vst [vmem:[#allocation33_spill] sm:$0xff] %v4483_v59  ;;  %v4513_v59 = vsel %vm562_vm1, %v589_v12, %v591_v15  ;;  %v598_v15 = vrot.slane %v4214_v48, 2 }
  0x82   : > { %8549 = vst [vmem:[#allocation39_spill] sm:$0xff] %v4513_v59 }
  0x86   : > { %661 = vrot.lane.b32.xlu2 %v4488_v4, %s3991_s15  ;;  %v4516_v4 = vsel %vm562_vm1, %v588_v7, %v589_v12  ;;  %v596_v12 = vrot.slane %v4223_v51, 2  ;;  %v608_v51 = vrot.slane %v4292_v30, 2 }
  0x87   : > { %659 = vrot.lane.b32.xlu1 %v4491_v44, %s3991_s15  ;;  %657 = vrot.lane.b32.xlu0 %v4494_v32, %s3991_s15  ;;  %8550 = vst [vmem:[#allocation40_spill] sm:$0xff] %v4516_v4 }
  0x88   : > { %v4504_v14 = vpop.permute.xlu2 %482 }
  0x89   : > { %8547 = vst [vmem:[#allocation37_spill] sm:$0xff] %v4504_v14 }
  0x8e   : > { %667 = vrot.lane.b32.xlu2 %v4510_v8, %s3991_s15  ;;  %v4535_v8 = vsel %vm562_vm1, %v599_v38, %v601_v27 }
  0x8f   : > { %665 = vrot.lane.b32.xlu1 %v4513_v59, %s3991_s15  ;;  %663 = vrot.lane.b32.xlu0 %v4516_v4, %s3991_s15  ;;  %8554 = vst [vmem:[#allocation44_spill] sm:$0xff] %v4535_v8  ;;  %v4538_v59 = vsel %vm562_vm1, %v598_v15, %v599_v38  ;;  %v4541_v4 = vsel %vm562_vm1, %v594_v40, %v596_v12  ;;  %v604_v38 = vrot.slane %v4249_v61, 2  ;;  %v606_v40 = vrot.slane %v4252_v62, 2 }
  0x90   : > { %v4526_v14 = vpop.permute.xlu2 %488  ;;  %8555 = vst [vmem:[#allocation45_spill] sm:$0xff] %v4538_v59  ;;  %v603_v15 = vrot.slane %v4255_v63, 2  ;;  %v614_v62 = vrot.slane %v4283_v20, 2 }
  0x91   : > { %8551 = vst [vmem:[#allocation41_spill] sm:$0xff] %v4526_v14  ;;  %v4530_v7 = vpop.permute.xlu1 %470  ;;  %v4532_v32 = vpop.permute.xlu0 %466 }
  0x92   : > { %8552 = vst [vmem:[#allocation42_spill] sm:$0xff] %v4530_v7  ;;  %v4561_v7 = vsel %vm562_vm1, %v608_v51, %v609_v3  ;;  %v616_v51 = vrot.slane %v4324_v57, 2  ;;  %v624_v57 = vrot.slane %v4352_v11, 2 }
  0x93   : > { %8553 = vst [vmem:[#allocation43_spill] sm:$0xff] %v4532_v32  ;;  %v4564_v32 = vsel %vm562_vm1, %v604_v38, %v606_v40  ;;  %v613_v40 = vrot.slane %v4280_v19, 2 }
  0x94   : > { %8559 = vst [vmem:[#allocation49_spill] sm:$0xff] %v4561_v7 }
  0x95   : > { %8560 = vst [vmem:[#allocation50_spill] sm:$0xff] %v4564_v32 }
  0x96   : > { %673 = vrot.lane.b32.xlu2 %v4535_v8, %s3991_s15  ;;  %v4567_v8 = vsel %vm562_vm1, %v603_v15, %v604_v38  ;;  %v611_v38 = vrot.slane %v4289_v29, 2  ;;  %v623_v29 = vrot.slane %v4358_v6, 2 }
  0x97   : > { %671 = vrot.lane.b32.xlu1 %v4538_v59, %s3991_s15  ;;  %669 = vrot.lane.b32.xlu0 %v4541_v4, %s3991_s15  ;;  %8561 = vst [vmem:[#allocation51_spill] sm:$0xff] %v4567_v8 }
  0x98   : > { %v4551_v27 = vpop.permute.xlu2 %494 }
  0x99   : > { %8556 = vst [vmem:[#allocation46_spill] sm:$0xff] %v4551_v27  ;;  %v4556_v12 = vpop.permute.xlu1 %472  ;;  %v4558_v14 = vpop.permute.xlu0 %468 }
  0x9a   : > { %8557 = vst [vmem:[#allocation47_spill] sm:$0xff] %v4556_v12 }
  0x9b   : > { %8558 = vst [vmem:[#allocation48_spill] sm:$0xff] %v4558_v14  ;;  %v4586_v14 = vsel %vm562_vm1, %v614_v62, %v616_v51 }
  0x9c   : > { %8565 = vst [vmem:[#allocation55_spill] sm:$0xff] %v4586_v14 }
  0x9e   : > { %679 = vrot.lane.b32.xlu2 %v4561_v7, %s3991_s15  ;;  %v4589_v7 = vsel %vm562_vm1, %v613_v40, %v614_v62  ;;  %v619_v62 = vrot.slane %v4315_v54, 2  ;;  %v618_v40 = vrot.slane %v4321_v56, 2 }
  0x9f   : > { %677 = vrot.lane.b32.xlu1 %v4564_v32, %s3991_s15  ;;  %675 = vrot.lane.b32.xlu0 %v4567_v8, %s3991_s15  ;;  %8566 = vst [vmem:[#allocation56_spill] sm:$0xff] %v4589_v7  ;;  %v4592_v8 = vsel %vm562_vm1, %v609_v3, %v611_v38  ;;  %v621_v3 = vrot.slane %v4318_v55, 2  ;;  %v629_v55 = vrot.slane %v4349_v43, 2 }
  0xa0   : > { %v4577_v27 = vpop.permute.xlu2 %500 }
  0xa1   : > { %8562 = vst [vmem:[#allocation52_spill] sm:$0xff] %v4577_v27  ;;  %v4581_v15 = vpop.permute.xlu1 %480  ;;  %v4583_v12 = vpop.permute.xlu0 %478 }
  0xa2   : > { %8563 = vst [vmem:[#allocation53_spill] sm:$0xff] %v4581_v15  ;;  %v4612_v15 = vsel %vm562_vm1, %v623_v29, %v624_v57  ;;  %v631_v29 = vrot.slane %v4390_v45, 2  ;;  %v638_v45 = vrot.slane %v4418_v34, 2 }
  0xa3   : > { %8564 = vst [vmem:[#allocation54_spill] sm:$0xff] %v4583_v12  ;;  %v4615_v12 = vsel %vm562_vm1, %v619_v62, %v621_v3  ;;  %v628_v3 = vrot.slane %v4346_v42, 2 }
  0xa4   : > { %8570 = vst [vmem:[#allocation60_spill] sm:$0xff] %v4612_v15 }
  0xa5   : > { %8571 = vst [vmem:[#allocation61_spill] sm:$0xff] %v4615_v12 }
  0xa6   : > { %685 = vrot.lane.b32.xlu2 %v4586_v14, %s3991_s15  ;;  %v4618_v14 = vsel %vm562_vm1, %v618_v40, %v619_v62  ;;  %v626_v62 = vrot.slane %v4355_v53, 2  ;;  %v639_v53 = vrot.slane %v4412_v31, 2 }
  0xa7   : > { %683 = vrot.lane.b32.xlu1 %v4589_v7, %s3991_s15  ;;  %681 = vrot.lane.b32.xlu0 %v4592_v8, %s3991_s15  ;;  %8572 = vst [vmem:[#allocation62_spill] sm:$0xff] %v4618_v14 }
  0xa8   : > { %v4602_v51 = vpop.permute.xlu2 %506 }
  0xa9   : > { %8567 = vst [vmem:[#allocation57_spill] sm:$0xff] %v4602_v51  ;;  %v4607_v38 = vpop.permute.xlu1 %486  ;;  %v4609_v27 = vpop.permute.xlu0 %484 }
  0xaa   : > { %8568 = vst [vmem:[#allocation58_spill] sm:$0xff] %v4607_v38 }
  0xab   : > { %8569 = vst [vmem:[#allocation59_spill] sm:$0xff] %v4609_v27  ;;  %v4637_v27 = vsel %vm562_vm1, %v629_v55, %v631_v29 }
  0xac   : > { %8576 = vst [vmem:[#allocation66_spill] sm:$0xff] %v4637_v27 }
  0xae   : > { %691 = vrot.lane.b32.xlu2 %v4612_v15, %s3991_s15  ;;  %v4640_v15 = vsel %vm562_vm1, %v628_v3, %v629_v55  ;;  %v634_v55 = vrot.slane %v4381_v41, 2  ;;  %v633_v3 = vrot.slane %v4387_v17, 2 }
  0xaf   : > { %689 = vrot.lane.b32.xlu1 %v4615_v12, %s3991_s15  ;;  %687 = vrot.lane.b32.xlu0 %v4618_v14, %s3991_s15  ;;  %8577 = vst [vmem:[#allocation67_spill] sm:$0xff] %v4640_v15  ;;  %v4643_v14 = vsel %vm562_vm1, %v624_v57, %v626_v62  ;;  %v636_v57 = vrot.slane %v4384_v18, 2 }
  0xb0   : > { %v4628_v38 = vpop.permute.xlu2 %512 }
  0xb1   : > { %8573 = vst [vmem:[#allocation63_spill] sm:$0xff] %v4628_v38  ;;  %v4632_v40 = vpop.permute.xlu1 %492  ;;  %v4634_v51 = vpop.permute.xlu0 %490 }
  0xb2   : > { %8574 = vst [vmem:[#allocation64_spill] sm:$0xff] %v4632_v40  ;;  %v4663_v40 = vsel %vm562_vm1, %v638_v45, %v639_v53  ;;  %v641_v45 = vrot.slane %v4415_v33, 2 }
  0xb3   : > { %8575 = vst [vmem:[#allocation65_spill] sm:$0xff] %v4634_v51  ;;  %v4666_v51 = vsel %vm562_vm1, %v634_v55, %v636_v57 }
  0xb4   : > { %8581 = vst [vmem:[#allocation71_spill] sm:$0xff] %v4666_v51 }
  0xb6   : > { %697 = vrot.lane.b32.xlu2 %v4637_v27, %s3991_s15  ;;  %v4669_v27 = vsel %vm562_vm1, %v633_v3, %v634_v55  ;;  %v4685_v55 = vsel %vm562_vm1, %v639_v53, %v641_v45 }
  0xb7   : > { %695 = vrot.lane.b32.xlu1 %v4640_v15, %s3991_s15  ;;  %693 = vrot.lane.b32.xlu0 %v4643_v14, %s3991_s15 }
  0xb8   : > { %v4653_v29 = vpop.permute.xlu2 %518 }
  0xb9   : > { %8578 = vst [vmem:[#allocation68_spill] sm:$0xff] %v4653_v29  ;;  %v4658_v62 = vpop.permute.xlu1 %498  ;;  %v4660_v38 = vpop.permute.xlu0 %496 }
  0xba   : > { %8579 = vst [vmem:[#allocation69_spill] sm:$0xff] %v4658_v62 }
  0xbb   : > { %8580 = vst [vmem:[#allocation70_spill] sm:$0xff] %v4660_v38 }
  0xbe   : > { %703 = vrot.lane.b32.xlu2 %v4663_v40, %s3991_s15 }
  0xbf   : > { %701 = vrot.lane.b32.xlu1 %v4666_v51, %s3991_s15  ;;  %699 = vrot.lane.b32.xlu0 %v4669_v27, %s3991_s15 }
  0xc0   : > { %v4677_v18 = vpop.permute.xlu2 %524 }
  0xc1   : > { %8582 = vst [vmem:[#allocation72_spill] sm:$0xff] %v4677_v18  ;;  %v4680_v29 = vpop.permute.xlu1 %504  ;;  %v4682_v57 = vpop.permute.xlu0 %502 }
  0xc2   : > { %8583 = vst [vmem:[#allocation73_spill] sm:$0xff] %v4680_v29 }
  0xc3   : > { %8584 = vst [vmem:[#allocation74_spill] sm:$0xff] %v4682_v57 }
  0xc6   : > { %743 = vrot.lane.b32.xlu2 %v4105_v5, %s3992_s16 }
  0xc7   : > { %741 = vrot.lane.b32.xlu1 %v4100_v2, %s3992_s16  ;;  %705 = vrot.lane.b32.xlu0 %v4685_v55, %s3991_s15 }
  0xc8   : > { %v4693_v3 = vpop.permute.xlu2 %643 }
  0xc9   : > { %8585 = vst [vmem:[#allocation75_spill] sm:$0xff] %v4693_v3  ;;  %v4695_v33 = vpop.permute.xlu1 %510  ;;  %v4697_v18 = vpop.permute.xlu0 %508 }
  0xca   : > { %8586 = vst [vmem:[#allocation76_spill] sm:$0xff] %v4695_v33 }
  0xcb   : > { %8587 = vst [vmem:[#allocation77_spill] sm:$0xff] %v4697_v18 }
  0xce   : > { %749 = vrot.lane.b32.xlu2 %v4161_v28, %s3992_s16 }
  0xcf   : > { %747 = vrot.lane.b32.xlu1 %v4097_v1, %s3992_s16  ;;  %745 = vrot.lane.b32.xlu0 %v4094_v0, %s3992_s16 }
  0xd0   : > { %v4705_v5 = vpop.permute.xlu2 %649 }
  0xd1   : > { %8588 = vst [vmem:[#allocation78_spill] sm:$0xff] %v4705_v5  ;;  %v4707_v2 = vpop.permute.xlu1 %516  ;;  %v4709_v53 = vpop.permute.xlu0 %514 }
  0xd2   : > { %8589 = vst [vmem:[#allocation79_spill] sm:$0xff] %v4707_v2 }
  0xd3   : > { %8590 = vst [vmem:[#allocation80_spill] sm:$0xff] %v4709_v53 }
  0xd6   : > { %755 = vrot.lane.b32.xlu2 %v4152_v25, %s3992_s16 }
  0xd7   : > { %753 = vrot.lane.b32.xlu1 %v4149_v24, %s3992_s16  ;;  %751 = vrot.lane.b32.xlu0 %v4155_v26, %s3992_s16 }
  0xd8   : > { %v4717_v45 = vpop.permute.xlu2 %655 }
  0xd9   : > { %8591 = vst [vmem:[#allocation81_spill] sm:$0xff] %v4717_v45  ;;  %v4719_v38 = vpop.permute.xlu1 %522  ;;  %v4721_v33 = vpop.permute.xlu0 %520 }
  0xda   : > { %8592 = vst [vmem:[#allocation82_spill] sm:$0xff] %v4719_v38 }
  0xdb   : > { %8593 = vst [vmem:[#allocation83_spill] sm:$0xff] %v4721_v33 }
  0xde   : > { %761 = vrot.lane.b32.xlu2 %v4226_v52, %s3992_s16 }
  0xdf   : > { %759 = vrot.lane.b32.xlu1 %v4183_v37, %s3992_s16  ;;  %757 = vrot.lane.b32.xlu0 %v4189_v39, %s3992_s16 }
  0xe0   : > { %v4729_v2 = vpop.permute.xlu2 %661 }
  0xe1   : > { %8594 = vst [vmem:[#allocation84_spill] sm:$0xff] %v4729_v2  ;;  %v4731_v53 = vpop.permute.xlu1 %528  ;;  %v4733_v18 = vpop.permute.xlu0 %526 }
  0xe2   : > { %8595 = vst [vmem:[#allocation85_spill] sm:$0xff] %v4731_v53 }
  0xe3   : > { %8596 = vst [vmem:[#allocation86_spill] sm:$0xff] %v4733_v18 }
  0xe6   : > { %767 = vrot.lane.b32.xlu2 %v4217_v49, %s3992_s16 }
  0xe7   : > { %765 = vrot.lane.b32.xlu1 %v4214_v48, %s3992_s16  ;;  %763 = vrot.lane.b32.xlu0 %v4220_v50, %s3992_s16 }
  0xe8   : > { %v4741_v38 = vpop.permute.xlu2 %667 }
  0xe9   : > { %8597 = vst [vmem:[#allocation87_spill] sm:$0xff] %v4741_v38  ;;  %v4743_v33 = vpop.permute.xlu1 %647  ;;  %v4745_v29 = vpop.permute.xlu0 %645 }
  0xea   : > { %8598 = vst [vmem:[#allocation88_spill] sm:$0xff] %v4743_v33 }
  0xeb   : > { %8599 = vst [vmem:[#allocation89_spill] sm:$0xff] %v4745_v29 }
  0xee   : > { %773 = vrot.lane.b32.xlu2 %v4292_v30, %s3992_s16 }
  0xef   : > { %771 = vrot.lane.b32.xlu1 %v4249_v61, %s3992_s16  ;;  %769 = vrot.lane.b32.xlu0 %v4255_v63, %s3992_s16 }
  0xf0   : > { %v4753_v53 = vpop.permute.xlu2 %673 }
  0xf1   : > { %8600 = vst [vmem:[#allocation90_spill] sm:$0xff] %v4753_v53  ;;  %v4755_v18 = vpop.permute.xlu1 %653  ;;  %v4757_v2 = vpop.permute.xlu0 %651 }
  0xf2   : > { %8601 = vst [vmem:[#allocation91_spill] sm:$0xff] %v4755_v18 }
  0xf3   : > { %8602 = vst [vmem:[#allocation92_spill] sm:$0xff] %v4757_v2 }
  0xf6   : > { %779 = vrot.lane.b32.xlu2 %v4283_v20, %s3992_s16 }
  0xf7   : > { %777 = vrot.lane.b32.xlu1 %v4280_v19, %s3992_s16  ;;  %775 = vrot.lane.b32.xlu0 %v4286_v23, %s3992_s16 }
  0xf8   : > { %v4765_v38 = vpop.permute.xlu2 %679 }
  0xf9   : > { %8603 = vst [vmem:[#allocation93_spill] sm:$0xff] %v4765_v38  ;;  %v4767_v57 = vpop.permute.xlu1 %659  ;;  %v4769_v45 = vpop.permute.xlu0 %657 }
  0xfa   : > { %8604 = vst [vmem:[#allocation94_spill] sm:$0xff] %v4767_v57 }
  0xfb   : > { %8605 = vst [vmem:[#allocation95_spill] sm:$0xff] %v4769_v45 }
  0xfe   : > { %785 = vrot.lane.b32.xlu2 %v4358_v6, %s3992_s16 }
  0xff   : > { %783 = vrot.lane.b32.xlu1 %v4315_v54, %s3992_s16  ;;  %781 = vrot.lane.b32.xlu0 %v4321_v56, %s3992_s16 }
 0x100   : > { %v4777_v53 = vpop.permute.xlu2 %685 }
 0x101   : > { %8606 = vst [vmem:[#allocation96_spill] sm:$0xff] %v4777_v53  ;;  %v4779_v62 = vpop.permute.xlu1 %665  ;;  %v4781_v38 = vpop.permute.xlu0 %663 }
 0x102   : > { %8607 = vst [vmem:[#allocation97_spill] sm:$0xff] %v4779_v62 }
 0x103   : > { %8608 = vst [vmem:[#allocation98_spill] sm:$0xff] %v4781_v38 }
 0x106   : > { %791 = vrot.lane.b32.xlu2 %v4349_v43, %s3992_s16 }
 0x107   : > { %789 = vrot.lane.b32.xlu1 %v4346_v42, %s3992_s16  ;;  %787 = vrot.lane.b32.xlu0 %v4352_v11, %s3992_s16 }
 0x108   : > { %v4789_v57 = vpop.permute.xlu2 %691 }
 0x109   : > { %8609 = vst [vmem:[#allocation99_spill] sm:$0xff] %v4789_v57  ;;  %v4791_v45 = vpop.permute.xlu1 %671  ;;  %v4793_v18 = vpop.permute.xlu0 %669  ;;  %v4808_v57 = vld [vmem:[%s4091_s13 + $0x188] sm:$0xff] }
 0x10a   : > { %8610 = vst [vmem:[#allocation100_spill] sm:$0xff] %v4791_v45  ;;  %v4811_v45 = vld [vmem:[%s4091_s13 + $0x180] sm:$0xff] }
 0x10b   : > { %8611 = vst [vmem:[#allocation101_spill] sm:$0xff] %v4793_v18 }
 0x10e   : > { %797 = vrot.lane.b32.xlu2 %v4418_v34, %s3992_s16 }
 0x10f   : > { %795 = vrot.lane.b32.xlu1 %v4381_v41, %s3992_s16  ;;  %793 = vrot.lane.b32.xlu0 %v4387_v17, %s3992_s16 }
 0x110   : > { %v4801_v53 = vpop.permute.xlu2 %697 }
 0x111   : > { %8612 = vst [vmem:[#allocation102_spill] sm:$0xff] %v4801_v53  ;;  %v4803_v62 = vpop.permute.xlu1 %677  ;;  %v4805_v38 = vpop.permute.xlu0 %675 }
 0x112   : > { %8613 = vst [vmem:[#allocation103_spill] sm:$0xff] %v4803_v62 }
 0x113   : > { %8614 = vst [vmem:[#allocation104_spill] sm:$0xff] %v4805_v38 }
 0x116   : > { %803 = vrot.lane.b32.xlu2 %v4808_v57, %s3992_s16 }
 0x117   : > { %801 = vrot.lane.b32.xlu1 %v4811_v45, %s3992_s16  ;;  %799 = vrot.lane.b32.xlu0 %v4412_v31, %s3992_s16 }
 0x118   : > { %v4819_v18 = vpop.permute.xlu2 %703 }
 0x119   : > { %8615 = vst [vmem:[#allocation105_spill] sm:$0xff] %v4819_v18  ;;  %v4821_v53 = vpop.permute.xlu1 %683  ;;  %v4823_v62 = vpop.permute.xlu0 %681 }
 0x11a   : > { %8616 = vst [vmem:[#allocation106_spill] sm:$0xff] %v4821_v53 }
 0x11b   : > { %8617 = vst [vmem:[#allocation107_spill] sm:$0xff] %v4823_v62 }
 0x11e   : > { %847 = vrot.lane.b32.xlu2 %v4121_v13, %s3993_s17 }
 0x11f   : > { %845 = vrot.lane.b32.xlu1 %v4145_v22, %s3993_s17  ;;  %843 = vrot.lane.b32.xlu0 %v4132_v16, %s3993_s17 }
 0x120   : > { %v4831_v38 = vpop.permute.xlu2 %743 }
 0x121   : > { %8618 = vst [vmem:[#allocation108_spill] sm:$0xff] %v4831_v38  ;;  %v4833_v2 = vpop.permute.xlu1 %689  ;;  %v4835_v5 = vpop.permute.xlu0 %687 }
 0x122   : > { %8619 = vst [vmem:[#allocation109_spill] sm:$0xff] %v4833_v2  ;;  %v8624_v2 = vld [vmem:[#allocation8_spill] sm:$0xff] }
 0x123   : > { %8620 = vst [vmem:[#allocation110_spill] sm:$0xff] %v4835_v5  ;;  %v8625_v5 = vld [vmem:[#allocation5_spill] sm:$0xff] }
 0x126   : > { %853 = vrot.lane.b32.xlu2 %v4177_v35, %s3993_s17 }
 0x127   : > { %851 = vrot.lane.b32.xlu1 %v4180_v36, %s3993_s17  ;;  %849 = vrot.lane.b32.xlu0 %v4142_v21, %s3993_s17 }
 0x128   : > { %v4843_v18 = vpop.permute.xlu2 %749 }
 0x129   : > { %8621 = vst [vmem:[#allocation111_spill] sm:$0xff] %v4843_v18  ;;  %v4845_v22 = vpop.permute.xlu1 %695  ;;  %v4847_v16 = vpop.permute.xlu0 %693  ;;  %v8629_v18 = vld [vmem:[#allocation10_spill] sm:$0xff] }
 0x12a   : > { %8622 = vst [vmem:[#allocation112_spill] sm:$0xff] %v4845_v22  ;;  %v8630_v22 = vld [vmem:[#allocation11_spill] sm:$0xff] }
 0x12b   : > { %8623 = vst [vmem:[#allocation113_spill] sm:$0xff] %v4847_v16  ;;  %v8631_v16 = vld [vmem:[#allocation6_spill] sm:$0xff] }
 0x12e   : > { %859 = vrot.lane.b32.xlu2 %v4208_v46, %s3993_s17 }
 0x12f   : > { %857 = vrot.lane.b32.xlu1 %v8624_v2, %s3993_s17  ;;  %855 = vrot.lane.b32.xlu0 %v8625_v5, %s3993_s17 }
 0x130   : > { %v4855_v53 = vpop.permute.xlu2 %755 }
 0x131   : > { %8626 = vst [vmem:[#allocation8_spill] sm:$0xff] %v4855_v53  ;;  %v4857_v62 = vpop.permute.xlu1 %701  ;;  %v4859_v33 = vpop.permute.xlu0 %699  ;;  %v8635_v53 = vld [vmem:[#allocation13_spill] sm:$0xff] }
 0x132   : > { %8627 = vst [vmem:[#allocation5_spill] sm:$0xff] %v4857_v62  ;;  %v8636_v62 = vld [vmem:[#allocation14_spill] sm:$0xff] }
 0x133   : > { %8628 = vst [vmem:[#allocation114_spill] sm:$0xff] %v4859_v33  ;;  %v8637_v33 = vld [vmem:[#allocation9_spill] sm:$0xff] }
 0x136   : > { %865 = vrot.lane.b32.xlu2 %v8629_v18, %s3993_s17 }
 0x137   : > { %863 = vrot.lane.b32.xlu1 %v8630_v22, %s3993_s17  ;;  %861 = vrot.lane.b32.xlu0 %v8631_v16, %s3993_s17 }
 0x138   : > { %v4867_v38 = vpop.permute.xlu2 %761 }
 0x139   : > { %8632 = vst [vmem:[#allocation11_spill] sm:$0xff] %v4867_v38  ;;  %v4869_v29 = vpop.permute.xlu1 %741  ;;  %v4871_v3 = vpop.permute.xlu0 %705  ;;  %v8641_v38 = vld [vmem:[#allocation16_spill] sm:$0xff] }
 0x13a   : > { %8633 = vst [vmem:[#allocation115_spill] sm:$0xff] %v4869_v29  ;;  %v8643_v29 = vld [vmem:[#allocation12_spill] sm:$0xff] }
 0x13b   : > { %8634 = vst [vmem:[#allocation116_spill] sm:$0xff] %v4871_v3  ;;  %v8642_v3 = vld [vmem:[#allocation17_spill] sm:$0xff] }
 0x13e   : > { %871 = vrot.lane.b32.xlu2 %v8635_v53, %s3993_s17 }
 0x13f   : > { %869 = vrot.lane.b32.xlu1 %v8636_v62, %s3993_s17  ;;  %867 = vrot.lane.b32.xlu0 %v8637_v33, %s3993_s17 }
 0x140   : > { %v4879_v18 = vpop.permute.xlu2 %767 }
 0x141   : > { %8638 = vst [vmem:[#allocation117_spill] sm:$0xff] %v4879_v18  ;;  %v4881_v46 = vpop.permute.xlu1 %747  ;;  %v4883_v16 = vpop.permute.xlu0 %745  ;;  %v8647_v18 = vld [vmem:[#allocation19_spill] sm:$0xff] }
 0x142   : > { %8639 = vst [vmem:[#allocation118_spill] sm:$0xff] %v4881_v46  ;;  %v8648_v46 = vld [vmem:[#allocation20_spill] sm:$0xff] }
 0x143   : > { %8640 = vst [vmem:[#allocation119_spill] sm:$0xff] %v4883_v16  ;;  %v8649_v16 = vld [vmem:[#allocation15_spill] sm:$0xff] }
 0x146   : > { %877 = vrot.lane.b32.xlu2 %v8641_v38, %s3993_s17 }
 0x147   : > { %875 = vrot.lane.b32.xlu1 %v8642_v3, %s3993_s17  ;;  %873 = vrot.lane.b32.xlu0 %v8643_v29, %s3993_s17 }
 0x148   : > { %v4891_v53 = vpop.permute.xlu2 %773 }
 0x149   : > { %8644 = vst [vmem:[#allocation120_spill] sm:$0xff] %v4891_v53  ;;  %v4893_v62 = vpop.permute.xlu1 %753  ;;  %v4895_v33 = vpop.permute.xlu0 %751  ;;  %v8653_v53 = vld [vmem:[#allocation22_spill] sm:$0xff] }
 0x14a   : > { %8645 = vst [vmem:[#allocation121_spill] sm:$0xff] %v4893_v62  ;;  %v8654_v62 = vld [vmem:[#allocation23_spill] sm:$0xff] }
 0x14b   : > { %8646 = vst [vmem:[#allocation122_spill] sm:$0xff] %v4895_v33  ;;  %v8655_v33 = vld [vmem:[#allocation18_spill] sm:$0xff] }
 0x14e   : > { %883 = vrot.lane.b32.xlu2 %v8647_v18, %s3993_s17 }
 0x14f   : > { %881 = vrot.lane.b32.xlu1 %v8648_v46, %s3993_s17  ;;  %879 = vrot.lane.b32.xlu0 %v8649_v16, %s3993_s17 }
 0x150   : > { %v4903_v38 = vpop.permute.xlu2 %779 }
 0x151   : > { %8650 = vst [vmem:[#allocation123_spill] sm:$0xff] %v4903_v38  ;;  %v4905_v3 = vpop.permute.xlu1 %759  ;;  %v4907_v29 = vpop.permute.xlu0 %757  ;;  %v8659_v38 = vld [vmem:[#allocation25_spill] sm:$0xff] }
 0x152   : > { %8651 = vst [vmem:[#allocation124_spill] sm:$0xff] %v4905_v3  ;;  %v8660_v3 = vld [vmem:[#allocation21_spill] sm:$0xff] }
 0x153   : > { %8652 = vst [vmem:[#allocation125_spill] sm:$0xff] %v4907_v29 }
 0x156   : > { %889 = vrot.lane.b32.xlu2 %v8653_v53, %s3993_s17 }
 0x157   : > { %887 = vrot.lane.b32.xlu1 %v8654_v62, %s3993_s17  ;;  %885 = vrot.lane.b32.xlu0 %v8655_v33, %s3993_s17 }
 0x158   : > { %v4915_v18 = vpop.permute.xlu2 %785 }
 0x159   : > { %8656 = vst [vmem:[#allocation23_spill] sm:$0xff] %v4915_v18  ;;  %v4917_v46 = vpop.permute.xlu1 %765  ;;  %v4919_v16 = vpop.permute.xlu0 %763  ;;  %v4934_v18 = vld [vmem:[%s4091_s13 + $0x190] sm:$0x3] }
 0x15a   : > { %8657 = vst [vmem:[#allocation126_spill] sm:$0xff] %v4917_v46  ;;  %v8664_v46 = vld [vmem:[#allocation28_spill] sm:$0xff] }
 0x15b   : > { %8658 = vst [vmem:[#allocation127_spill] sm:$0xff] %v4919_v16  ;;  %v8665_v16 = vld [vmem:[#allocation24_spill] sm:$0xff] }
 0x15e   : > { %895 = vrot.lane.b32.xlu2 %v8659_v38, %s3993_s17 }
 0x15f   : > { %893 = vrot.lane.b32.xlu1 %v4409_v58, %s3993_s17  ;;  %891 = vrot.lane.b32.xlu0 %v8660_v3, %s3993_s17  ;;  %v839_v3 = vrot.slane %v4808_v57, 1 }
 0x160   : > { %v4927_v29 = vpop.permute.xlu2 %791 }
 0x161   : > { %8661 = vst [vmem:[#allocation128_spill] sm:$0xff] %v4927_v29  ;;  %v4929_v53 = vpop.permute.xlu1 %771  ;;  %v4931_v33 = vpop.permute.xlu0 %769  ;;  %v841_v29 = vrot.slane %v4934_v18, 1 }
 0x162   : > { %8662 = vst [vmem:[#allocation129_spill] sm:$0xff] %v4929_v53  ;;  %v838_v53 = vrot.slane %v4811_v45, 1 }
 0x163   : > { %8663 = vst [vmem:[#allocation130_spill] sm:$0xff] %v4931_v33 }
 0x166   : > { %901 = vrot.lane.b32.xlu2 %v4433_v60, %s3993_s17  ;;  %v4952_v60 = vsel %vm385_vm0, %v839_v3, %v841_v29 }
 0x167   : > { %899 = vrot.lane.b32.xlu1 %v8664_v46, %s3993_s17  ;;  %897 = vrot.lane.b32.xlu0 %v8665_v16, %s3993_s17  ;;  %v4955_v46 = vsel %vm385_vm0, %v838_v53, %v839_v3 }
 0x168   : > { %v4942_v38 = vpop.permute.xlu2 %797 }
 0x169   : > { %8666 = vst [vmem:[#allocation24_spill] sm:$0xff] %v4942_v38  ;;  %v4947_v33 = vpop.permute.xlu1 %777  ;;  %v4949_v58 = vpop.permute.xlu0 %775 }
 0x16a   : > { %8667 = vst [vmem:[#allocation131_spill] sm:$0xff] %v4947_v33 }
 0x16b   : > { %8668 = vst [vmem:[#allocation132_spill] sm:$0xff] %v4949_v58 }
 0x16e   : > { %944 = vrot.lane.b32.xlu2 %v4451_v10, %s3994_s18  ;;  %v8672_v10 = vld [vmem:[#allocation29_spill] sm:$0xff] }
 0x16f   : > { %905 = vrot.lane.b32.xlu1 %v4952_v60, %s3993_s17  ;;  %903 = vrot.lane.b32.xlu0 %v4955_v46, %s3993_s17 }
 0x170   : > { %v4963_v38 = vpop.permute.xlu2 %803 }
 0x171   : > { %8669 = vst [vmem:[#allocation133_spill] sm:$0xff] %v4963_v38  ;;  %v4965_v33 = vpop.permute.xlu1 %783  ;;  %v4967_v58 = vpop.permute.xlu0 %781  ;;  %v8676_v38 = vld [vmem:[#allocation36_spill] sm:$0xff] }
 0x172   : > { %8670 = vst [vmem:[#allocation134_spill] sm:$0xff] %v4965_v33  ;;  %v8677_v33 = vld [vmem:[#allocation31_spill] sm:$0xff] }
 0x173   : > { %8671 = vst [vmem:[#allocation135_spill] sm:$0xff] %v4967_v58 }
 0x176   : > { %950 = vrot.lane.b32.xlu2 %v4470_v9, %s3994_s18 }
 0x177   : > { %948 = vrot.lane.b32.xlu1 %v4473_v47, %s3994_s18  ;;  %946 = vrot.lane.b32.xlu0 %v8672_v10, %s3994_s18 }
 0x178   : > { %v4975_v29 = vpop.permute.xlu2 %847 }
 0x179   : > { %8673 = vst [vmem:[#allocation29_spill] sm:$0xff] %v4975_v29  ;;  %v4977_v3 = vpop.permute.xlu1 %789  ;;  %v4979_v53 = vpop.permute.xlu0 %787  ;;  %v8681_v29 = vld [vmem:[#allocation39_spill] sm:$0xff] }
 0x17a   : > { %8674 = vst [vmem:[#allocation136_spill] sm:$0xff] %v4977_v3  ;;  %v8682_v3 = vld [vmem:[#allocation40_spill] sm:$0xff] }
 0x17b   : > { %8675 = vst [vmem:[#allocation137_spill] sm:$0xff] %v4979_v53  ;;  %v8683_v53 = vld [vmem:[#allocation34_spill] sm:$0xff] }
 0x17e   : > { %956 = vrot.lane.b32.xlu2 %v4491_v44, %s3994_s18 }
 0x17f   : > { %954 = vrot.lane.b32.xlu1 %v8676_v38, %s3994_s18  ;;  %952 = vrot.lane.b32.xlu0 %v8677_v33, %s3994_s18 }
 0x180   : > { %v4987_v58 = vpop.permute.xlu2 %853 }
 0x181   : > { %8678 = vst [vmem:[#allocation138_spill] sm:$0xff] %v4987_v58  ;;  %v4989_v9 = vpop.permute.xlu1 %795  ;;  %v4991_v10 = vpop.permute.xlu0 %793 }
 0x182   : > { %8679 = vst [vmem:[#allocation139_spill] sm:$0xff] %v4989_v9  ;;  %v8687_v9 = vld [vmem:[#allocation38_spill] sm:$0xff] }
 0x183   : > { %8680 = vst [vmem:[#allocation140_spill] sm:$0xff] %v4991_v10 }
 0x186   : > { %962 = vrot.lane.b32.xlu2 %v8681_v29, %s3994_s18 }
 0x187   : > { %960 = vrot.lane.b32.xlu1 %v8682_v3, %s3994_s18  ;;  %958 = vrot.lane.b32.xlu0 %v8683_v53, %s3994_s18 }
 0x188   : > { %v4999_v44 = vpop.permute.xlu2 %859 }
 0x189   : > { %8684 = vst [vmem:[#allocation40_spill] sm:$0xff] %v4999_v44  ;;  %v5001_v38 = vpop.permute.xlu1 %801  ;;  %v5003_v33 = vpop.permute.xlu0 %799 }
 0x18a   : > { %8685 = vst [vmem:[#allocation34_spill] sm:$0xff] %v5001_v38  ;;  %v8691_v38 = vld [vmem:[#allocation51_spill] sm:$0xff] }
 0x18b   : > { %8686 = vst [vmem:[#allocation141_spill] sm:$0xff] %v5003_v33  ;;  %v8692_v33 = vld [vmem:[#allocation44_spill] sm:$0xff] }
 0x18e   : > { %968 = vrot.lane.b32.xlu2 %v4538_v59, %s3994_s18 }
 0x18f   : > { %966 = vrot.lane.b32.xlu1 %v4541_v4, %s3994_s18  ;;  %964 = vrot.lane.b32.xlu0 %v8687_v9, %s3994_s18 }
 0x190   : > { %v5011_v10 = vpop.permute.xlu2 %865 }
 0x191   : > { %8688 = vst [vmem:[#allocation142_spill] sm:$0xff] %v5011_v10  ;;  %v5013_v58 = vpop.permute.xlu1 %845  ;;  %v5015_v29 = vpop.permute.xlu0 %843  ;;  %v8696_v10 = vld [vmem:[#allocation49_spill] sm:$0xff] }
 0x192   : > { %8689 = vst [vmem:[#allocation143_spill] sm:$0xff] %v5013_v58 }
 0x193   : > { %8690 = vst [vmem:[#allocation144_spill] sm:$0xff] %v5015_v29 }
 0x196   : > { %974 = vrot.lane.b32.xlu2 %v4564_v32, %s3994_s18 }
 0x197   : > { %972 = vrot.lane.b32.xlu1 %v8691_v38, %s3994_s18  ;;  %970 = vrot.lane.b32.xlu0 %v8692_v33, %s3994_s18 }
 0x198   : > { %v5023_v44 = vpop.permute.xlu2 %871 }
 0x199   : > { %8693 = vst [vmem:[#allocation51_spill] sm:$0xff] %v5023_v44  ;;  %v5025_v59 = vpop.permute.xlu1 %851  ;;  %v5027_v9 = vpop.permute.xlu0 %849  ;;  %v8700_v44 = vld [vmem:[#allocation62_spill] sm:$0xff] }
 0x19a   : > { %8694 = vst [vmem:[#allocation44_spill] sm:$0xff] %v5025_v59  ;;  %v8701_v59 = vld [vmem:[#allocation55_spill] sm:$0xff] }
 0x19b   : > { %8695 = vst [vmem:[#allocation145_spill] sm:$0xff] %v5027_v9 }
 0x19e   : > { %980 = vrot.lane.b32.xlu2 %v4589_v7, %s3994_s18 }
 0x19f   : > { %978 = vrot.lane.b32.xlu1 %v4592_v8, %s3994_s18  ;;  %976 = vrot.lane.b32.xlu0 %v8696_v10, %s3994_s18 }
 0x1a0   : > { %v5035_v58 = vpop.permute.xlu2 %877 }
 0x1a1   : > { %8697 = vst [vmem:[#allocation146_spill] sm:$0xff] %v5035_v58  ;;  %v5037_v29 = vpop.permute.xlu1 %857  ;;  %v5039_v32 = vpop.permute.xlu0 %855  ;;  %v8705_v58 = vld [vmem:[#allocation60_spill] sm:$0xff] }
 0x1a2   : > { %8698 = vst [vmem:[#allocation147_spill] sm:$0xff] %v5037_v29 }
 0x1a3   : > { %8699 = vst [vmem:[#allocation148_spill] sm:$0xff] %v5039_v32 }
 0x1a6   : > { %986 = vrot.lane.b32.xlu2 %v4615_v12, %s3994_s18 }
 0x1a7   : > { %984 = vrot.lane.b32.xlu1 %v8700_v44, %s3994_s18  ;;  %982 = vrot.lane.b32.xlu0 %v8701_v59, %s3994_s18 }
 0x1a8   : > { %v5047_v9 = vpop.permute.xlu2 %883 }
 0x1a9   : > { %8702 = vst [vmem:[#allocation62_spill] sm:$0xff] %v5047_v9  ;;  %v5049_v7 = vpop.permute.xlu1 %863  ;;  %v5051_v10 = vpop.permute.xlu0 %861  ;;  %v939_v9 = vrot.slane %v4811_v45, 2 }
 0x1aa   : > { %8703 = vst [vmem:[#allocation55_spill] sm:$0xff] %v5049_v7  ;;  %v940_v7 = vrot.slane %v4808_v57, 2 }
 0x1ab   : > { %8704 = vst [vmem:[#allocation149_spill] sm:$0xff] %v5051_v10  ;;  %v8709_v10 = vld [vmem:[#allocation66_spill] sm:$0xff] }
 0x1ae   : > { %992 = vrot.lane.b32.xlu2 %v4640_v15, %s3994_s18 }
 0x1af   : > { %990 = vrot.lane.b32.xlu1 %v4643_v14, %s3994_s18  ;;  %988 = vrot.lane.b32.xlu0 %v8705_v58, %s3994_s18 }
 0x1b0   : > { %v5059_v29 = vpop.permute.xlu2 %889 }
 0x1b1   : > { %8706 = vst [vmem:[#allocation60_spill] sm:$0xff] %v5059_v29  ;;  %v5061_v32 = vpop.permute.xlu1 %869  ;;  %v5063_v12 = vpop.permute.xlu0 %867 }
 0x1b2   : > { %8707 = vst [vmem:[#allocation150_spill] sm:$0xff] %v5061_v32 }
 0x1b3   : > { %8708 = vst [vmem:[#allocation151_spill] sm:$0xff] %v5063_v12  ;;  %v5080_v12 = vsel %vm562_vm1, %v939_v9, %v940_v7 }
 0x1b6   : > { %998 = vrot.lane.b32.xlu2 %v4666_v51, %s3994_s18 }
 0x1b7   : > { %996 = vrot.lane.b32.xlu1 %v4669_v27, %s3994_s18  ;;  %994 = vrot.lane.b32.xlu0 %v8709_v10, %s3994_s18 }
 0x1b8   : > { %v5073_v15 = vpop.permute.xlu2 %895 }
 0x1b9   : > { %8710 = vst [vmem:[#allocation152_spill] sm:$0xff] %v5073_v15  ;;  %v5075_v29 = vpop.permute.xlu1 %875  ;;  %v5077_v32 = vpop.permute.xlu0 %873  ;;  %v942_v15 = vrot.slane %v4934_v18, 2 }
 0x1ba   : > { %8711 = vst [vmem:[#allocation153_spill] sm:$0xff] %v5075_v29 }
 0x1bb   : > { %8712 = vst [vmem:[#allocation154_spill] sm:$0xff] %v5077_v32  ;;  %v5096_v9 = vsel %vm562_vm1, %v940_v7, %v942_v15  ;;  %v5219_v15 = vld [vmem:[%s4091_s13 + $0x1a0] sm:$0xff] }
 0x1be   : > { %1004 = vrot.lane.b32.xlu2 %v5080_v12, %s3994_s18 }
 0x1bf   : > { %1002 = vrot.lane.b32.xlu1 %v4685_v55, %s3994_s18  ;;  %1000 = vrot.lane.b32.xlu0 %v4663_v40, %s3994_s18 }
 0x1c0   : > { %v5088_v51 = vpop.permute.xlu2 %901 }
 0x1c1   : > { %8713 = vst [vmem:[#allocation155_spill] sm:$0xff] %v5088_v51  ;;  %v5091_v10 = vpop.permute.xlu1 %881  ;;  %v5093_v29 = vpop.permute.xlu0 %879 }
 0x1c6   : > { %1044 = vrot.lane.b32.xlu2 %v4097_v1, %s8378_s19 }
 0x1c7   : > { %1042 = vrot.lane.b32.xlu1 %v4094_v0, %s8378_s19  ;;  %1006 = vrot.lane.b32.xlu0 %v5096_v9, %s3994_s18 }
 0x1c8   : > { %v5104_v51 = vpop.permute.xlu2 %944 }
 0x1c9   : > { %v5106_v18 = vpop.permute.xlu1 %887  ;;  %v5108_v32 = vpop.permute.xlu0 %885 }
 0x1ca   : > { %8714 = vst [vmem:[#allocation156_spill] sm:$0xff] %v5106_v18  ;;  %v8764_v18 = vld [vmem:[#allocation28_spill] sm:$0xff] }
 0x1cb   : > { %8715 = vst [vmem:[#allocation157_spill] sm:$0xff] %v5108_v32  ;;  %v8807_v32 = vld [vmem:[#allocation75_spill] sm:$0xff] }
 0x1ce   : > { %1050 = vrot.lane.b32.xlu2 %v4149_v24, %s8378_s19 }
 0x1cf   : > { %1048 = vrot.lane.b32.xlu1 %v4155_v26, %s8378_s19  ;;  %1046 = vrot.lane.b32.xlu0 %v4161_v28, %s8378_s19 }
 0x1d0   : > { %v5116_v1 = vpop.permute.xlu2 %950 }
 0x1d1   : > { %v5118_v0 = vpop.permute.xlu1 %893  ;;  %v5120_v7 = vpop.permute.xlu0 %891 }
 0x1d2   : > { %8716 = vst [vmem:[#allocation158_spill] sm:$0xff] %v5118_v0  ;;  %v8751_v0 = vld [vmem:[#allocation20_spill] sm:$0xff] }
 0x1d3   : > { %8717 = vst [vmem:[#allocation159_spill] sm:$0xff] %v5120_v7  ;;  %v1140_v7 = vrot.slane %v5219_v15, 1 }
 0x1d6   : > { %1056 = vrot.lane.b32.xlu2 %v4183_v37, %s8378_s19 }
 0x1d7   : > { %1054 = vrot.lane.b32.xlu1 %v4189_v39, %s8378_s19  ;;  %1052 = vrot.lane.b32.xlu0 %v4152_v25, %s8378_s19 }
 0x1d8   : > { %v5128_v24 = vpop.permute.xlu2 %956 }
 0x1d9   : > { %v5130_v26 = vpop.permute.xlu1 %899  ;;  %v5132_v28 = vpop.permute.xlu0 %897 }
 0x1da   : > { %8718 = vst [vmem:[#allocation160_spill] sm:$0xff] %v5130_v26 }
 0x1db   : > { %8719 = vst [vmem:[#allocation161_spill] sm:$0xff] %v5132_v28  ;;  %v8742_v28 = vld [vmem:[#allocation14_spill] sm:$0xff] }
 0x1de   : > { %1062 = vrot.lane.b32.xlu2 %v4214_v48, %s8378_s19 }
 0x1df   : > { %1060 = vrot.lane.b32.xlu1 %v4220_v50, %s8378_s19  ;;  %1058 = vrot.lane.b32.xlu0 %v4226_v52, %s8378_s19 }
 0x1e0   : > { %v5140_v37 = vpop.permute.xlu2 %962 }
 0x1e1   : > { %8720 = vst [vmem:[#allocation162_spill] sm:$0xff] %v5140_v37  ;;  %v5142_v39 = vpop.permute.xlu1 %905  ;;  %v5144_v25 = vpop.permute.xlu0 %903 }
 0x1e2   : > { %8721 = vst [vmem:[#allocation163_spill] sm:$0xff] %v5142_v39  ;;  %v5222_v39 = vld [vmem:[%s4091_s13 + $0x198] sm:$0xff] }
 0x1e3   : > { %8722 = vst [vmem:[#allocation164_spill] sm:$0xff] %v5144_v25 }
 0x1e6   : > { %1068 = vrot.lane.b32.xlu2 %v4249_v61, %s8378_s19 }
 0x1e7   : > { %1066 = vrot.lane.b32.xlu1 %v4255_v63, %s8378_s19  ;;  %1064 = vrot.lane.b32.xlu0 %v4217_v49, %s8378_s19 }
 0x1e8   : > { %v5152_v48 = vpop.permute.xlu2 %968 }
 0x1e9   : > { %8723 = vst [vmem:[#allocation165_spill] sm:$0xff] %v5152_v48  ;;  %v5154_v50 = vpop.permute.xlu1 %948  ;;  %v5156_v52 = vpop.permute.xlu0 %946 }
 0x1ee   : > { %1074 = vrot.lane.b32.xlu2 %v4280_v19, %s8378_s19 }
 0x1ef   : > { %1072 = vrot.lane.b32.xlu1 %v4286_v23, %s8378_s19  ;;  %1070 = vrot.lane.b32.xlu0 %v4292_v30, %s8378_s19 }
 0x1f0   : > { %v5164_v61 = vpop.permute.xlu2 %974 }
 0x1f1   : > { %8724 = vst [vmem:[#allocation166_spill] sm:$0xff] %v5164_v61  ;;  %v5166_v63 = vpop.permute.xlu1 %954  ;;  %v5168_v49 = vpop.permute.xlu0 %952 }
 0x1f6   : > { %1080 = vrot.lane.b32.xlu2 %v4315_v54, %s8378_s19 }
 0x1f7   : > { %1078 = vrot.lane.b32.xlu1 %v4321_v56, %s8378_s19  ;;  %1076 = vrot.lane.b32.xlu0 %v4283_v20, %s8378_s19 }
 0x1f8   : > { %v5176_v19 = vpop.permute.xlu2 %980 }
 0x1f9   : > { %v5178_v23 = vpop.permute.xlu1 %960  ;;  %v5180_v30 = vpop.permute.xlu0 %958 }
 0x1fe   : > { %1086 = vrot.lane.b32.xlu2 %v4346_v42, %s8378_s19 }
 0x1ff   : > { %1084 = vrot.lane.b32.xlu1 %v4352_v11, %s8378_s19  ;;  %1082 = vrot.lane.b32.xlu0 %v4358_v6, %s8378_s19 }
 0x200   : > { %v5188_v54 = vpop.permute.xlu2 %986 }
 0x201   : > { %8725 = vst [vmem:[#allocation167_spill] sm:$0xff] %v5188_v54  ;;  %v5190_v20 = vpop.permute.xlu1 %966  ;;  %v5192_v56 = vpop.permute.xlu0 %964 }
 0x202   : > { %8726 = vst [vmem:[#allocation168_spill] sm:$0xff] %v5190_v20 }
 0x203   : > { %8727 = vst [vmem:[#allocation169_spill] sm:$0xff] %v5192_v56  ;;  %v5550_v56 = vld [vmem:[%s5509_s28 + $0x30] sm:$0xff] }
 0x206   : > { %1092 = vrot.lane.b32.xlu2 %v4381_v41, %s8378_s19 }
 0x207   : > { %1090 = vrot.lane.b32.xlu1 %v4387_v17, %s8378_s19  ;;  %1088 = vrot.lane.b32.xlu0 %v4349_v43, %s8378_s19 }
 0x208   : > { %v5200_v11 = vpop.permute.xlu2 %992 }
 0x209   : > { %8728 = vst [vmem:[#allocation170_spill] sm:$0xff] %v5200_v11  ;;  %v5202_v42 = vpop.permute.xlu1 %972  ;;  %v5204_v6 = vpop.permute.xlu0 %970 }
 0x20a   : > { %8729 = vst [vmem:[#allocation171_spill] sm:$0xff] %v5202_v42  ;;  %v1139_v42 = vrot.slane %v5222_v39, 1 }
 0x20b   : > { %8730 = vst [vmem:[#allocation172_spill] sm:$0xff] %v5204_v6 }
 0x20e   : > { %1098 = vrot.lane.b32.xlu2 %v4811_v45, %s8378_s19 }
 0x20f   : > { %1096 = vrot.lane.b32.xlu1 %v4412_v31, %s8378_s19  ;;  %1094 = vrot.lane.b32.xlu0 %v4418_v34, %s8378_s19 }
 0x210   : > { %v5212_v41 = vpop.permute.xlu2 %998 }
 0x211   : > { %8731 = vst [vmem:[#allocation173_spill] sm:$0xff] %v5212_v41  ;;  %v5214_v17 = vpop.permute.xlu1 %978  ;;  %v5216_v43 = vpop.permute.xlu0 %976 }
 0x216   : > { %1104 = vrot.lane.b32.xlu2 %v5219_v15, %s8378_s19 }
 0x217   : > { %1102 = vrot.lane.b32.xlu1 %v5222_v39, %s8378_s19  ;;  %1100 = vrot.lane.b32.xlu0 %v4808_v57, %s8378_s19 }
 0x218   : > { %v5230_v34 = vpop.permute.xlu2 %1004 }
 0x219   : > { %8732 = vst [vmem:[#allocation174_spill] sm:$0xff] %v5230_v34  ;;  %v5232_v31 = vpop.permute.xlu1 %984  ;;  %v5234_v45 = vpop.permute.xlu0 %982  ;;  %v8738_v34 = vld [vmem:[#allocation6_spill] sm:$0xff] }
 0x21a   : > { %8733 = vst [vmem:[#allocation175_spill] sm:$0xff] %v5232_v31 }
 0x21e   : > { %1148 = vrot.lane.b32.xlu2 %v4180_v36, %s8376_s20 }
 0x21f   : > { %1146 = vrot.lane.b32.xlu1 %v4142_v21, %s8376_s20  ;;  %1144 = vrot.lane.b32.xlu0 %v4121_v13, %s8376_s20 }
 0x220   : > { %v5242_v25 = vpop.permute.xlu2 %1044 }
 0x221   : > { %v5244_v26 = vpop.permute.xlu1 %990  ;;  %v5246_v57 = vpop.permute.xlu0 %988 }
 0x222   : > { %8734 = vst [vmem:[#allocation176_spill] sm:$0xff] %v5244_v26 }
 0x223   : > { %8735 = vst [vmem:[#allocation177_spill] sm:$0xff] %v5246_v57  ;;  %v8758_v57 = vld [vmem:[#allocation26_spill] sm:$0xff] }
 0x226   : > { %1154 = vrot.lane.b32.xlu2 %v8624_v2, %s8376_s20  ;;  %v8739_v2 = vld [vmem:[#allocation7_spill] sm:$0xff] }
 0x227   : > { %1152 = vrot.lane.b32.xlu1 %v8625_v5, %s8376_s20  ;;  %1150 = vrot.lane.b32.xlu0 %v4177_v35, %s8376_s20 }
 0x228   : > { %v5254_v36 = vpop.permute.xlu2 %1050 }
 0x229   : > { %v5256_v21 = vpop.permute.xlu1 %996  ;;  %v5258_v13 = vpop.permute.xlu0 %994 }
 0x22a   : > { %8736 = vst [vmem:[#allocation178_spill] sm:$0xff] %v5256_v21  ;;  %v8743_v21 = vld [vmem:[#allocation9_spill] sm:$0xff] }
 0x22b   : > { %8737 = vst [vmem:[#allocation179_spill] sm:$0xff] %v5258_v13  ;;  %v8747_v13 = vld [vmem:[#allocation17_spill] sm:$0xff] }
 0x22e   : > { %1160 = vrot.lane.b32.xlu2 %v8630_v22, %s8376_s20  ;;  %v8744_v22 = vld [vmem:[#allocation10_spill] sm:$0xff] }
 0x22f   : > { %1158 = vrot.lane.b32.xlu1 %v8738_v34, %s8376_s20  ;;  %1156 = vrot.lane.b32.xlu0 %v8739_v2, %s8376_s20 }
 0x230   : > { %v5266_v41 = vpop.permute.xlu2 %1056 }
 0x231   : > { %v5268_v5 = vpop.permute.xlu1 %1002  ;;  %v5270_v35 = vpop.permute.xlu0 %1000 }
 0x232   : > { %8740 = vst [vmem:[#allocation6_spill] sm:$0xff] %v5268_v5  ;;  %v8748_v5 = vld [vmem:[#allocation12_spill] sm:$0xff] }
 0x233   : > { %8741 = vst [vmem:[#allocation7_spill] sm:$0xff] %v5270_v35 }
 0x236   : > { %1166 = vrot.lane.b32.xlu2 %v8742_v28, %s8376_s20  ;;  %v8749_v28 = vld [vmem:[#allocation13_spill] sm:$0xff] }
 0x237   : > { %1164 = vrot.lane.b32.xlu1 %v8743_v21, %s8376_s20  ;;  %1162 = vrot.lane.b32.xlu0 %v8744_v22, %s8376_s20 }
 0x238   : > { %v5278_v61 = vpop.permute.xlu2 %1062 }
 0x239   : > { %8745 = vst [vmem:[#allocation14_spill] sm:$0xff] %v5278_v61  ;;  %v5280_v34 = vpop.permute.xlu1 %1042  ;;  %v5282_v2 = vpop.permute.xlu0 %1006  ;;  %v8810_v61 = vrot.slane %v5219_v15, 2 }
 0x23a   : > { %8746 = vst [vmem:[#allocation9_spill] sm:$0xff] %v5282_v2  ;;  %v8752_v2 = vld [vmem:[#allocation15_spill] sm:$0xff] }
 0x23e   : > { %1172 = vrot.lane.b32.xlu2 %v8747_v13, %s8376_s20  ;;  %v8753_v13 = vld [vmem:[#allocation16_spill] sm:$0xff] }
 0x23f   : > { %1170 = vrot.lane.b32.xlu1 %v8748_v5, %s8376_s20  ;;  %1168 = vrot.lane.b32.xlu0 %v8749_v28, %s8376_s20 }
 0x240   : > { %v5290_v35 = vpop.permute.xlu2 %1068 }
 0x241   : > { %8750 = vst [vmem:[#allocation10_spill] sm:$0xff] %v5290_v35  ;;  %v5292_v21 = vpop.permute.xlu1 %1048  ;;  %v5294_v22 = vpop.permute.xlu0 %1046 }
 0x246   : > { %1178 = vrot.lane.b32.xlu2 %v8751_v0, %s8376_s20  ;;  %v1141_v0 = vsel %vm385_vm0, %v1139_v42, %v1140_v7  ;;  %v8760_v42 = vld [vmem:[#allocation22_spill] sm:$0xff] }
 0x247   : > { %1176 = vrot.lane.b32.xlu1 %v8752_v2, %s8376_s20  ;;  %1174 = vrot.lane.b32.xlu0 %v8753_v13, %s8376_s20  ;;  %v8754_v2 = vld [vmem:[#allocation18_spill] sm:$0xff]  ;;  %v8755_v13 = vld [vmem:[#allocation19_spill] sm:$0xff] }
 0x248   : > { %v5302_v11 = vpop.permute.xlu2 %1074 }
 0x249   : > { %v5304_v5 = vpop.permute.xlu1 %1054  ;;  %v5306_v28 = vpop.permute.xlu0 %1052 }
 0x24e   : > { %1184 = vrot.lane.b32.xlu2 %v8654_v62, %s8376_s20  ;;  %v8759_v62 = vld [vmem:[#allocation21_spill] sm:$0xff] }
 0x24f   : > { %1182 = vrot.lane.b32.xlu1 %v8754_v2, %s8376_s20  ;;  %1180 = vrot.lane.b32.xlu0 %v8755_v13, %s8376_s20 }
 0x250   : > { %v5317_v35 = vpop.permute.xlu2 %1080 }
 0x251   : > { %8756 = vst [vmem:[#allocation17_spill] sm:$0xff] %v5317_v35  ;;  %v5319_v26 = vpop.permute.xlu1 %1060  ;;  %v5321_v6 = vpop.permute.xlu0 %1058 }
 0x252   : > { %8757 = vst [vmem:[#allocation12_spill] sm:$0xff] %v5319_v26  ;;  %v5675_v26 = vld [vmem:[%s5509_s28 + $0xa0] sm:$0x3] }
 0x253   : > { %8835 = vst [vmem:[#allocation202_spill] sm:$0xff] %v5675_v26 }
 0x256   : > { %1190 = vrot.lane.b32.xlu2 %v8758_v57, %s8376_s20  ;;  %v8765_v57 = vld [vmem:[#allocation25_spill] sm:$0xff] }
 0x257   : > { %1188 = vrot.lane.b32.xlu1 %v8759_v62, %s8376_s20  ;;  %1186 = vrot.lane.b32.xlu0 %v8760_v42, %s8376_s20 }
 0x258   : > { %v5329_v2 = vpop.permute.xlu2 %1086 }
 0x259   : > { %8761 = vst [vmem:[#allocation13_spill] sm:$0xff] %v5329_v2  ;;  %v5331_v48 = vpop.permute.xlu1 %1066  ;;  %v5333_v13 = vpop.permute.xlu0 %1064  ;;  %v5348_v2 = vld [vmem:[%s4091_s13 + $0x1a8] sm:$0x3] }
 0x25a   : > { %8762 = vst [vmem:[#allocation20_spill] sm:$0xff] %v5331_v48  ;;  %v8775_v48 = vld [vmem:[#allocation31_spill] sm:$0xff] }
 0x25b   : > { %8763 = vst [vmem:[#allocation15_spill] sm:$0xff] %v5333_v13 }
 0x25e   : > { %1196 = vrot.lane.b32.xlu2 %v8764_v18, %s8376_s20  ;;  %v8769_v18 = vld [vmem:[#allocation27_spill] sm:$0xff] }
 0x25f   : > { %1194 = vrot.lane.b32.xlu1 %v8665_v16, %s8376_s20  ;;  %1192 = vrot.lane.b32.xlu0 %v8765_v57, %s8376_s20  ;;  %v1142_v57 = vrot.slane %v5348_v2, 1 }
 0x260   : > { %v5341_v54 = vpop.permute.xlu2 %1092 }
 0x261   : > { %8766 = vst [vmem:[#allocation16_spill] sm:$0xff] %v5341_v54  ;;  %v5343_v62 = vpop.permute.xlu1 %1072  ;;  %v5345_v42 = vpop.permute.xlu0 %1070 }
 0x262   : > { %8767 = vst [vmem:[#allocation18_spill] sm:$0xff] %v5343_v62 }
 0x263   : > { %8768 = vst [vmem:[#allocation19_spill] sm:$0xff] %v5345_v42  ;;  %v1143_v42 = vsel %vm385_vm0, %v1140_v7, %v1142_v57  ;;  %v8776_v7 = vld [vmem:[#allocation32_spill] sm:$0xff] }
 0x266   : > { %1202 = vrot.lane.b32.xlu2 %v4952_v60, %s8376_s20 }
 0x267   : > { %1200 = vrot.lane.b32.xlu1 %v4955_v46, %s8376_s20  ;;  %1198 = vrot.lane.b32.xlu0 %v8769_v18, %s8376_s20 }
 0x268   : > { %v5356_v16 = vpop.permute.xlu2 %1098 }
 0x269   : > { %8770 = vst [vmem:[#allocation26_spill] sm:$0xff] %v5356_v16  ;;  %v5359_v54 = vpop.permute.xlu1 %1078  ;;  %v5361_v62 = vpop.permute.xlu0 %1076  ;;  %v8774_v16 = vld [vmem:[#allocation36_spill] sm:$0xff] }
 0x26e   : > { %1245 = vrot.lane.b32.xlu2 %v4473_v47, %s3997_s26 }
 0x26f   : > { %1206 = vrot.lane.b32.xlu1 %v1143_v42, %s8376_s20  ;;  %1204 = vrot.lane.b32.xlu0 %v1141_v0, %s8376_s20 }
 0x270   : > { %v5368_v46 = vpop.permute.xlu2 %1104 }
 0x271   : > { %8771 = vst [vmem:[#allocation21_spill] sm:$0xff] %v5368_v46  ;;  %v5370_v60 = vpop.permute.xlu1 %1084  ;;  %v5372_v18 = vpop.permute.xlu0 %1082  ;;  %v8782_v46 = vld [vmem:[#allocation38_spill] sm:$0xff] }
 0x272   : > { %8772 = vst [vmem:[#allocation22_spill] sm:$0xff] %v5370_v60 }
 0x273   : > { %8773 = vst [vmem:[#allocation28_spill] sm:$0xff] %v5372_v18  ;;  %v8809_v18 = vld [vmem:[#allocation144_spill] sm:$0xff] }
 0x276   : > { %1251 = vrot.lane.b32.xlu2 %v8774_v16, %s3997_s26  ;;  %v8779_v16 = vld [vmem:[#allocation35_spill] sm:$0xff] }
 0x277   : > { %1249 = vrot.lane.b32.xlu1 %v8775_v48, %s3997_s26  ;;  %1247 = vrot.lane.b32.xlu0 %v8776_v7, %s3997_s26 }
 0x278   : > { %v5380_v47 = vpop.permute.xlu2 %1148 }
 0x279   : > { %v5382_v42 = vpop.permute.xlu1 %1090  ;;  %v5384_v0 = vpop.permute.xlu0 %1088 }
 0x27a   : > { %8777 = vst [vmem:[#allocation25_spill] sm:$0xff] %v5382_v42 }
 0x27b   : > { %8778 = vst [vmem:[#allocation27_spill] sm:$0xff] %v5384_v0  ;;  %v8380_v0 = vrot.slane %v5219_v15, 2 }
 0x27e   : > { %1257 = vrot.lane.b32.xlu2 %v8682_v3, %s3997_s26  ;;  %v8783_v3 = vld [vmem:[#allocation39_spill] sm:$0xff] }
 0x27f   : > { %1255 = vrot.lane.b32.xlu1 %v8683_v53, %s3997_s26  ;;  %1253 = vrot.lane.b32.xlu0 %v8779_v16, %s3997_s26 }
 0x280   : > { %v5392_v57 = vpop.permute.xlu2 %1154 }
 0x281   : > { %v5394_v48 = vpop.permute.xlu1 %1096  ;;  %v5396_v7 = vpop.permute.xlu0 %1094 }
 0x282   : > { %8780 = vst [vmem:[#allocation36_spill] sm:$0xff] %v5394_v48 }
 0x283   : > { %8781 = vst [vmem:[#allocation31_spill] sm:$0xff] %v5396_v7  ;;  %v1240_v7 = vrot.slane %v5222_v39, 2 }
 0x286   : > { %1263 = vrot.lane.b32.xlu2 %v4541_v4, %s3997_s26  ;;  %v8786_v4 = vld [vmem:[#allocation45_spill] sm:$0xff] }
 0x287   : > { %1261 = vrot.lane.b32.xlu1 %v8782_v46, %s3997_s26  ;;  %1259 = vrot.lane.b32.xlu0 %v8783_v3, %s3997_s26 }
 0x288   : > { %v5404_v42 = vpop.permute.xlu2 %1160 }
 0x289   : > { %v5406_v53 = vpop.permute.xlu1 %1102  ;;  %v5408_v16 = vpop.permute.xlu0 %1100 }
 0x28a   : > { %8784 = vst [vmem:[#allocation32_spill] sm:$0xff] %v5406_v53  ;;  %v8788_v53 = vld [vmem:[#allocation49_spill] sm:$0xff] }
 0x28b   : > { %8785 = vst [vmem:[#allocation35_spill] sm:$0xff] %v5408_v16 }
 0x28e   : > { %1269 = vrot.lane.b32.xlu2 %v8691_v38, %s3997_s26  ;;  %v8789_v38 = vld [vmem:[#allocation50_spill] sm:$0xff] }
 0x28f   : > { %1267 = vrot.lane.b32.xlu1 %v8692_v33, %s3997_s26  ;;  %1265 = vrot.lane.b32.xlu0 %v8786_v4, %s3997_s26 }
 0x290   : > { %v5416_v48 = vpop.permute.xlu2 %1166 }
 0x291   : > { %8787 = vst [vmem:[#allocation38_spill] sm:$0xff] %v5416_v48  ;;  %v5418_v46 = vpop.permute.xlu1 %1146  ;;  %v5420_v3 = vpop.permute.xlu0 %1144 }
 0x296   : > { %1275 = vrot.lane.b32.xlu2 %v4592_v8, %s3997_s26  ;;  %v1242_v8 = vsel %vm562_vm1, %v1240_v7, %v8380_v0  ;;  %v1607_v7 = vld [vmem:[%s8291_s2 + $0x10] sm:$0xff] }
 0x297   : > { %1273 = vrot.lane.b32.xlu1 %v8788_v53, %s3997_s26  ;;  %1271 = vrot.lane.b32.xlu0 %v8789_v38, %s3997_s26  ;;  %v8791_v53 = vld [vmem:[#allocation56_spill] sm:$0xff] }
 0x298   : > { %v5428_v16 = vpop.permute.xlu2 %1172 }
 0x299   : > { %8790 = vst [vmem:[#allocation39_spill] sm:$0xff] %v5428_v16  ;;  %v5430_v33 = vpop.permute.xlu1 %1152  ;;  %v5432_v4 = vpop.permute.xlu0 %1150 }
 0x29e   : > { %1281 = vrot.lane.b32.xlu2 %v8700_v44, %s3997_s26  ;;  %v1609_v44 = vld [vmem:[%s8291_s2 + $0x20] sm:$0xf] }
 0x29f   : > { %1279 = vrot.lane.b32.xlu1 %v8701_v59, %s3997_s26  ;;  %1277 = vrot.lane.b32.xlu0 %v8791_v53, %s3997_s26  ;;  %v1608_v59 = vld [vmem:[%s8291_s2 + $0x18] sm:$0xff]  ;;  %v8792_v53 = vld [vmem:[#allocation61_spill] sm:$0xff] }
 0x2a0   : > { %v5445_v38 = vpop.permute.xlu2 %1178  ;;  %3756 = vmatpush.msk.msra.mxu1 %vm3024_vm2, %v1609_v44  ;;  %3799 = vmatpush.msk.msra.mxu3 %vm3024_vm2, %v1609_v44  ;;  %v1606_v44 = vld [vmem:[%s8291_s2 + $0x8] sm:$0xff] }
 0x2a1   : > { %v5447_v16 = vpop.permute.xlu1 %1158  ;;  %v5449_v39 = vpop.permute.xlu0 %1156 }
 0x2a2   : > { %3252 = vmatpush.msra.mxu1 %v1608_v59  ;;  %3800 = vmatpush.msra.mxu3 %v1608_v59 }
 0x2a4   : > { %3253 = vmatpush.msra.mxu1 %v1607_v7  ;;  %3801 = vmatpush.msra.mxu3 %v1607_v7  ;;  %v8797_v7 = vld [vmem:[#allocation67_spill] sm:$0xff] }
 0x2a6   : > { %1287 = vrot.lane.b32.xlu2 %v4643_v14, %s3997_s26  ;;  %3254 = vmatpush.msra.mxu1 %v1606_v44  ;;  %v1605_v14 = vld [vmem:[%s8291_s2] sm:$0xff] }
 0x2a7   : > { %1285 = vrot.lane.b32.xlu1 %v8705_v58, %s3997_s26  ;;  %1283 = vrot.lane.b32.xlu0 %v8792_v53, %s3997_s26  ;;  %v8796_v58 = vld [vmem:[#allocation66_spill] sm:$0xff] }
 0x2a8   : > { %v5471_v0 = vpop.permute.xlu2 %1184  ;;  %3255 = vmatpush.msra.mxu1 %v1605_v14  ;;  %3802 = vmatpush.msra.mxu3 %v1606_v44 }
 0x2a9   : > { %8793 = vst [vmem:[#allocation45_spill] sm:$0xff] %v5471_v0  ;;  %v5473_v48 = vpop.permute.xlu1 %1164  ;;  %v5475_v59 = vpop.permute.xlu0 %1162  ;;  %v8808_v0 = vld [vmem:[#allocation115_spill] sm:$0xff] }
 0x2aa   : > { %8794 = vst [vmem:[#allocation49_spill] sm:$0xff] %v5473_v48  ;;  %3803 = vmatpush.msra.mxu3 %v1605_v14 }
 0x2ab   : > { %8795 = vst [vmem:[#allocation50_spill] sm:$0xff] %v5475_v59  ;;  %v5634_v59 = vld [vmem:[%s5509_s28 + $0x80] sm:$0xff] }
 0x2ac   : > { %8825 = vst [vmem:[#allocation192_spill] sm:$0xff] %v5634_v59 }
 0x2ae   : > { %1293 = vrot.lane.b32.xlu2 %v4669_v27, %s3997_s26  ;;  %v8801_v27 = vld [vmem:[#allocation71_spill] sm:$0xff] }
 0x2af   : > { %1291 = vrot.lane.b32.xlu1 %v8796_v58, %s3997_s26  ;;  %1289 = vrot.lane.b32.xlu0 %v8797_v7, %s3997_s26  ;;  %v5518_v7 = vld [vmem:[%s5509_s28] sm:$0xff] }
 0x2b0   : > { %v5486_v53 = vpop.permute.xlu2 %1190 }
 0x2b1   : > { %8798 = vst [vmem:[#allocation56_spill] sm:$0xff] %v5486_v53  ;;  %v5488_v60 = vpop.permute.xlu1 %1170  ;;  %v5490_v13 = vpop.permute.xlu0 %1168  ;;  %v1712_v53 = vrot.slane %v5518_v7, 1 }
 0x2b2   : > { %8799 = vst [vmem:[#allocation61_spill] sm:$0xff] %v5488_v60  ;;  %v1243_v60 = vrot.slane %v5348_v2, 2 }
 0x2b3   : > { %8800 = vst [vmem:[#allocation66_spill] sm:$0xff] %v5490_v13  ;;  %v8805_v13 = vld [vmem:[#allocation43_spill] sm:$0xff] }
 0x2b4   : > { %v1244_v31 = vsel %vm562_vm1, %v8810_v61, %v1243_v60 }
 0x2b6   : > { %1299 = vrot.lane.b32.xlu2 %v4685_v55, %s3997_s26  ;;  %v5515_v55 = vld [vmem:[%s5509_s28 + $0x10] sm:$0x3] }
 0x2b7   : > { %1297 = vrot.lane.b32.xlu1 %v4663_v40, %s3997_s26  ;;  %1295 = vrot.lane.b32.xlu0 %v8801_v27, %s3997_s26  ;;  %v5512_v40 = vld [vmem:[%s5509_s28 + $0x8] sm:$0xff] }
 0x2b8   : > { %v5498_v44 = vpop.permute.xlu2 %1196  ;;  %v1713_v27 = vrot.slane %v5512_v40, 1 }
 0x2b9   : > { %8802 = vst [vmem:[#allocation67_spill] sm:$0xff] %v5498_v44  ;;  %v5500_v14 = vpop.permute.xlu1 %1176  ;;  %v5502_v58 = vpop.permute.xlu0 %1174  ;;  %v1715_v44 = vrot.slane %v5515_v55, 1 }
 0x2ba   : > { %8803 = vst [vmem:[#allocation71_spill] sm:$0xff] %v5502_v58 }
 0x2bb   : > { %v1716_v2 = vsel %vm385_vm0, %v1713_v27, %v1715_v44  ;;  %v5561_v44 = vld [vmem:[%s5509_s28 + $0x28] sm:$0x3] }
 0x2be   : > { %1305 = vrot.lane.b32.xlu2 %v1242_v8, %s3997_s26  ;;  %v3853_v8 = vld [vmem:[%s4091_s13] sm:$0xff] }
 0x2bf   : > { %1303 = vrot.lane.b32.xlu1 %v5096_v9, %s3997_s26  ;;  %1301 = vrot.lane.b32.xlu0 %v5080_v12, %s3997_s26  ;;  %v1342_v20 = vsel %vm1341_vm3, %v3853_v8, %v8805_v13  ;;  %v1714_v8 = vsel %vm385_vm0, %v1712_v53, %v1713_v27 }
 0x2c0   : > { %v5527_v58 = vpop.permute.xlu2 %1202 }
 0x2c1   : > { %8804 = vst [vmem:[#allocation180_spill] sm:$0xff] %v5527_v58  ;;  %v5534_v9 = vpop.permute.xlu1 %1182  ;;  %v5536_v12 = vpop.permute.xlu0 %1180  ;;  %v1375_v58 = vsel %vm1374_vm4, %v1342_v20, %v8807_v32  ;;  %v5553_v32 = vld [vmem:[%s5509_s28 + $0x38] sm:$0xff] }
 0x2c2   : > { %8806 = vst [vmem:[#allocation43_spill] sm:$0xff] %v5534_v9  ;;  %v1408_v48 = vsel %vm1407_vm5, %v1375_v58, %v8808_v0  ;;  %v5558_v0 = vld [vmem:[%s5509_s28 + $0x20] sm:$0xff]  ;;  %v5564_v58 = vld [vmem:[%s5509_s28 + $0x18] sm:$0xff]  ;;  %v1723_v61 = vrot.slane %v5553_v32, 1 }
 0x2c3   : > { %v1441_v13 = vsel %vm1440_vm7, %v1408_v48, %v8809_v18  ;;  %v1718_v60 = vrot.slane %v5558_v0, 1  ;;  %v1720_v48 = vrot.slane %v5561_v44, 1  ;;  %v1717_v53 = vrot.slane %v5564_v58, 1  ;;  %v5631_v9 = vld [vmem:[%s5509_s28 + $0x78] sm:$0xff] }
 0x2c4   : > { %v1474_v20 = vsel %vm1473_vm6, %v1441_v13, %v5104_v51  ;;  %v1722_v51 = vrot.slane %v5550_v56, 1  ;;  %8824 = vst [vmem:[#allocation191_spill] sm:$0xff] %v5631_v9 }
 0x2c5   : > { %v1507_v18 = vsel %vm1506_vm8, %v1474_v20, %v5280_v34  ;;  %v5594_v20 = vld [vmem:[%s5509_s28 + $0x50] sm:$0xff] }
 0x2c6   : > { %1794 = vrot.lane.b32.xlu2 %v1716_v2, %s3990_s14  ;;  %v1540_v15 = vsel %vm1539_vm10, %v1507_v18, %v5420_v3  ;;  %v5585_v13 = vsel %vm385_vm0, %v1722_v51, %v1723_v61  ;;  %v5588_v3 = vsel %vm385_vm0, %v1718_v60, %v1720_v48  ;;  %8816 = vst [vmem:[#allocation183_spill] sm:$0xff] %v5594_v20  ;;  %v5597_v18 = vld [vmem:[%s5509_s28 + $0x58] sm:$0x3]  ;;  %v1728_v51 = vrot.slane %v5594_v20, 1 }
 0x2c7   : > { %1792 = vrot.lane.b32.xlu1 %v1714_v8, %s3990_s14  ;;  %1307 = vrot.lane.b32.xlu0 %v1244_v31, %s3997_s26  ;;  %8813 = vst [vmem:[#allocation144_spill] sm:$0xff] %v5585_v13  ;;  %v5591_v8 = vsel %vm385_vm0, %v1717_v53, %v1718_v60 }
 0x2c8   : > { %v1246_v34 = vpop.permute.xlu2 %1245  ;;  %8814 = vst [vmem:[#allocation181_spill] sm:$0xff] %v5588_v3 }
 0x2c9   : > { %v5578_v31 = vpop.permute.xlu1 %1188  ;;  %v5580_v27 = vpop.permute.xlu0 %1186  ;;  %v1573_v2 = vsel %vm1572_vm9, %v1540_v15, %v1246_v34  ;;  %8815 = vst [vmem:[#allocation182_spill] sm:$0xff] %v5591_v8  ;;  %v5603_v15 = vld [vmem:[%s5509_s28 + $0x40] sm:$0x3]  ;;  %v1730_v34 = vrot.slane %v5597_v18, 1 }
 0x2ca   : > { %8811 = vst [vmem:[#allocation75_spill] sm:$0xff] %v5578_v31  ;;  %3757 = vmatmul.msk.f32.vlgmr.msra.gmra.mxu1 %vm2927_vm11, %v1573_v2  ;;  %v5600_v31 = vld [vmem:[%s5509_s28 + $0x48] sm:$0xff]  ;;  %v1725_v53 = vrot.slane %v5603_v15, 1 }
 0x2cb   : > { %8812 = vst [vmem:[#allocation115_spill] sm:$0xff] %v5580_v27  ;;  %v1727_v48 = vrot.slane %v5600_v31, 1 }
 0x2cc   : > { %8817 = vst [vmem:[#allocation184_spill] sm:$0xff] %v5597_v18  ;;  %v5640_v18 = vld [vmem:[%s5509_s28 + $0x70] sm:$0x3] }
 0x2cd   : > { %8818 = vst [vmem:[#allocation185_spill] sm:$0xff] %v5600_v31  ;;  %v5625_v27 = vsel %vm385_vm0, %v1727_v48, %v1728_v51  ;;  %v5637_v31 = vld [vmem:[%s5509_s28 + $0x68] sm:$0xff] }
 0x2ce   : > { %1800 = vrot.lane.b32.xlu2 %v5585_v13, %s3990_s14  ;;  %8822 = vst [vmem:[#allocation189_spill] sm:$0xff] %v5625_v27  ;;  %v1733_v48 = vrot.slane %v5637_v31, 1 }
 0x2cf   : > { %1798 = vrot.lane.b32.xlu1 %v5588_v3, %s3990_s14  ;;  %1796 = vrot.lane.b32.xlu0 %v5591_v8, %s3990_s14  ;;  %v5622_v3 = vsel %vm385_vm0, %v1728_v51, %v1730_v34  ;;  %v5628_v8 = vsel %vm385_vm0, %v1723_v61, %v1725_v53  ;;  %8826 = vst [vmem:[#allocation193_spill] sm:$0xff] %v5637_v31  ;;  %v1737_v61 = vrot.slane %v5631_v9, 1  ;;  %v1738_v51 = vrot.slane %v5634_v59, 1  ;;  %v5672_v59 = vld [vmem:[%s5509_s28 + $0x98] sm:$0xff]  ;;  %v5681_v31 = vld [vmem:[%s5509_s28 + $0x88] sm:$0x3] }
 0x2d0   : > { %v5613_v60 = vpop.permute.xlu2 %1251  ;;  %8821 = vst [vmem:[#allocation188_spill] sm:$0xff] %v5622_v3  ;;  %v1735_v53 = vrot.slane %v5640_v18, 1 }
 0x2d1   : > { %v5617_v2 = vpop.permute.xlu1 %1194  ;;  %v5619_v13 = vpop.permute.xlu0 %1192  ;;  %8823 = vst [vmem:[#allocation190_spill] sm:$0xff] %v5628_v8 }
 0x2d2   : > { %8819 = vst [vmem:[#allocation186_spill] sm:$0xff] %v5617_v2  ;;  %v5643_v2 = vld [vmem:[%s5509_s28 + $0x60] sm:$0xff] }
 0x2d3   : > { %8820 = vst [vmem:[#allocation187_spill] sm:$0xff] %v5619_v13 }
 0x2d4   : > { %8827 = vst [vmem:[#allocation194_spill] sm:$0xff] %v5640_v18  ;;  %v5678_v18 = vld [vmem:[%s5509_s28 + $0x90] sm:$0xff] }
 0x2d5   : > { %8828 = vst [vmem:[#allocation195_spill] sm:$0xff] %v5643_v2 }
 0x2d6   : > { %1806 = vrot.lane.b32.xlu2 %v5622_v3, %s3990_s14  ;;  %v1732_v3 = vrot.slane %v5643_v2, 1  ;;  %8834 = vst [vmem:[#allocation201_spill] sm:$0xff] %v5672_v59  ;;  %v8841_v2 = vld [vmem:[#allocation48_spill] sm:$0xff] }
 0x2d7   : > { %1804 = vrot.lane.b32.xlu1 %v5625_v27, %s3990_s14  ;;  %1802 = vrot.lane.b32.xlu0 %v5628_v8, %s3990_s14  ;;  %v5663_v27 = vsel %vm385_vm0, %v1737_v61, %v1738_v51  ;;  %v5666_v8 = vsel %vm385_vm0, %v1733_v48, %v1735_v53  ;;  %8836 = vst [vmem:[#allocation203_spill] sm:$0xff] %v5678_v18  ;;  %v1745_v61 = vrot.slane %v5675_v26, 1  ;;  %v1742_v53 = vrot.slane %v5678_v18, 1  ;;  %v8843_v26 = vld [vmem:[#allocation89_spill] sm:$0xff] }
 0x2d8   : > { %v5653_v34 = vpop.permute.xlu2 %1257  ;;  %8831 = vst [vmem:[#allocation198_spill] sm:$0xff] %v5663_v27  ;;  %v5669_v9 = vsel %vm385_vm0, %v1732_v3, %v1733_v48  ;;  %v1743_v3 = vrot.slane %v5672_v59, 1 }
 0x2d9   : > { %v5658_v13 = vpop.permute.xlu1 %1200  ;;  %v5660_v20 = vpop.permute.xlu0 %1198  ;;  %8832 = vst [vmem:[#allocation199_spill] sm:$0xff] %v5666_v8 }
 0x2da   : > { %8829 = vst [vmem:[#allocation196_spill] sm:$0xff] %v5658_v13  ;;  %v5703_v59 = vsel %vm385_vm0, %v1743_v3, %v1745_v61  ;;  %v5728_v61 = vld [vmem:[%s5509_s28 + $0xa8] sm:$0xff] }
 0x2db   : > { %8830 = vst [vmem:[#allocation197_spill] sm:$0xff] %v5660_v20  ;;  %v3854_v20 = vld [vmem:[%s4091_s13 + $0x8] sm:$0xff] }
 0x2dc   : > { %8833 = vst [vmem:[#allocation200_spill] sm:$0xff] %v5669_v9 }
 0x2dd   : > { %8837 = vst [vmem:[#allocation204_spill] sm:$0xff] %v5681_v31 }
 0x2de   : > { %1812 = vrot.lane.b32.xlu2 %v5663_v27, %s3990_s14  ;;  %v1740_v27 = vrot.slane %v5681_v31, 1  ;;  %8842 = vst [vmem:[#allocation48_spill] sm:$0xff] %v5703_v59  ;;  %v5714_v31 = vld [vmem:[%s5509_s28 + $0xc0] sm:$0xff] }
 0x2df   : > { %1810 = vrot.lane.b32.xlu1 %v5666_v8, %s3990_s14  ;;  %1808 = vrot.lane.b32.xlu0 %v5669_v9, %s3990_s14  ;;  %v1343_v9 = vsel %vm1341_vm3, %v3854_v20, %v8841_v2  ;;  %8846 = vst [vmem:[#allocation209_spill] sm:$0xff] %v5714_v31  ;;  %v5722_v20 = vld [vmem:[%s5509_s28 + $0xb0] sm:$0xff]  ;;  %v5725_v2 = vld [vmem:[%s5509_s28 + $0xb8] sm:$0x3] }
 0x2e0   : > { %v5691_v48 = vpop.permute.xlu2 %1263  ;;  %v1376_v35 = vsel %vm1374_vm4, %v1343_v9, %v8843_v26  ;;  %v5711_v18 = vsel %vm385_vm0, %v1738_v51, %v1740_v27  ;;  %v8850_v26 = vld [vmem:[#allocation143_spill] sm:$0xff] }
 0x2e1   : > { %8838 = vst [vmem:[#allocation205_spill] sm:$0xff] %v5691_v48  ;;  %v5695_v13 = vpop.permute.xlu1 %1206  ;;  %v5697_v8 = vpop.permute.xlu0 %1204  ;;  %v5708_v48 = vsel %vm385_vm0, %v1742_v53, %v1743_v3  ;;  %v1748_v3 = vrot.slane %v5722_v20, 1  ;;  %v1747_v53 = vrot.slane %v5728_v61, 1 }
 0x2e2   : > { %8839 = vst [vmem:[#allocation206_spill] sm:$0xff] %v5695_v13  ;;  %v5717_v13 = vld [vmem:[%s5509_s28 + $0xc8] sm:$0xff] }
 0x2e3   : > { %8840 = vst [vmem:[#allocation207_spill] sm:$0xff] %v5697_v8  ;;  %v8848_v8 = vld [vmem:[#allocation108_spill] sm:$0xff] }
 0x2e4   : > { %8844 = vst [vmem:[#allocation89_spill] sm:$0xff] %v5708_v48  ;;  %v1409_v37 = vsel %vm1407_vm5, %v1376_v35, %v8848_v8  ;;  %v1752_v35 = vrot.slane %v5714_v31, 1  ;;  %v1753_v8 = vrot.slane %v5717_v13, 1 }
 0x2e5   : > { %8845 = vst [vmem:[#allocation208_spill] sm:$0xff] %v5711_v18  ;;  %v1442_v9 = vsel %vm1440_vm7, %v1409_v37, %v8850_v26 }
 0x2e6   : > { %8847 = vst [vmem:[#allocation210_spill] sm:$0xff] %v5717_v13  ;;  %1818 = vrot.lane.b32.xlu2 %v5703_v59, %s3990_s14  ;;  %v1475_v27 = vsel %vm1473_vm6, %v1442_v9, %v5156_v52  ;;  %v1750_v52 = vrot.slane %v5725_v2, 1 }
 0x2e7   : > { %8849 = vst [vmem:[#allocation108_spill] sm:$0xff] %v5725_v2  ;;  %1816 = vrot.lane.b32.xlu1 %v5708_v48, %s3990_s14  ;;  %1814 = vrot.lane.b32.xlu0 %v5711_v18, %s3990_s14  ;;  %v1508_v37 = vsel %vm1506_vm8, %v1475_v27, %v5242_v25  ;;  %v3855_v25 = vld [vmem:[%s4091_s13 + $0x18] sm:$0xff]  ;;  %v8852_v27 = vld [vmem:[#allocation42_spill] sm:$0xff] }
 0x2e8   : > { %v5744_v51 = vpop.permute.xlu2 %1269  ;;  %v1541_v26 = vsel %vm1539_vm10, %v1508_v37, %v5418_v46  ;;  %v1344_v48 = vsel %vm1341_vm3, %v3855_v25, %v8852_v27  ;;  %v8854_v2 = vld [vmem:[#allocation88_spill] sm:$0xff]  ;;  %v5762_v13 = vsel %vm385_vm0, %v1748_v3, %v1750_v52  ;;  %v5765_v46 = vsel %vm385_vm0, %v1747_v53, %v1748_v3  ;;  %v8861_v27 = vld [vmem:[#allocation29_spill] sm:$0xff] }
 0x2e9   : > { %8851 = vst [vmem:[#allocation143_spill] sm:$0xff] %v5744_v51  ;;  %v1250_v9 = vpop.permute.xlu1 %1249  ;;  %v1248_v59 = vpop.permute.xlu0 %1247  ;;  %v5757_v51 = vsel %vm385_vm0, %v1752_v35, %v1753_v8  ;;  %v1377_v31 = vsel %vm1374_vm4, %v1344_v48, %v8854_v2  ;;  %v5768_v37 = vld [vmem:[%s5509_s28 + $0xe0] sm:$0xff]  ;;  %v5779_v35 = vld [vmem:[%s5509_s28 + $0xd0] sm:$0x3] }
 0x2ea   : > { %v1574_v18 = vsel %vm1572_vm9, %v1541_v26, %v1248_v59  ;;  %8853 = vst [vmem:[#allocation42_spill] sm:$0xff] %v5757_v51  ;;  %v5771_v59 = vld [vmem:[%s5509_s28 + $0xe8] sm:$0x3]  ;;  %v8859_v26 = vld [vmem:[#allocation119_spill] sm:$0xff] }
 0x2eb   : > { %3758 = vmatmul.msk.f32.gmra.mxu1 %vm2927_vm11, %v1574_v18  ;;  %8855 = vst [vmem:[#allocation88_spill] sm:$0xff] %v5762_v13  ;;  %v1410_v25 = vsel %vm1407_vm5, %v1377_v31, %v8859_v26  ;;  %v5776_v18 = vld [vmem:[%s5509_s28 + $0xd8] sm:$0xff]  ;;  %v1758_v31 = vrot.slane %v5768_v37, 1  ;;  %v1760_v3 = vrot.slane %v5771_v59, 1 }
 0x2ec   : > { %8856 = vst [vmem:[#allocation211_spill] sm:$0xff] %v5765_v46  ;;  %v1443_v48 = vsel %vm1440_vm7, %v1410_v25, %v8861_v27  ;;  %v1757_v26 = vrot.slane %v5776_v18, 1 }
 0x2ed   : > { %8857 = vst [vmem:[#allocation212_spill] sm:$0xff] %v5768_v37  ;;  %v1476_v2 = vsel %vm1473_vm6, %v1443_v48, %v5154_v50  ;;  %v1755_v50 = vrot.slane %v5779_v35, 1  ;;  %v5879_v37 = vld [vmem:[%s5509_s28 + $0x128] sm:$0xff] }
 0x2ee   : > { %8858 = vst [vmem:[#allocation213_spill] sm:$0xff] %v5771_v59  ;;  %1824 = vrot.lane.b32.xlu2 %v5757_v51, %s3990_s14  ;;  %v1509_v52 = vsel %vm1506_vm8, %v1476_v2, %v5294_v22  ;;  %v8863_v22 = vld [vmem:[#allocation47_spill] sm:$0xff]  ;;  %v5820_v59 = vld [vmem:[%s5509_s28 + $0x108] sm:$0xff] }
 0x2ef   : > { %8860 = vst [vmem:[#allocation119_spill] sm:$0xff] %v5776_v18  ;;  %1822 = vrot.lane.b32.xlu1 %v5762_v13, %s3990_s14  ;;  %1820 = vrot.lane.b32.xlu0 %v5765_v46, %s3990_s14  ;;  %v1542_v25 = vsel %vm1539_vm10, %v1509_v52, %v5380_v47  ;;  %v3856_v46 = vld [vmem:[%s4091_s13 + $0x20] sm:$0xff]  ;;  %v5809_v13 = vsel %vm385_vm0, %v1758_v31, %v1760_v3 }
 0x2f0   : > { %v5795_v53 = vpop.permute.xlu2 %1275  ;;  %v1575_v51 = vsel %vm1572_vm9, %v1542_v25, %v1250_v9  ;;  %v1345_v2 = vsel %vm1341_vm3, %v3856_v46, %v8863_v22  ;;  %8864 = vst [vmem:[#allocation47_spill] sm:$0xff] %v5809_v13  ;;  %v5814_v47 = vsel %vm385_vm0, %v1757_v26, %v1758_v31  ;;  %v5817_v52 = vsel %vm385_vm0, %v1753_v8, %v1755_v50  ;;  %v5823_v9 = vld [vmem:[%s5509_s28 + $0x110] sm:$0xff]  ;;  %v5831_v3 = vld [vmem:[%s5509_s28 + $0x100] sm:$0x3] }
 0x2f1   : > { %8862 = vst [vmem:[#allocation29_spill] sm:$0xff] %v5795_v53  ;;  %v5801_v27 = vpop.permute.xlu1 %1255  ;;  %v1254_v48 = vpop.permute.xlu0 %1253  ;;  %v8865_v53 = vld [vmem:[#allocation78_spill] sm:$0xff]  ;;  %v1768_v26 = vrot.slane %v5823_v9, 1 }
 0x2f2   : > { %v1378_v18 = vsel %vm1374_vm4, %v1345_v2, %v8865_v53  ;;  %8866 = vst [vmem:[#allocation78_spill] sm:$0xff] %v5814_v47  ;;  %v8870_v25 = vld [vmem:[#allocation118_spill] sm:$0xff]  ;;  %v8872_v53 = vld [vmem:[#allocation145_spill] sm:$0xff] }
 0x2f3   : > { %3759 = vmatmul.msk.f32.gmra.mxu1 %vm2927_vm11, %v1575_v51  ;;  %8867 = vst [vmem:[#allocation214_spill] sm:$0xff] %v5817_v52  ;;  %v1411_v46 = vsel %vm1407_vm5, %v1378_v18, %v8870_v25  ;;  %v5828_v51 = vld [vmem:[%s5509_s28 + $0xf8] sm:$0xff]  ;;  %v5834_v22 = vld [vmem:[%s5509_s28 + $0xf0] sm:$0xff]  ;;  %v1767_v18 = vrot.slane %v5820_v59, 1 }
 0x2f4   : > { %8868 = vst [vmem:[#allocation215_spill] sm:$0xff] %v5820_v59  ;;  %v1444_v31 = vsel %vm1440_vm7, %v1411_v46, %v8872_v53  ;;  %v1763_v25 = vrot.slane %v5828_v51, 1  ;;  %v1762_v46 = vrot.slane %v5834_v22, 1  ;;  %v8875_v59 = vld [vmem:[#allocation92_spill] sm:$0xff] }
 0x2f5   : > { %8869 = vst [vmem:[#allocation216_spill] sm:$0xff] %v5823_v9  ;;  %v1477_v8 = vsel %vm1473_vm6, %v1444_v31, %v5116_v1  ;;  %v1765_v1 = vrot.slane %v5831_v3, 1 }
 0x2f6   : > { %8871 = vst [vmem:[#allocation118_spill] sm:$0xff] %v5831_v3  ;;  %1830 = vrot.lane.b32.xlu2 %v5809_v13, %s3990_s14  ;;  %v1510_v50 = vsel %vm1506_vm8, %v1477_v8, %v5292_v21  ;;  %v3857_v8 = vld [vmem:[%s4091_s13 + $0x30] sm:$0xff]  ;;  %v5868_v3 = vsel %vm385_vm0, %v1767_v18, %v1768_v26  ;;  %v5890_v18 = vld [vmem:[%s5509_s28 + $0x118] sm:$0x3] }
 0x2f7   : > { %1828 = vrot.lane.b32.xlu1 %v5814_v47, %s3990_s14  ;;  %1826 = vrot.lane.b32.xlu0 %v5817_v52, %s3990_s14  ;;  %v1543_v53 = vsel %vm1539_vm10, %v1510_v50, %v5432_v4  ;;  %v8873_v52 = vld [vmem:[#allocation30_spill] sm:$0xff]  ;;  %8874 = vst [vmem:[#allocation145_spill] sm:$0xff] %v5868_v3  ;;  %v5873_v4 = vsel %vm385_vm0, %v1763_v25, %v1765_v1 }
 0x2f8   : > { %v5850_v2 = vpop.permute.xlu2 %1281  ;;  %v1576_v21 = vsel %vm1572_vm9, %v1543_v53, %v5613_v60  ;;  %v1346_v47 = vsel %vm1341_vm3, %v3857_v8, %v8873_v52  ;;  %8876 = vst [vmem:[#allocation30_spill] sm:$0xff] %v5873_v4  ;;  %v5876_v50 = vsel %vm385_vm0, %v1762_v46, %v1763_v25  ;;  %v5882_v60 = vld [vmem:[%s5509_s28 + $0x130] sm:$0x3]  ;;  %v8880_v53 = vld [vmem:[#allocation111_spill] sm:$0xff]  ;;  %v8882_v8 = vld [vmem:[#allocation44_spill] sm:$0xff] }
 0x2f9   : > { %v5857_v31 = vpop.permute.xlu1 %1261  ;;  %v5859_v13 = vpop.permute.xlu0 %1259  ;;  %v1379_v9 = vsel %vm1374_vm4, %v1346_v47, %v8875_v59  ;;  %8877 = vst [vmem:[#allocation92_spill] sm:$0xff] %v5876_v50  ;;  %v1775_v25 = vrot.slane %v5882_v60, 1 }
 0x2fa   : > { %8878 = vst [vmem:[#allocation217_spill] sm:$0xff] %v5879_v37  ;;  %v1412_v52 = vsel %vm1407_vm5, %v1379_v9, %v8880_v53  ;;  %v1773_v9 = vrot.slane %v5879_v37, 1  ;;  %v5933_v37 = vld [vmem:[%s5509_s28 + $0x150] sm:$0xff] }
 0x2fb   : > { %3760 = vmatmul.msk.f32.gmra.mxu1 %vm2927_vm11, %v1576_v21  ;;  %8879 = vst [vmem:[#allocation218_spill] sm:$0xff] %v5882_v60  ;;  %v5887_v21 = vld [vmem:[%s5509_s28 + $0x120] sm:$0xff]  ;;  %v1445_v59 = vsel %vm1440_vm7, %v1412_v52, %v8882_v8 }
 0x2fc   : > { %8881 = vst [vmem:[#allocation111_spill] sm:$0xff] %v5887_v21  ;;  %v1478_v47 = vsel %vm1473_vm6, %v1445_v59, %v5168_v49  ;;  %v1772_v53 = vrot.slane %v5887_v21, 1  ;;  %v1770_v49 = vrot.slane %v5890_v18, 1  ;;  %v8885_v21 = vld [vmem:[#allocation91_spill] sm:$0xff] }
 0x2fd   : > { %v1511_v1 = vsel %vm1506_vm8, %v1478_v47, %v5254_v36  ;;  %v3858_v36 = vld [vmem:[%s4091_s13 + $0x38] sm:$0xff]  ;;  %v8883_v47 = vld [vmem:[#allocation33_spill] sm:$0xff]  ;;  %8888 = vst [vmem:[#allocation219_spill] sm:$0xff] %v5933_v37 }
 0x2fe   : > { %1836 = vrot.lane.b32.xlu2 %v5868_v3, %s3990_s14  ;;  %v1544_v52 = vsel %vm1539_vm10, %v1511_v1, %v5430_v33  ;;  %v5927_v33 = vsel %vm385_vm0, %v1772_v53, %v1773_v9  ;;  %v5930_v1 = vsel %vm385_vm0, %v1768_v26, %v1770_v49 }
 0x2ff   : > { %1834 = vrot.lane.b32.xlu1 %v5873_v4, %s3990_s14  ;;  %1832 = vrot.lane.b32.xlu0 %v5876_v50, %s3990_s14  ;;  %v1577_v3 = vsel %vm1572_vm9, %v1544_v52, %v1254_v48  ;;  %v1347_v50 = vsel %vm1341_vm3, %v3858_v36, %v8883_v47  ;;  %v5922_v4 = vsel %vm385_vm0, %v1773_v9, %v1775_v25  ;;  %v5936_v48 = vld [vmem:[%s5509_s28 + $0x158] sm:$0xff]  ;;  %v8890_v52 = vld [vmem:[#allocation122_spill] sm:$0xff]  ;;  %v5944_v25 = vld [vmem:[%s5509_s28 + $0x148] sm:$0x3] }
 0x300   : > { %v5906_v46 = vpop.permute.xlu2 %1287  ;;  %8884 = vst [vmem:[#allocation44_spill] sm:$0xff] %v5922_v4  ;;  %v1380_v60 = vsel %vm1374_vm4, %v1347_v50, %v8885_v21  ;;  %v5947_v47 = vld [vmem:[%s5509_s28 + $0x138] sm:$0xff]  ;;  %v8894_v50 = vld [vmem:[#allocation138_spill] sm:$0xff]  ;;  %v1783_v9 = vrot.slane %v5936_v48, 1 }
 0x301   : > { %v5912_v8 = vpop.permute.xlu1 %1267  ;;  %v5914_v59 = vpop.permute.xlu0 %1265  ;;  %8886 = vst [vmem:[#allocation33_spill] sm:$0xff] %v5927_v33  ;;  %v1413_v36 = vsel %vm1407_vm5, %v1380_v60, %v8890_v52  ;;  %v1782_v60 = vrot.slane %v5933_v37, 1  ;;  %v8897_v37 = vld [vmem:[#allocation69_spill] sm:$0xff] }
 0x302   : > { %8887 = vst [vmem:[#allocation91_spill] sm:$0xff] %v5930_v1  ;;  %v1446_v21 = vsel %vm1440_vm7, %v1413_v36, %v8894_v50  ;;  %v1777_v36 = vrot.slane %v5947_v47, 1 }
 0x303   : > { %3761 = vmatmul.msk.f32.gmra.mxu1 %vm2927_vm11, %v1577_v3  ;;  %8889 = vst [vmem:[#allocation220_spill] sm:$0xff] %v5936_v48  ;;  %v5941_v3 = vld [vmem:[%s5509_s28 + $0x140] sm:$0xff]  ;;  %v1479_v26 = vsel %vm1473_vm6, %v1446_v21, %v5166_v63  ;;  %v1780_v63 = vrot.slane %v5944_v25, 1 }
 0x304   : > { %8891 = vst [vmem:[#allocation122_spill] sm:$0xff] %v5941_v3  ;;  %v1512_v53 = vsel %vm1506_vm8, %v1479_v26, %v5306_v28  ;;  %v1778_v52 = vrot.slane %v5941_v3, 1  ;;  %v3859_v26 = vld [vmem:[%s4091_s13 + $0x48] sm:$0xff] }
 0x305   : > { %8892 = vst [vmem:[#allocation221_spill] sm:$0xff] %v5944_v25  ;;  %v1545_v50 = vsel %vm1539_vm10, %v1512_v53, %v5392_v57  ;;  %v3860_v25 = vld [vmem:[%s4091_s13 + $0xc0] sm:$0xff]  ;;  %v5984_v57 = vsel %vm385_vm0, %v1782_v60, %v1783_v9 }
 0x306   : > { %8893 = vst [vmem:[#allocation222_spill] sm:$0xff] %v5947_v47  ;;  %1842 = vrot.lane.b32.xlu2 %v5922_v4, %s3990_s14  ;;  %v1578_v28 = vsel %vm1572_vm9, %v1545_v50, %v5801_v27  ;;  %v1358_v48 = vsel %vm1341_vm3, %v3860_v25, %v8897_v37  ;;  %v8899_v53 = vld [vmem:[#allocation81_spill] sm:$0xff]  ;;  %v8900_v47 = vld [vmem:[#allocation104_spill] sm:$0xff]  ;;  %v5991_v50 = vsel %vm385_vm0, %v1778_v52, %v1780_v63  ;;  %v6000_v37 = vld [vmem:[%s5509_s28 + $0x178] sm:$0x3] }
 0x307   : > { %1840 = vrot.lane.b32.xlu1 %v5927_v33, %s3990_s14  ;;  %1838 = vrot.lane.b32.xlu0 %v5930_v1, %s3990_s14  ;;  %v8896_v1 = vld [vmem:[#allocation54_spill] sm:$0xff]  ;;  %v1391_v27 = vsel %vm1374_vm4, %v1358_v48, %v8900_v47  ;;  %8901 = vst [vmem:[#allocation69_spill] sm:$0xff] %v5991_v50  ;;  %v8903_v25 = vld [vmem:[#allocation121_spill] sm:$0xff]  ;;  %v8906_v48 = vld [vmem:[#allocation148_spill] sm:$0xff] }
 0x308   : > { %v5963_v49 = vpop.permute.xlu2 %1293  ;;  %v1348_v33 = vsel %vm1341_vm3, %v3859_v26, %v8896_v1  ;;  %8898 = vst [vmem:[#allocation54_spill] sm:$0xff] %v5984_v57  ;;  %v5994_v1 = vsel %vm385_vm0, %v1777_v36, %v1778_v52  ;;  %v5997_v26 = vld [vmem:[%s5509_s28 + $0x170] sm:$0xff]  ;;  %v8907_v63 = vld [vmem:[#allocation153_spill] sm:$0xff] }
 0x309   : > { %8895 = vst [vmem:[#allocation138_spill] sm:$0xff] %v5963_v49  ;;  %v5970_v21 = vpop.permute.xlu1 %1273  ;;  %v5972_v4 = vpop.permute.xlu0 %1271  ;;  %v1381_v3 = vsel %vm1374_vm4, %v1348_v33, %v8899_v53  ;;  %v6007_v33 = vld [vmem:[%s5509_s28 + $0x168] sm:$0xff]  ;;  %v6010_v53 = vld [vmem:[%s5509_s28 + $0x160] sm:$0x3] }
 0x30a   : > { %8902 = vst [vmem:[#allocation81_spill] sm:$0xff] %v5994_v1  ;;  %v1414_v60 = vsel %vm1407_vm5, %v1381_v3, %v8903_v25 }
 0x30b   : > { %3762 = vmatmul.msk.f32.gmra.mxu1 %vm2927_vm11, %v1578_v28  ;;  %v8904_v28 = vld [vmem:[#allocation120_spill] sm:$0xff]  ;;  %8905 = vst [vmem:[#allocation104_spill] sm:$0xff] %v6007_v33  ;;  %v1447_v47 = vsel %vm1440_vm7, %v1414_v60, %v8906_v48 }
 0x30c   : > { %v1424_v49 = vsel %vm1407_vm5, %v1391_v27, %v8904_v28  ;;  %v1480_v3 = vsel %vm1473_vm6, %v1447_v47, %v5128_v24  ;;  %v1788_v27 = vrot.slane %v5997_v26, 1  ;;  %v1785_v28 = vrot.slane %v6010_v53, 1 }
 0x30d   : > { %v1457_v52 = vsel %vm1440_vm7, %v1424_v49, %v8907_v63  ;;  %v1790_v49 = vrot.slane %v6000_v37, 1  ;;  %v1513_v25 = vsel %vm1506_vm8, %v1480_v3, %v5304_v5 }
 0x30e   : > { %1848 = vrot.lane.b32.xlu2 %v5984_v57, %s3990_s14  ;;  %v1490_v36 = vsel %vm1473_vm6, %v1457_v52, %v5216_v43  ;;  %v1787_v43 = vrot.slane %v6007_v33, 1  ;;  %v1546_v48 = vsel %vm1539_vm10, %v1513_v25, %v5449_v39  ;;  %v3861_v57 = vld [vmem:[%s4091_s13 + $0x50] sm:$0xff] }
 0x30f   : > { %1846 = vrot.lane.b32.xlu1 %v5991_v50, %s3990_s14  ;;  %1844 = vrot.lane.b32.xlu0 %v5994_v1, %s3990_s14  ;;  %v1523_v24 = vsel %vm1506_vm8, %v1490_v36, %v5302_v11  ;;  %v8909_v1 = vld [vmem:[#allocation53_spill] sm:$0xff]  ;;  %v1579_v11 = vsel %vm1572_vm9, %v1546_v48, %v5653_v34  ;;  %v8910_v50 = vld [vmem:[#allocation52_spill] sm:$0xff]  ;;  %v8911_v33 = vld [vmem:[#allocation95_spill] sm:$0xff] }
 0x310   : > { %v6032_v60 = vpop.permute.xlu2 %1299  ;;  %v1556_v47 = vsel %vm1539_vm10, %v1523_v24, %v5500_v14  ;;  %v1349_v5 = vsel %vm1341_vm3, %v3861_v57, %v8909_v1  ;;  %v3862_v36 = vld [vmem:[%s4091_s13 + $0xc8] sm:$0xff]  ;;  %v6054_v14 = vsel %vm385_vm0, %v1788_v27, %v1790_v49  ;;  %v8913_v57 = vld [vmem:[#allocation103_spill] sm:$0xff]  ;;  %v8914_v34 = vld [vmem:[#allocation8_spill] sm:$0xff]  ;;  %v6061_v24 = vsel %vm385_vm0, %v1787_v43, %v1788_v27 }
 0x311   : > { %8908 = vst [vmem:[#allocation121_spill] sm:$0xff] %v6032_v60  ;;  %v1280_v63 = vpop.permute.xlu1 %1279  ;;  %v1278_v52 = vpop.permute.xlu0 %1277  ;;  %v1359_v60 = vsel %vm1341_vm3, %v3862_v36, %v8910_v50  ;;  %v1382_v39 = vsel %vm1374_vm4, %v1349_v5, %v8911_v33  ;;  %v6064_v50 = vsel %vm385_vm0, %v1783_v9, %v1785_v28  ;;  %v8917_v33 = vld [vmem:[#allocation132_spill] sm:$0xff]  ;;  %v8919_v49 = vld [vmem:[#allocation146_spill] sm:$0xff]  ;;  %v1893_v43 = vrot.slane %v5564_v58, 2 }
 0x312   : > { %v1589_v3 = vsel %vm1572_vm9, %v1556_v47, %v1278_v52  ;;  %8912 = vst [vmem:[#allocation120_spill] sm:$0xff] %v6054_v14  ;;  %v1392_v1 = vsel %vm1374_vm4, %v1359_v60, %v8913_v57  ;;  %v1415_v25 = vsel %vm1407_vm5, %v1382_v39, %v8914_v34  ;;  %v8918_v47 = vld [vmem:[#allocation147_spill] sm:$0xff]  ;;  %v8921_v34 = vld [vmem:[#allocation74_spill] sm:$0xff] }
 0x313   : > { %3763 = vmatmul.msk.f32.gmra.mxu1 %vm2927_vm11, %v1579_v11  ;;  %3773 = vmatmul.msk.f32.vlgmr.msra.gmra.mxu3 %vm2927_vm11, %v1589_v3  ;;  %8915 = vst [vmem:[#allocation148_spill] sm:$0xff] %v6061_v24  ;;  %v1425_v48 = vsel %vm1407_vm5, %v1392_v1, %v8917_v33  ;;  %v1448_v52 = vsel %vm1440_vm7, %v1415_v25, %v8918_v47  ;;  %v1888_v3 = vrot.slane %v5518_v7, 2  ;;  %v8920_v1 = vld [vmem:[#allocation37_spill] sm:$0xff]  ;;  %v3864_v7 = vld [vmem:[%s4091_s13 + $0xd8] sm:$0xff]  ;;  %v8922_v25 = vld [vmem:[#allocation94_spill] sm:$0xff] }
 0x314   : > { %8916 = vst [vmem:[#allocation153_spill] sm:$0xff] %v6064_v50  ;;  %v1458_v5 = vsel %vm1440_vm7, %v1425_v48, %v8919_v49  ;;  %v1481_v60 = vsel %vm1473_vm6, %v1448_v52, %v5180_v30  ;;  %v1894_v30 = vrot.slane %v5558_v0, 2  ;;  %v8923_v33 = vld [vmem:[#allocation93_spill] sm:$0xff] }
 0x315   : > { %v1491_v27 = vsel %vm1473_vm6, %v1458_v5, %v5214_v17  ;;  %v1514_v9 = vsel %vm1506_vm8, %v1481_v60, %v5266_v41  ;;  %v1889_v17 = vrot.slane %v5512_v40, 2  ;;  %v1891_v41 = vrot.slane %v5515_v55, 2  ;;  %v3863_v40 = vld [vmem:[%s4091_s13 + $0x60] sm:$0xff]  ;;  %v8925_v5 = vld [vmem:[#allocation131_spill] sm:$0xff] }
 0x316   : > { %1854 = vrot.lane.b32.xlu2 %v6054_v14, %s3990_s14  ;;  %v1524_v28 = vsel %vm1506_vm8, %v1491_v27, %v5361_v62  ;;  %v1547_v36 = vsel %vm1539_vm10, %v1514_v9, %v5447_v16  ;;  %v1350_v55 = vsel %vm1341_vm3, %v3863_v40, %v8920_v1  ;;  %v1360_v16 = vsel %vm1341_vm3, %v3864_v7, %v8921_v34  ;;  %v8924_v52 = vld [vmem:[#allocation125_spill] sm:$0xff]  ;;  %v8926_v27 = vld [vmem:[#allocation40_spill] sm:$0xff]  ;;  %v8930_v7 = vld [vmem:[#allocation107_spill] sm:$0xff] }
 0x317   : > { %1852 = vrot.lane.b32.xlu1 %v6061_v24, %s3990_s14  ;;  %1850 = vrot.lane.b32.xlu0 %v6064_v50, %s3990_s14  ;;  %v1557_v39 = vsel %vm1539_vm10, %v1524_v28, %v5445_v38  ;;  %v1580_v62 = vsel %vm1572_vm9, %v1547_v36, %v5859_v13  ;;  %v6113_v38 = vsel %vm562_vm1, %v1893_v43, %v1894_v30  ;;  %v8928_v40 = vld [vmem:[#allocation73_spill] sm:$0xff] }
 0x318   : > { %v6088_v11 = vpop.permute.xlu2 %1305  ;;  %v1590_v57 = vsel %vm1572_vm9, %v1557_v39, %v1280_v63  ;;  %v1383_v13 = vsel %vm1374_vm4, %v1350_v55, %v8922_v25  ;;  %v1393_v63 = vsel %vm1374_vm4, %v1360_v16, %v8923_v33  ;;  %v1892_v48 = vsel %vm562_vm1, %v1889_v17, %v1891_v41  ;;  %v8929_v55 = vld [vmem:[#allocation59_spill] sm:$0xff]  ;;  %v8931_v16 = vld [vmem:[#allocation84_spill] sm:$0xff] }
 0x319   : > { %v6097_v58 = vpop.permute.xlu1 %1285  ;;  %v6099_v0 = vpop.permute.xlu0 %1283  ;;  %v1890_v47 = vsel %vm562_vm1, %v1888_v3, %v1889_v17  ;;  %v1416_v49 = vsel %vm1407_vm5, %v1383_v13, %v8924_v52  ;;  %v1426_v60 = vsel %vm1407_vm5, %v1393_v63, %v8925_v5  ;;  %v1899_v41 = vrot.slane %v5553_v32, 2  ;;  %v8932_v25 = vld [vmem:[#allocation123_spill] sm:$0xff]  ;;  %v8933_v63 = vld [vmem:[#allocation124_spill] sm:$0xff]  ;;  %v8934_v52 = vld [vmem:[#allocation149_spill] sm:$0xff] }
 0x31a   : > { %v1449_v9 = vsel %vm1440_vm7, %v1416_v49, %v8926_v27  ;;  %v1459_v43 = vsel %vm1440_vm7, %v1426_v60, %v5093_v29  ;;  %v1901_v3 = vrot.slane %v5603_v15, 2  ;;  %v8935_v60 = vld [vmem:[#allocation162_spill] sm:$0xff] }
 0x31b   : > { %3764 = vmatmul.msk.f32.gmra.mxu1 %vm2927_vm11, %v1580_v62  ;;  %3774 = vmatmul.msk.f32.gmra.mxu3 %vm2927_vm11, %v1590_v57  ;;  %v1482_v28 = vsel %vm1473_vm6, %v1449_v9, %v5178_v23  ;;  %v1492_v17 = vsel %vm1473_vm6, %v1459_v43, %v5176_v19  ;;  %v1898_v23 = vrot.slane %v5550_v56, 2  ;;  %v1896_v19 = vrot.slane %v5561_v44, 2  ;;  %v3866_v44 = vld [vmem:[%s4091_s13 + $0x68] sm:$0xff] }
 0x31c   : > { %v1515_v29 = vsel %vm1506_vm8, %v1482_v28, %v5321_v6  ;;  %v1525_v36 = vsel %vm1506_vm8, %v1492_v17, %v5359_v54  ;;  %v3865_v6 = vld [vmem:[%s4091_s13 + $0xe0] sm:$0xff]  ;;  %v6170_v34 = vsel %vm562_vm1, %v1899_v41, %v1901_v3 }
 0x31d   : > { %v1548_v62 = vsel %vm1539_vm10, %v1515_v29, %v5404_v42  ;;  %v1558_v32 = vsel %vm1539_vm10, %v1525_v36, %v5536_v12  ;;  %v1361_v54 = vsel %vm1341_vm3, %v3865_v6, %v8928_v40  ;;  %v1351_v42 = vsel %vm1341_vm3, %v3866_v44, %v8929_v55  ;;  %v8939_v17 = vld [vmem:[#allocation12_spill] sm:$0xff]  ;;  %v8941_v29 = vld [vmem:[#allocation183_spill] sm:$0xff]  ;;  %v8944_v6 = vld [vmem:[#allocation50_spill] sm:$0xff] }
 0x31e   : > { %1972 = vrot.lane.b32.xlu2 %v6113_v38, %s3991_s15  ;;  %v1581_v1 = vsel %vm1572_vm9, %v1548_v62, %v5857_v31  ;;  %v1591_v56 = vsel %vm1572_vm9, %v1558_v32, %v5850_v2  ;;  %v1394_v12 = vsel %vm1374_vm4, %v1361_v54, %v8930_v7  ;;  %v1384_v31 = vsel %vm1374_vm4, %v1351_v42, %v8931_v16  ;;  %v8943_v62 = vld [vmem:[#allocation185_spill] sm:$0xff]  ;;  %v8945_v54 = vld [vmem:[#allocation43_spill] sm:$0xff] }
 0x31f   : > { %1970 = vrot.lane.b32.xlu1 %v1892_v48, %s3991_s15  ;;  %1968 = vrot.lane.b32.xlu0 %v1890_v47, %s3991_s15  ;;  %v1427_v2 = vsel %vm1407_vm5, %v1394_v12, %v8932_v25  ;;  %v6177_v13 = vsel %vm562_vm1, %v1898_v23, %v1899_v41  ;;  %v6180_v33 = vsel %vm562_vm1, %v1894_v30, %v1896_v19  ;;  %v8936_v30 = vld [vmem:[#allocation17_spill] sm:$0xff]  ;;  %v1904_v36 = vrot.slane %v8941_v29, 2  ;;  %v8942_v23 = vld [vmem:[#allocation184_spill] sm:$0xff]  ;;  %v3867_v12 = vld [vmem:[%s4091_s13 + $0xf0] sm:$0xff] }
 0x320   : > { %v6143_v39 = vpop.permute.xlu2 %1794  ;;  %v1417_v48 = vsel %vm1407_vm5, %v1384_v31, %v8933_v63  ;;  %v1460_v47 = vsel %vm1440_vm7, %v1427_v2, %v5091_v10  ;;  %v8937_v10 = vld [vmem:[#allocation195_spill] sm:$0xff]  ;;  %v1906_v19 = vrot.slane %v8942_v23, 2  ;;  %v1903_v32 = vrot.slane %v8943_v62, 2  ;;  %v8946_v55 = vld [vmem:[#allocation205_spill] sm:$0xff]  ;;  %v8948_v2 = vld [vmem:[#allocation58_spill] sm:$0xff] }
 0x321   : > { %8927 = vst [vmem:[#allocation53_spill] sm:$0xff] %v6143_v39  ;;  %v6151_v57 = vpop.permute.xlu1 %1291  ;;  %v6153_v15 = vpop.permute.xlu0 %1289  ;;  %v1450_v49 = vsel %vm1440_vm7, %v1417_v48, %v8934_v52  ;;  %v1493_v5 = vsel %vm1473_vm6, %v1460_v47, %v5234_v45  ;;  %v1908_v43 = vrot.slane %v8937_v10, 2  ;;  %v8938_v45 = vld [vmem:[#allocation193_spill] sm:$0xff]  ;;  %v3868_v25 = vld [vmem:[%s4091_s13 + $0x78] sm:$0xff]  ;;  %v8949_v47 = vld [vmem:[#allocation98_spill] sm:$0xff] }
 0x322   : > { %v1483_v27 = vsel %vm1473_vm6, %v1450_v49, %v8935_v60  ;;  %v1526_v9 = vsel %vm1506_vm8, %v1493_v5, %v8936_v30  ;;  %v1909_v28 = vrot.slane %v8938_v45, 2  ;;  %v8947_v16 = vld [vmem:[#allocation57_spill] sm:$0xff]  ;;  %v1352_v63 = vsel %vm1341_vm3, %v3868_v25, %v8948_v2  ;;  %v8950_v49 = vld [vmem:[#allocation106_spill] sm:$0xff]  ;;  %v8956_v23 = vld [vmem:[#allocation175_spill] sm:$0xff] }
 0x323   : > { %3765 = vmatmul.msk.f32.gmra.mxu1 %vm2927_vm11, %v1581_v1  ;;  %3775 = vmatmul.msk.f32.gmra.mxu3 %vm2927_vm11, %v1591_v56  ;;  %v1516_v41 = vsel %vm1506_vm8, %v1483_v27, %v8939_v17  ;;  %v1559_v1 = vsel %vm1539_vm10, %v1526_v9, %v8945_v54  ;;  %v1362_v31 = vsel %vm1341_vm3, %v3867_v12, %v8947_v16  ;;  %v8951_v27 = vld [vmem:[#allocation11_spill] sm:$0xff]  ;;  %v8954_v17 = vld [vmem:[#allocation62_spill] sm:$0xff]  ;;  %v8955_v29 = vld [vmem:[#allocation169_spill] sm:$0xff] }
 0x324   : > { %v1549_v40 = vsel %vm1539_vm10, %v1516_v41, %v8944_v6  ;;  %v1592_v7 = vsel %vm1572_vm9, %v1559_v1, %v6099_v0  ;;  %v6230_v48 = vsel %vm562_vm1, %v1908_v43, %v1909_v28  ;;  %v1385_v52 = vsel %vm1374_vm4, %v1352_v63, %v8949_v47  ;;  %v8952_v9 = vld [vmem:[#allocation135_spill] sm:$0xff]  ;;  %v8957_v62 = vld [vmem:[#allocation192_spill] sm:$0xff]  ;;  %v8959_v54 = vld [vmem:[#allocation14_spill] sm:$0xff] }
 0x325   : > { %v1582_v42 = vsel %vm1572_vm9, %v1549_v40, %v8946_v55  ;;  %v1395_v0 = vsel %vm1374_vm4, %v1362_v31, %v8950_v49  ;;  %v6237_v5 = vsel %vm562_vm1, %v1904_v36, %v1906_v19  ;;  %v6240_v60 = vsel %vm562_vm1, %v1903_v32, %v1904_v36  ;;  %v8953_v43 = vld [vmem:[#allocation55_spill] sm:$0xff]  ;;  %v8958_v6 = vld [vmem:[#allocation204_spill] sm:$0xff]  ;;  %v8963_v31 = vld [vmem:[#allocation194_spill] sm:$0xff] }
 0x326   : > { %1978 = vrot.lane.b32.xlu2 %v6170_v34, %s3991_s15  ;;  %v1418_v30 = vsel %vm1407_vm5, %v1385_v52, %v8951_v27  ;;  %v1428_v10 = vsel %vm1407_vm5, %v1395_v0, %v8952_v9  ;;  %v1914_v32 = vrot.slane %v8957_v62, 2  ;;  %v1916_v40 = vrot.slane %v8958_v6, 2  ;;  %v8960_v55 = vld [vmem:[#allocation28_spill] sm:$0xff]  ;;  %v8962_v12 = vld [vmem:[#allocation191_spill] sm:$0xff]  ;;  %v8964_v2 = vld [vmem:[#allocation49_spill] sm:$0xff] }
 0x327   : > { %1976 = vrot.lane.b32.xlu1 %v6177_v13, %s3991_s15  ;;  %1974 = vrot.lane.b32.xlu0 %v6180_v33, %s3991_s15  ;;  %v1451_v45 = vsel %vm1440_vm7, %v1418_v30, %v8953_v43  ;;  %v1461_v41 = vsel %vm1440_vm7, %v1428_v10, %v8954_v17  ;;  %v1913_v16 = vrot.slane %v8962_v12, 2  ;;  %v1911_v25 = vrot.slane %v8963_v31, 2  ;;  %v8965_v47 = vld [vmem:[#allocation45_spill] sm:$0xff]  ;;  %v8970_v62 = vld [vmem:[#allocation127_spill] sm:$0xff] }
 0x328   : > { %v6204_v3 = vpop.permute.xlu2 %1800  ;;  %v1484_v36 = vsel %vm1473_vm6, %v1451_v45, %v8955_v29  ;;  %v1494_v19 = vsel %vm1473_vm6, %v1461_v41, %v8956_v23  ;;  %v3869_v27 = vld [vmem:[%s4091_s13 + $0x80] sm:$0xff]  ;;  %v3870_v45 = vld [vmem:[%s4091_s13 + $0xf8] sm:$0xff]  ;;  %v6293_v23 = vsel %vm562_vm1, %v1914_v32, %v1916_v40 }
 0x329   : > { %8940 = vst [vmem:[#allocation52_spill] sm:$0xff] %v6204_v3  ;;  %v6213_v56 = vpop.permute.xlu1 %1297  ;;  %v6215_v44 = vpop.permute.xlu0 %1295  ;;  %v1517_v1 = vsel %vm1506_vm8, %v1484_v36, %v8959_v54  ;;  %v8966_v30 = vld [vmem:[#allocation41_spill] sm:$0xff]  ;;  %v6300_v6 = vsel %vm562_vm1, %v1913_v16, %v1914_v32  ;;  %v6303_v54 = vsel %vm562_vm1, %v1909_v28, %v1911_v25  ;;  %v8975_v32 = vld [vmem:[#allocation167_spill] sm:$0xff] }
 0x32a   : > { %v1550_v63 = vsel %vm1539_vm10, %v1517_v1, %v8964_v2  ;;  %v1353_v9 = vsel %vm1341_vm3, %v3869_v27, %v8966_v30  ;;  %v8967_v17 = vld [vmem:[#allocation77_spill] sm:$0xff]  ;;  %v8971_v1 = vld [vmem:[#allocation134_spill] sm:$0xff]  ;;  %v8974_v2 = vld [vmem:[#allocation168_spill] sm:$0xff] }
 0x32b   : > { %3766 = vmatmul.msk.f32.gmra.mxu1 %vm2927_vm11, %v1582_v42  ;;  %3776 = vmatmul.msk.f32.gmra.mxu3 %vm2927_vm11, %v1592_v7  ;;  %v1527_v42 = vsel %vm1506_vm8, %v1494_v19, %v8960_v55  ;;  %v1583_v10 = vsel %vm1572_vm9, %v1550_v63, %v5914_v59  ;;  %v1363_v41 = vsel %vm1341_vm3, %v3870_v45, %v8967_v17  ;;  %v8968_v29 = vld [vmem:[#allocation97_spill] sm:$0xff]  ;;  %v8969_v19 = vld [vmem:[#allocation96_spill] sm:$0xff]  ;;  %v8976_v28 = vld [vmem:[#allocation15_spill] sm:$0xff] }
 0x32c   : > { %v1560_v52 = vsel %vm1539_vm10, %v1527_v42, %v8965_v47  ;;  %v1386_v36 = vsel %vm1374_vm4, %v1353_v9, %v8968_v29  ;;  %v1396_v59 = vsel %vm1374_vm4, %v1363_v41, %v8969_v19  ;;  %v8972_v42 = vld [vmem:[#allocation142_spill] sm:$0xff]  ;;  %v8973_v40 = vld [vmem:[#allocation157_spill] sm:$0xff]  ;;  %v1923_v47 = vrot.slane %v5728_v61, 2  ;;  %v8981_v41 = vld [vmem:[#allocation203_spill] sm:$0xff] }
 0x32d   : > { %v1593_v43 = vsel %vm1572_vm9, %v1560_v52, %v6097_v58  ;;  %v1419_v58 = vsel %vm1407_vm5, %v1386_v36, %v8970_v62  ;;  %v1429_v55 = vsel %vm1407_vm5, %v1396_v59, %v8971_v1  ;;  %v1924_v52 = vrot.slane %v5722_v20, 2  ;;  %v8977_v27 = vld [vmem:[#allocation22_spill] sm:$0xff]  ;;  %v8983_v59 = vld [vmem:[#allocation115_spill] sm:$0xff] }
 0x32e   : > { %1984 = vrot.lane.b32.xlu2 %v6230_v48, %s3991_s15  ;;  %v1452_v12 = vsel %vm1440_vm7, %v1419_v58, %v8972_v42  ;;  %v1462_v31 = vsel %vm1440_vm7, %v1429_v55, %v8973_v40  ;;  %v8980_v45 = vld [vmem:[#allocation202_spill] sm:$0xff]  ;;  %v1918_v29 = vrot.slane %v8981_v41, 2  ;;  %v8984_v42 = vld [vmem:[#allocation65_spill] sm:$0xff] }
 0x32f   : > { %1982 = vrot.lane.b32.xlu1 %v6237_v5, %s3991_s15  ;;  %1980 = vrot.lane.b32.xlu0 %v6240_v60, %s3991_s15  ;;  %v1485_v63 = vsel %vm1473_vm6, %v1452_v12, %v8974_v2  ;;  %v1495_v16 = vsel %vm1473_vm6, %v1462_v31, %v8975_v32  ;;  %v1921_v17 = vrot.slane %v8980_v45, 2  ;;  %v8982_v36 = vld [vmem:[#allocation38_spill] sm:$0xff]  ;;  %v8985_v31 = vld [vmem:[#allocation76_spill] sm:$0xff]  ;;  %v8986_v32 = vld [vmem:[#allocation87_spill] sm:$0xff] }
 0x330   : > { %v6266_v7 = vpop.permute.xlu2 %1806  ;;  %v1518_v25 = vsel %vm1506_vm8, %v1485_v63, %v8976_v28  ;;  %v1528_v30 = vsel %vm1506_vm8, %v1495_v16, %v8977_v27  ;;  %v3871_v55 = vld [vmem:[%s4091_s13 + $0x90] sm:$0xff]  ;;  %v3872_v40 = vld [vmem:[%s4091_s13 + $0x108] sm:$0xff]  ;;  %v6353_v63 = vsel %vm562_vm1, %v1923_v47, %v1924_v52 }
 0x331   : > { %8961 = vst [vmem:[#allocation95_spill] sm:$0xff] %v6266_v7  ;;  %v6274_v49 = vpop.permute.xlu1 %1303  ;;  %v6276_v0 = vpop.permute.xlu0 %1301  ;;  %v1551_v19 = vsel %vm1539_vm10, %v1518_v25, %v8982_v36  ;;  %v1561_v62 = vsel %vm1539_vm10, %v1528_v30, %v8983_v59  ;;  %v1354_v12 = vsel %vm1341_vm3, %v3871_v55, %v8984_v42  ;;  %v1364_v2 = vsel %vm1341_vm3, %v3872_v40, %v8985_v31  ;;  %v8987_v16 = vld [vmem:[#allocation110_spill] sm:$0xff]  ;;  %v8990_v47 = vld [vmem:[#allocation151_spill] sm:$0xff]  ;;  %v8991_v36 = vld [vmem:[#allocation156_spill] sm:$0xff] }
 0x332   : > { %v1584_v58 = vsel %vm1572_vm9, %v1551_v19, %v5912_v8  ;;  %v1594_v1 = vsel %vm1572_vm9, %v1561_v62, %v5906_v46  ;;  %v1387_v8 = vsel %vm1374_vm4, %v1354_v12, %v8986_v32  ;;  %v1397_v46 = vsel %vm1374_vm4, %v1364_v2, %v8987_v16  ;;  %v8988_v27 = vld [vmem:[#allocation126_spill] sm:$0xff]  ;;  %v8995_v55 = vld [vmem:[#allocation20_spill] sm:$0xff]  ;;  %v8996_v12 = vld [vmem:[#allocation13_spill] sm:$0xff] }
 0x333   : > { %3767 = vmatmul.msk.f32.gmra.mxu1 %vm2927_vm11, %v1583_v10  ;;  %3777 = vmatmul.msk.f32.gmra.mxu3 %vm2927_vm11, %v1593_v43  ;;  %v8979_v10 = vld [vmem:[#allocation201_spill] sm:$0xff]  ;;  %v1420_v30 = vsel %vm1407_vm5, %v1387_v8, %v8988_v27  ;;  %v8994_v62 = vld [vmem:[#allocation210_spill] sm:$0xff]  ;;  %v8998_v8 = vld [vmem:[#allocation108_spill] sm:$0xff] }
 0x334   : > { %v1919_v43 = vrot.slane %v8979_v10, 2  ;;  %v8989_v10 = vld [vmem:[#allocation23_spill] sm:$0xff]  ;;  %v1453_v41 = vsel %vm1440_vm7, %v1420_v30, %v8990_v47  ;;  %v8997_v2 = vld [vmem:[#allocation209_spill] sm:$0xff]  ;;  %v1926_v16 = vrot.slane %v8998_v8, 2 }
 0x335   : > { %v1430_v45 = vsel %vm1407_vm5, %v1397_v46, %v8989_v10  ;;  %v1928_v32 = vrot.slane %v8997_v2, 2  ;;  %v8999_v46 = vld [vmem:[#allocation66_spill] sm:$0xff]  ;;  %v9000_v30 = vld [vmem:[#allocation75_spill] sm:$0xff]  ;;  %v9009_v8 = vld [vmem:[#allocation117_spill] sm:$0xff] }
 0x336   : > { %1990 = vrot.lane.b32.xlu2 %v6293_v23, %s3991_s15  ;;  %v6360_v28 = vsel %vm562_vm1, %v1919_v43, %v1921_v17  ;;  %v6363_v25 = vsel %vm562_vm1, %v1918_v29, %v1919_v43  ;;  %v1463_v19 = vsel %vm1440_vm7, %v1430_v45, %v8991_v36  ;;  %v8992_v17 = vld [vmem:[#allocation165_spill] sm:$0xff]  ;;  %v3873_v47 = vld [vmem:[%s4091_s13 + $0x98] sm:$0xff] }
 0x337   : > { %1988 = vrot.lane.b32.xlu1 %v6300_v6, %s3991_s15  ;;  %1986 = vrot.lane.b32.xlu0 %v6303_v54, %s3991_s15  ;;  %v1486_v43 = vsel %vm1473_vm6, %v1453_v41, %v8992_v17  ;;  %v8993_v29 = vld [vmem:[#allocation177_spill] sm:$0xff]  ;;  %v9003_v41 = vld [vmem:[#allocation64_spill] sm:$0xff] }
 0x338   : > { %v6327_v9 = vpop.permute.xlu2 %1812  ;;  %v1496_v59 = vsel %vm1473_vm6, %v1463_v19, %v8993_v29  ;;  %v1519_v42 = vsel %vm1506_vm8, %v1486_v43, %v8995_v55  ;;  %v1355_v36 = vsel %vm1341_vm3, %v3873_v47, %v9003_v41  ;;  %v9004_v19 = vld [vmem:[#allocation143_spill] sm:$0xff]  ;;  %v9006_v55 = vld [vmem:[#allocation101_spill] sm:$0xff]  ;;  %v9012_v47 = vld [vmem:[#allocation150_spill] sm:$0xff] }
 0x339   : > { %8978 = vst [vmem:[#allocation103_spill] sm:$0xff] %v6327_v9  ;;  %v6336_v61 = vpop.permute.xlu1 %1792  ;;  %v6338_v20 = vpop.permute.xlu0 %1307  ;;  %v1529_v40 = vsel %vm1506_vm8, %v1496_v59, %v8996_v12  ;;  %v1552_v27 = vsel %vm1539_vm10, %v1519_v42, %v8999_v46  ;;  %v3874_v29 = vld [vmem:[%s4091_s13 + $0x110] sm:$0xff]  ;;  %v1388_v42 = vsel %vm1374_vm4, %v1355_v36, %v9006_v55 }
 0x33a   : > { %v1562_v10 = vsel %vm1539_vm10, %v1529_v40, %v9000_v30  ;;  %v1585_v17 = vsel %vm1572_vm9, %v1552_v27, %v9004_v19  ;;  %v9005_v59 = vld [vmem:[#allocation63_spill] sm:$0xff]  ;;  %v9008_v40 = vld [vmem:[#allocation109_spill] sm:$0xff]  ;;  %v6426_v27 = vsel %vm562_vm1, %v1924_v52, %v1926_v16  ;;  %v9014_v19 = vld [vmem:[#allocation172_spill] sm:$0xff] }
 0x33b   : > { %3768 = vmatmul.msk.f32.gmra.mxu1 %vm2927_vm11, %v1584_v58  ;;  %3778 = vmatmul.msk.f32.gmra.mxu3 %vm2927_vm11, %v1594_v1  ;;  %v1929_v58 = vrot.slane %v8994_v62, 2  ;;  %v1931_v1 = vrot.slane %v5779_v35, 2  ;;  %v1595_v43 = vsel %vm1572_vm9, %v1562_v10, %v6153_v15  ;;  %v1365_v62 = vsel %vm1341_vm3, %v3874_v29, %v9005_v59  ;;  %v9011_v30 = vld [vmem:[#allocation137_spill] sm:$0xff]  ;;  %v9016_v52 = vld [vmem:[#allocation10_spill] sm:$0xff]  ;;  %v9017_v59 = vld [vmem:[#allocation27_spill] sm:$0xff] }
 0x33c   : > { %v1398_v2 = vsel %vm1374_vm4, %v1365_v62, %v9008_v40  ;;  %v1421_v15 = vsel %vm1407_vm5, %v1388_v42, %v9009_v8  ;;  %v1939_v29 = vrot.slane %v5828_v51, 2  ;;  %v9019_v42 = vld [vmem:[#allocation212_spill] sm:$0xff]  ;;  %v3878_v9 = vld [vmem:[%s4091_s13 + $0xb0] sm:$0xff] }
 0x33d   : > { %v6416_v12 = vsel %vm562_vm1, %v1929_v58, %v1931_v1  ;;  %v6423_v46 = vsel %vm562_vm1, %v1928_v32, %v1929_v58  ;;  %v1431_v10 = vsel %vm1407_vm5, %v1398_v2, %v9011_v30  ;;  %v1454_v41 = vsel %vm1440_vm7, %v1421_v15, %v9012_v47  ;;  %v9013_v1 = vld [vmem:[#allocation60_spill] sm:$0xff]  ;;  %v9020_v2 = vld [vmem:[#allocation213_spill] sm:$0xff]  ;;  %v9021_v15 = vld [vmem:[#allocation119_spill] sm:$0xff] }
 0x33e   : > { %1996 = vrot.lane.b32.xlu2 %v6353_v63, %s3991_s15  ;;  %9007 = vst [vmem:[#allocation147_spill] sm:$0xff] %v6416_v12  ;;  %v1464_v36 = vsel %vm1440_vm7, %v1431_v10, %v9013_v1  ;;  %v9015_v58 = vld [vmem:[#allocation176_spill] sm:$0xff]  ;;  %v1934_v40 = vrot.slane %v9019_v42, 2  ;;  %v1936_v8 = vrot.slane %v9020_v2, 2  ;;  %v1933_v30 = vrot.slane %v9021_v15, 2  ;;  %v9022_v10 = vld [vmem:[#allocation61_spill] sm:$0xff] }
 0x33f   : > { %1994 = vrot.lane.b32.xlu1 %v6360_v28, %s3991_s15  ;;  %1992 = vrot.lane.b32.xlu0 %v6363_v25, %s3991_s15  ;;  %9010 = vst [vmem:[#allocation146_spill] sm:$0xff] %v6423_v46  ;;  %v1497_v32 = vsel %vm1473_vm6, %v1464_v36, %v9015_v58  ;;  %v3875_v58 = vld [vmem:[%s4091_s13 + $0xa8] sm:$0xff]  ;;  %v9027_v42 = vld [vmem:[#allocation80_spill] sm:$0xff]  ;;  %v9029_v15 = vld [vmem:[#allocation99_spill] sm:$0xff] }
 0x340   : > { %v6389_v31 = vpop.permute.xlu2 %1818  ;;  %v1530_v62 = vsel %vm1506_vm8, %v1497_v32, %v9017_v59  ;;  %v9026_v32 = vld [vmem:[#allocation46_spill] sm:$0xff]  ;;  %v3876_v59 = vld [vmem:[%s4091_s13 + $0x120] sm:$0xff] }
 0x341   : > { %v6397_v45 = vpop.permute.xlu1 %1798  ;;  %v6399_v35 = vpop.permute.xlu0 %1796  ;;  %v9028_v2 = vld [vmem:[#allocation100_spill] sm:$0xff] }
 0x342   : > { %9001 = vst [vmem:[#allocation8_spill] sm:$0xff] %v6397_v45 }
 0x343   : > { %9002 = vst [vmem:[#allocation132_spill] sm:$0xff] %v6399_v35  ;;  %3769 = vmatmul.msk.f32.gmra.mxu1 %vm2927_vm11, %v1585_v17  ;;  %3779 = vmatmul.msk.f32.gmra.mxu3 %vm2927_vm11, %v1595_v43  ;;  %v1487_v17 = vsel %vm1473_vm6, %v1454_v41, %v9014_v19  ;;  %v1938_v43 = vrot.slane %v5834_v22, 2  ;;  %v9023_v41 = vld [vmem:[#allocation56_spill] sm:$0xff] }
 0x344   : > { %v1520_v16 = vsel %vm1506_vm8, %v1487_v17, %v9016_v52  ;;  %v1563_v1 = vsel %vm1539_vm10, %v1530_v62, %v9023_v41  ;;  %v1356_v52 = vsel %vm1341_vm3, %v3875_v58, %v9026_v32  ;;  %v9030_v41 = vld [vmem:[#allocation130_spill] sm:$0xff]  ;;  %v9033_v32 = vld [vmem:[#allocation159_spill] sm:$0xff] }
 0x345   : > { %v1553_v47 = vsel %vm1539_vm10, %v1520_v16, %v9022_v10  ;;  %v1596_v17 = vsel %vm1572_vm9, %v1563_v1, %v6151_v57  ;;  %v1366_v16 = vsel %vm1341_vm3, %v3876_v59, %v9027_v42  ;;  %v6476_v62 = vsel %vm562_vm1, %v1938_v43, %v1939_v29  ;;  %v9032_v43 = vld [vmem:[#allocation51_spill] sm:$0xff]  ;;  %v9036_v42 = vld [vmem:[#allocation216_spill] sm:$0xff] }
 0x346   : > { %2002 = vrot.lane.b32.xlu2 %v6416_v12, %s3991_s15  ;;  %v1586_v19 = vsel %vm1572_vm9, %v1553_v47, %v5972_v4  ;;  %v1389_v4 = vsel %vm1374_vm4, %v1356_v52, %v9028_v2  ;;  %v1399_v57 = vsel %vm1374_vm4, %v1366_v16, %v9029_v15  ;;  %v6483_v10 = vsel %vm562_vm1, %v1934_v40, %v1936_v8  ;;  %v9034_v8 = vld [vmem:[#allocation171_spill] sm:$0xff]  ;;  %v9048_v12 = vld [vmem:[#allocation70_spill] sm:$0xff] }
 0x347   : > { %2000 = vrot.lane.b32.xlu1 %v6423_v46, %s3991_s15  ;;  %1998 = vrot.lane.b32.xlu0 %v6426_v27, %s3991_s15  ;;  %v6486_v47 = vsel %vm562_vm1, %v1933_v30, %v1934_v40  ;;  %v1422_v1 = vsel %vm1407_vm5, %v1389_v4, %v9030_v41  ;;  %v9035_v30 = vld [vmem:[#allocation170_spill] sm:$0xff]  ;;  %v1944_v16 = vrot.slane %v9036_v42, 2  ;;  %v1946_v2 = vrot.slane %v5890_v18, 2  ;;  %v9037_v4 = vld [vmem:[#allocation19_spill] sm:$0xff] }
 0x348   : > { %v6450_v55 = vpop.permute.xlu2 %1824  ;;  %v1455_v58 = vsel %vm1440_vm7, %v1422_v1, %v9032_v43  ;;  %v9041_v43 = vld [vmem:[#allocation118_spill] sm:$0xff] }
 0x349   : > { %9018 = vst [vmem:[#allocation37_spill] sm:$0xff] %v6450_v55  ;;  %v6459_v36 = vpop.permute.xlu1 %1804  ;;  %v6461_v51 = vpop.permute.xlu0 %1802  ;;  %v1488_v40 = vsel %vm1473_vm6, %v1455_v58, %v9034_v8  ;;  %v1941_v58 = vrot.slane %v9041_v43, 2  ;;  %v9043_v8 = vld [vmem:[#allocation187_spill] sm:$0xff] }
 0x34a   : > { %9024 = vst [vmem:[#allocation74_spill] sm:$0xff] %v6459_v36  ;;  %v1521_v15 = vsel %vm1506_vm8, %v1488_v40, %v9037_v4  ;;  %v3877_v40 = vld [vmem:[%s4091_s13 + $0x128] sm:$0xff]  ;;  %v9046_v4 = vld [vmem:[#allocation79_spill] sm:$0xff] }
 0x34b   : > { %9025 = vst [vmem:[#allocation94_spill] sm:$0xff] %v6461_v51  ;;  %3770 = vmatmul.msk.f32.gmra.mxu1 %vm2927_vm11, %v1586_v19  ;;  %3780 = vmatmul.msk.f32.gmra.mxu3 %vm2927_vm11, %v1596_v17  ;;  %v9031_v19 = vld [vmem:[#allocation136_spill] sm:$0xff]  ;;  %v9069_v36 = vld [vmem:[#allocation29_spill] sm:$0xff]  ;;  %v9086_v51 = vld [vmem:[#allocation83_spill] sm:$0xff] }
 0x34c   : > { %v1432_v17 = vsel %vm1407_vm5, %v1399_v57, %v9031_v19  ;;  %v9038_v57 = vld [vmem:[#allocation25_spill] sm:$0xff]  ;;  %v9040_v19 = vld [vmem:[#allocation215_spill] sm:$0xff] }
 0x34d   : > { %v1465_v52 = vsel %vm1440_vm7, %v1432_v17, %v9033_v32  ;;  %v1943_v17 = vrot.slane %v9040_v19, 2  ;;  %v9042_v32 = vld [vmem:[#allocation39_spill] sm:$0xff]  ;;  %v9047_v19 = vld [vmem:[#allocation138_spill] sm:$0xff] }
 0x34e   : > { %2008 = vrot.lane.b32.xlu2 %v6476_v62, %s3991_s15  ;;  %v1498_v59 = vsel %vm1473_vm6, %v1465_v52, %v9035_v30  ;;  %v1554_v52 = vsel %vm1539_vm10, %v1521_v15, %v9042_v32  ;;  %v1357_v15 = vsel %vm1341_vm3, %v3878_v9, %v9048_v12  ;;  %v9049_v32 = vld [vmem:[#allocation113_spill] sm:$0xff]  ;;  %v6549_v9 = vsel %vm562_vm1, %v1939_v29, %v1941_v58  ;;  %v9057_v29 = vld [vmem:[#allocation16_spill] sm:$0xff] }
 0x34f   : > { %2006 = vrot.lane.b32.xlu1 %v6483_v10, %s3991_s15  ;;  %2004 = vrot.lane.b32.xlu0 %v6486_v47, %s3991_s15  ;;  %v1531_v41 = vsel %vm1506_vm8, %v1498_v59, %v9038_v57  ;;  %v1367_v59 = vsel %vm1341_vm3, %v3877_v40, %v9046_v4  ;;  %v1587_v57 = vsel %vm1572_vm9, %v1554_v52, %v5970_v21  ;;  %v9050_v40 = vld [vmem:[#allocation90_spill] sm:$0xff]  ;;  %v9051_v52 = vld [vmem:[#allocation128_spill] sm:$0xff]  ;;  %v9052_v12 = vld [vmem:[#allocation129_spill] sm:$0xff] }
 0x350   : > { %v6512_v1 = vpop.permute.xlu2 %1830  ;;  %v1564_v30 = vsel %vm1539_vm10, %v1531_v41, %v9043_v8  ;;  %v1400_v41 = vsel %vm1374_vm4, %v1367_v59, %v9049_v32  ;;  %v6539_v8 = vsel %vm562_vm1, %v1944_v16, %v1946_v2  ;;  %v1390_v21 = vsel %vm1374_vm4, %v1357_v15, %v9050_v40  ;;  %v9054_v2 = vld [vmem:[#allocation154_spill] sm:$0xff]  ;;  %v9055_v32 = vld [vmem:[#allocation179_spill] sm:$0xff] }
 0x351   : > { %9039 = vst [vmem:[#allocation93_spill] sm:$0xff] %v6512_v1  ;;  %v6520_v42 = vpop.permute.xlu1 %1810  ;;  %v6522_v18 = vpop.permute.xlu0 %1808  ;;  %v1597_v43 = vsel %vm1572_vm9, %v1564_v30, %v9047_v19  ;;  %v1433_v30 = vsel %vm1407_vm5, %v1400_v41, %v9051_v52  ;;  %v6546_v4 = vsel %vm562_vm1, %v1943_v17, %v1944_v16  ;;  %v1423_v59 = vsel %vm1407_vm5, %v1390_v21, %v9052_v12  ;;  %v9056_v16 = vld [vmem:[#allocation166_spill] sm:$0xff] }
 0x352   : > { %9044 = vst [vmem:[#allocation125_spill] sm:$0xff] %v6520_v42  ;;  %v9058_v41 = vld [vmem:[#allocation222_spill] sm:$0xff] }
 0x353   : > { %9045 = vst [vmem:[#allocation131_spill] sm:$0xff] %v6522_v18  ;;  %3771 = vmatmul.msk.f32.gmra.mxu1 %vm2927_vm11, %v1587_v57  ;;  %3781 = vmatmul.msk.f32.gmra.mxu3 %vm2927_vm11, %v1597_v43  ;;  %v9053_v57 = vld [vmem:[#allocation158_spill] sm:$0xff]  ;;  %v1456_v43 = vsel %vm1440_vm7, %v1423_v59, %v9054_v2  ;;  %v1953_v40 = vrot.slane %v9058_v41, 2 }
 0x354   : > { %v1466_v19 = vsel %vm1440_vm7, %v1433_v30, %v9053_v57  ;;  %v1489_v17 = vsel %vm1473_vm6, %v1456_v43, %v9056_v16  ;;  %v9059_v21 = vld [vmem:[#allocation122_spill] sm:$0xff]  ;;  %v9062_v57 = vld [vmem:[#allocation217_spill] sm:$0xff]  ;;  %v9065_v16 = vld [vmem:[#allocation71_spill] sm:$0xff] }
 0x355   : > { %v1499_v15 = vsel %vm1473_vm6, %v1466_v19, %v9055_v32  ;;  %v1954_v52 = vrot.slane %v9059_v21, 2  ;;  %v9060_v30 = vld [vmem:[#allocation18_spill] sm:$0xff]  ;;  %v1949_v19 = vrot.slane %v9062_v57, 2  ;;  %v9064_v32 = vld [vmem:[#allocation111_spill] sm:$0xff] }
 0x356   : > { %2014 = vrot.lane.b32.xlu2 %v6539_v8, %s3991_s15  ;;  %v1532_v58 = vsel %vm1506_vm8, %v1499_v15, %v9057_v29  ;;  %v1522_v12 = vsel %vm1506_vm8, %v1489_v17, %v9060_v30  ;;  %v9063_v2 = vld [vmem:[#allocation218_spill] sm:$0xff]  ;;  %v1948_v15 = vrot.slane %v9064_v32, 2 }
 0x357   : > { %2012 = vrot.lane.b32.xlu1 %v6546_v4, %s3991_s15  ;;  %2010 = vrot.lane.b32.xlu0 %v6549_v9, %s3991_s15  ;;  %v1951_v43 = vrot.slane %v9063_v2, 2  ;;  %v1555_v29 = vsel %vm1539_vm10, %v1522_v12, %v9065_v16  ;;  %v9066_v42 = vld [vmem:[#allocation186_spill] sm:$0xff]  ;;  %v9070_v2 = vld [vmem:[#allocation68_spill] sm:$0xff] }
 0x358   : > { %v6573_v59 = vpop.permute.xlu2 %1836  ;;  %v1565_v18 = vsel %vm1539_vm10, %v1532_v58, %v9066_v42  ;;  %v1588_v17 = vsel %vm1572_vm9, %v1555_v29, %v9069_v36  ;;  %v6596_v42 = vsel %vm562_vm1, %v1953_v40, %v1954_v52  ;;  %v9072_v58 = vld [vmem:[#allocation112_spill] sm:$0xff]  ;;  %v6604_v36 = vsel %vm562_vm1, %v1948_v15, %v1949_v19  ;;  %v9077_v40 = vld [vmem:[#allocation178_spill] sm:$0xff]  ;;  %v9079_v15 = vld [vmem:[#allocation31_spill] sm:$0xff] }
 0x359   : > { %9061 = vst [vmem:[#allocation40_spill] sm:$0xff] %v6573_v59  ;;  %v6582_v7 = vpop.permute.xlu1 %1816  ;;  %v6584_v46 = vpop.permute.xlu0 %1814  ;;  %v1598_v30 = vsel %vm1572_vm9, %v1565_v18, %v6215_v44  ;;  %v3879_v59 = vld [vmem:[%s4091_s13 + $0x138] sm:$0xff]  ;;  %v6601_v16 = vsel %vm562_vm1, %v1949_v19, %v1951_v43  ;;  %v1961_v43 = vrot.slane %v6010_v53, 2  ;;  %v3880_v53 = vld [vmem:[%s4091_s13 + $0x140] sm:$0xff] }
 0x35a   : > { %9067 = vst [vmem:[#allocation73_spill] sm:$0xff] %v6582_v7  ;;  %v1368_v1 = vsel %vm1341_vm3, %v3879_v59, %v9070_v2  ;;  %v9075_v44 = vld [vmem:[#allocation140_spill] sm:$0xff] }
 0x35b   : > { %9068 = vst [vmem:[#allocation59_spill] sm:$0xff] %v6584_v46  ;;  %3772 = vmatmul.msk.f32.gmra.mxu1 %vm2927_vm11, %v1588_v17  ;;  %3782 = vmatmul.msk.f32.gmra.mxu3 %vm2927_vm11, %v1598_v30  ;;  %v1401_v12 = vsel %vm1374_vm4, %v1368_v1, %v9072_v58  ;;  %v9076_v59 = vld [vmem:[#allocation152_spill] sm:$0xff]  ;;  %v9081_v58 = vld [vmem:[#allocation219_spill] sm:$0xff] }
 0x35c   : > { %9071 = vst [vmem:[#allocation107_spill] sm:$0xff] %v6596_v42  ;;  %v1434_v18 = vsel %vm1407_vm5, %v1401_v12, %v9075_v44  ;;  %v9078_v1 = vld [vmem:[#allocation220_spill] sm:$0xff]  ;;  %v1958_v12 = vrot.slane %v9081_v58, 2  ;;  %v9082_v44 = vld [vmem:[#allocation221_spill] sm:$0xff] }
 0x35d   : > { %9073 = vst [vmem:[#allocation84_spill] sm:$0xff] %v6601_v16  ;;  %v1467_v29 = vsel %vm1440_vm7, %v1434_v18, %v9076_v59  ;;  %v1959_v19 = vrot.slane %v9078_v1, 2  ;;  %v1956_v18 = vrot.slane %v9082_v44, 2  ;;  %v9083_v59 = vld [vmem:[#allocation67_spill] sm:$0xff]  ;;  %v9088_v44 = vld [vmem:[#allocation102_spill] sm:$0xff] }
 0x35e   : > { %9074 = vst [vmem:[#allocation123_spill] sm:$0xff] %v6604_v36  ;;  %2020 = vrot.lane.b32.xlu2 %v6596_v42, %s3991_s15  ;;  %v1500_v17 = vsel %vm1473_vm6, %v1467_v29, %v9077_v40 }
 0x35f   : > { %2018 = vrot.lane.b32.xlu1 %v6601_v16, %s3991_s15  ;;  %2016 = vrot.lane.b32.xlu0 %v6604_v36, %s3991_s15  ;;  %v1533_v30 = vsel %vm1506_vm8, %v1500_v17, %v9079_v15  ;;  %v1369_v17 = vsel %vm1341_vm3, %v3880_v53, %v9086_v51  ;;  %v6639_v15 = vsel %vm562_vm1, %v1959_v19, %v1961_v43 }
 0x360   : > { %v6622_v2 = vpop.permute.xlu2 %1842  ;;  %v1566_v29 = vsel %vm1539_vm10, %v1533_v30, %v9083_v59  ;;  %9087 = vst [vmem:[#allocation17_spill] sm:$0xff] %v6639_v15  ;;  %v6644_v30 = vsel %vm562_vm1, %v1958_v12, %v1959_v19  ;;  %v6647_v59 = vsel %vm562_vm1, %v1954_v52, %v1956_v18  ;;  %v9094_v52 = vld [vmem:[#allocation36_spill] sm:$0xff]  ;;  %v1966_v18 = vrot.slane %v6000_v37, 2 }
 0x361   : > { %9080 = vst [vmem:[#allocation124_spill] sm:$0xff] %v6622_v2  ;;  %v6628_v40 = vpop.permute.xlu1 %1822  ;;  %v6630_v7 = vpop.permute.xlu0 %1820  ;;  %v1599_v46 = vsel %vm1572_vm9, %v1566_v29, %v6213_v56  ;;  %v1402_v2 = vsel %vm1374_vm4, %v1369_v17, %v9088_v44  ;;  %v9092_v29 = vld [vmem:[#allocation161_spill] sm:$0xff] }
 0x362   : > { %9084 = vst [vmem:[#allocation149_spill] sm:$0xff] %v6628_v40  ;;  %v9091_v40 = vld [vmem:[#allocation139_spill] sm:$0xff]  ;;  %v9097_v17 = vld [vmem:[#allocation197_spill] sm:$0xff] }
 0x363   : > { %9085 = vst [vmem:[#allocation162_spill] sm:$0xff] %v6630_v7  ;;  %3783 = vmatmul.msk.f32.gmra.mxu3 %vm2927_vm11, %v1599_v46  ;;  %v1435_v56 = vsel %vm1407_vm5, %v1402_v2, %v9091_v40  ;;  %v9093_v46 = vld [vmem:[#allocation173_spill] sm:$0xff]  ;;  %v1964_v2 = vrot.slane %v5997_v26, 2  ;;  %v9096_v40 = vld [vmem:[#allocation104_spill] sm:$0xff]  ;;  %v9102_v7 = vld [vmem:[#allocation114_spill] sm:$0xff] }
 0x364   : > { %9089 = vst [vmem:[#allocation195_spill] sm:$0xff] %v6644_v30  ;;  %v1468_v51 = vsel %vm1440_vm7, %v1435_v56, %v9092_v29  ;;  %v1963_v53 = vrot.slane %v9096_v40, 2 }
 0x365   : > { %9090 = vst [vmem:[#allocation193_spill] sm:$0xff] %v6647_v59  ;;  %v1501_v43 = vsel %vm1473_vm6, %v1468_v51, %v9093_v46  ;;  %v9100_v51 = vld [vmem:[#allocation121_spill] sm:$0xff] }
 0x366   : > { %2026 = vrot.lane.b32.xlu2 %v6639_v15, %s3991_s15  ;;  %v1534_v19 = vsel %vm1506_vm8, %v1501_v43, %v9094_v52  ;;  %v3881_v43 = vld [vmem:[%s4091_s13 + $0x150] sm:$0xff]  ;;  %v6683_v15 = vsel %vm562_vm1, %v1964_v2, %v1966_v18  ;;  %v9111_v18 = vld [vmem:[#allocation196_spill] sm:$0xff] }
 0x367   : > { %2024 = vrot.lane.b32.xlu1 %v6644_v30, %s3991_s15  ;;  %2022 = vrot.lane.b32.xlu0 %v6647_v59, %s3991_s15  ;;  %v1567_v44 = vsel %vm1539_vm10, %v1534_v19, %v9097_v17  ;;  %v9101_v52 = vld [vmem:[#allocation82_spill] sm:$0xff]  ;;  %9103 = vst [vmem:[#allocation185_spill] sm:$0xff] %v6683_v15  ;;  %v6686_v19 = vsel %vm562_vm1, %v1963_v53, %v1964_v2  ;;  %v9105_v17 = vld [vmem:[#allocation24_spill] sm:$0xff]  ;;  %v9135_v59 = vld [vmem:[#allocation85_spill] sm:$0xff] }
 0x368   : > { %v6663_v12 = vpop.permute.xlu2 %1848  ;;  %v1600_v46 = vsel %vm1572_vm9, %v1567_v44, %v9100_v51  ;;  %9104 = vst [vmem:[#allocation50_spill] sm:$0xff] %v6686_v19  ;;  %v9106_v44 = vld [vmem:[#allocation160_spill] sm:$0xff] }
 0x369   : > { %9095 = vst [vmem:[#allocation12_spill] sm:$0xff] %v6663_v12  ;;  %v6670_v56 = vpop.permute.xlu1 %1828  ;;  %v6672_v29 = vpop.permute.xlu0 %1826  ;;  %v1370_v12 = vsel %vm1341_vm3, %v3881_v43, %v9101_v52 }
 0x36a   : > { %9098 = vst [vmem:[#allocation183_spill] sm:$0xff] %v6670_v56  ;;  %v1403_v37 = vsel %vm1374_vm4, %v1370_v12, %v9102_v7  ;;  %v6693_v56 = vld [vmem:[%s5509_s28 + $0x18] sm:$0xff]  ;;  %v9109_v12 = vld [vmem:[#allocation26_spill] sm:$0xff] }
 0x36b   : > { %9099 = vst [vmem:[#allocation184_spill] sm:$0xff] %v6672_v29  ;;  %3784 = vmatmul.msk.f32.gmra.mxu3 %vm2927_vm11, %v1600_v46  ;;  %v1436_v30 = vsel %vm1407_vm5, %v1403_v37, %v9105_v17  ;;  %v9108_v46 = vld [vmem:[#allocation7_spill] sm:$0xff] }
 0x36c   : > { %v1469_v51 = vsel %vm1440_vm7, %v1436_v30, %v9106_v44  ;;  %9107 = vst [vmem:[#allocation43_spill] sm:$0xff] %v6693_v56  ;;  %v3883_v17 = vld [vmem:[%s4091_s13 + $0x158] sm:$0xff] }
 0x36d   : > { %v1502_v7 = vsel %vm1473_vm6, %v1469_v51, %v9108_v46  ;;  %v9114_v44 = vld [vmem:[#allocation72_spill] sm:$0xff]  ;;  %v9115_v46 = vld [vmem:[#allocation5_spill] sm:$0xff] }
 0x36e   : > { %2066 = vrot.lane.b32.xlu2 %v6693_v56, %s3992_s16  ;;  %v1535_v2 = vsel %vm1506_vm8, %v1502_v7, %v9109_v12  ;;  %v1371_v51 = vsel %vm1341_vm3, %v3883_v17, %v9114_v44  ;;  %v9116_v12 = vld [vmem:[#allocation141_spill] sm:$0xff]  ;;  %v6733_v17 = vld [vmem:[%s5509_s28 + $0x30] sm:$0xff] }
 0x36f   : > { %2030 = vrot.lane.b32.xlu1 %v6683_v15, %s3991_s15  ;;  %2028 = vrot.lane.b32.xlu0 %v6686_v19, %s3991_s15  ;;  %v1568_v53 = vsel %vm1539_vm10, %v1535_v2, %v9111_v18  ;;  %v1404_v7 = vsel %vm1374_vm4, %v1371_v51, %v9115_v46  ;;  %v9117_v18 = vld [vmem:[#allocation155_spill] sm:$0xff]  ;;  %s3793_s15 = sshll.u32 %s4083_s9, 8  ;;  %s3946_s9 = scalar_lea.hbm %s8295_s6, 4 }
 0x370   : > { %v6705_v30 = vpop.permute.xlu2 %1854  ;;  %v1601_v37 = vsel %vm1572_vm9, %v1568_v53, %v6276_v0  ;;  %v1437_v2 = vsel %vm1407_vm5, %v1404_v7, %v9116_v12  ;;  %v6726_v15 = vld [vmem:[%s5509_s28 + $0x38] sm:$0xff]  ;;  %v9118_v0 = vld [vmem:[#allocation6_spill] sm:$0xff]  ;;  %s7721_s20 = scalar_lea.vmem %s8294_s5, %s3793_s15 }
 0x371   : > { %9110 = vst [vmem:[#allocation205_spill] sm:$0xff] %v6705_v30  ;;  %v6709_v43 = vpop.permute.xlu1 %1834  ;;  %v6711_v52 = vpop.permute.xlu0 %1832  ;;  %v1470_v30 = vsel %vm1440_vm7, %v1437_v2, %v9117_v18  ;;  %v9120_v44 = vld [vmem:[#allocation35_spill] sm:$0xff]  ;;  %v9122_v7 = vld [vmem:[#allocation180_spill] sm:$0xff] }
 0x372   : > { %9112 = vst [vmem:[#allocation57_spill] sm:$0xff] %v6709_v43  ;;  %v1503_v53 = vsel %vm1473_vm6, %v1470_v30, %v9118_v0  ;;  %v3887_v0 = vld [vmem:[%s4091_s13 + $0x168] sm:$0xff] }
 0x373   : > { %9113 = vst [vmem:[#allocation58_spill] sm:$0xff] %v6711_v52  ;;  %3785 = vmatmul.msk.f32.gmra.mxu3 %vm2927_vm11, %v1601_v37  ;;  %v6738_v37 = vld [vmem:[%s5509_s28 + $0x20] sm:$0xff]  ;;  %v1536_v51 = vsel %vm1506_vm8, %v1503_v53, %v9120_v44  ;;  %v9125_v43 = vld [vmem:[#allocation86_spill] sm:$0xff] }
 0x374   : > { %9119 = vst [vmem:[#allocation98_spill] sm:$0xff] %v6738_v37  ;;  %v1569_v30 = vsel %vm1539_vm10, %v1536_v51, %v9122_v7  ;;  %v1372_v19 = vsel %vm1341_vm3, %v3887_v0, %v9125_v43  ;;  %v9126_v53 = vld [vmem:[#allocation105_spill] sm:$0xff]  ;;  %v9127_v52 = vld [vmem:[#allocation34_spill] sm:$0xff]  ;;  %v9128_v7 = vld [vmem:[#allocation164_spill] sm:$0xff] }
 0x375   : > { %v1602_v18 = vsel %vm1572_vm9, %v1569_v30, %v6274_v49  ;;  %v1405_v44 = vsel %vm1374_vm4, %v1372_v19, %v9126_v53  ;;  %v9129_v49 = vld [vmem:[#allocation174_spill] sm:$0xff]  ;;  %v9132_v53 = vld [vmem:[#allocation207_spill] sm:$0xff] }
 0x376   : > { %2072 = vrot.lane.b32.xlu2 %v6726_v15, %s3992_s16  ;;  %v1438_v51 = vsel %vm1407_vm5, %v1405_v44, %v9127_v52  ;;  %v6772_v30 = vld [vmem:[%s5509_s28 + $0x50] sm:$0xff]  ;;  %v6777_v19 = vld [vmem:[%s5509_s28 + $0x48] sm:$0xff]  ;;  %v9130_v52 = vld [vmem:[#allocation32_spill] sm:$0xff] }
 0x377   : > { %2070 = vrot.lane.b32.xlu1 %v6733_v17, %s3992_s16  ;;  %2068 = vrot.lane.b32.xlu0 %v6738_v37, %s3992_s16 }
 0x378   : > { %v6744_v46 = vpop.permute.xlu2 %1972 }
 0x379   : > { %9121 = vst [vmem:[#allocation106_spill] sm:$0xff] %v6744_v46  ;;  %v6748_v12 = vpop.permute.xlu1 %1840  ;;  %v6750_v2 = vpop.permute.xlu0 %1838 }
 0x37a   : > { %9123 = vst [vmem:[#allocation11_spill] sm:$0xff] %v6748_v12  ;;  %v1471_v12 = vsel %vm1440_vm7, %v1438_v51, %v9128_v7 }
 0x37b   : > { %9124 = vst [vmem:[#allocation135_spill] sm:$0xff] %v6750_v2  ;;  %3786 = vmatmul.msk.f32.gmra.mxu3 %vm2927_vm11, %v1602_v18  ;;  %v6765_v2 = vld [vmem:[%s5509_s28 + $0x60] sm:$0xff]  ;;  %v1504_v43 = vsel %vm1473_vm6, %v1471_v12, %v9129_v49  ;;  %v3891_v49 = vld [vmem:[%s4091_s13 + $0x170] sm:$0xff]  ;;  %s9241_s13 = smov 28  }
 0x37c   : > { %v1537_v18 = vsel %vm1506_vm8, %v1504_v43, %v9130_v52  ;;  %v1373_v29 = vsel %vm1341_vm3, %v3891_v49, %v9135_v59  ;;  %v9136_v43 = vld [vmem:[#allocation116_spill] sm:$0xff]  ;;  %v9142_v49 = vld [vmem:[#allocation206_spill] sm:$0xff] }
 0x37d   : > { %v1570_v12 = vsel %vm1539_vm10, %v1537_v18, %v9132_v53  ;;  %v1406_v52 = vsel %vm1374_vm4, %v1373_v29, %v9136_v43  ;;  %v9138_v18 = vld [vmem:[#allocation163_spill] sm:$0xff]  ;;  %v6816_v29 = vld [vmem:[%s5509_s28 + $0x68] sm:$0xff] }
 0x37e   : > { %2078 = vrot.lane.b32.xlu2 %v6765_v2, %s3992_s16  ;;  %v1603_v7 = vsel %vm1572_vm9, %v1570_v12, %v6088_v11  ;;  %v9139_v11 = vld [vmem:[#allocation9_spill] sm:$0xff]  ;;  %v6811_v12 = vld [vmem:[%s5509_s28 + $0x78] sm:$0xff] }
 0x37f   : > { %2076 = vrot.lane.b32.xlu1 %v6772_v30, %s3992_s16  ;;  %2074 = vrot.lane.b32.xlu0 %v6777_v19, %s3992_s16 }
 0x380   : > { %v6783_v0 = vpop.permute.xlu2 %1978 }
 0x381   : > { %9131 = vst [vmem:[#allocation55_spill] sm:$0xff] %v6783_v0  ;;  %v6787_v44 = vpop.permute.xlu1 %1846  ;;  %v6789_v51 = vpop.permute.xlu0 %1844  ;;  %v9137_v0 = vld [vmem:[#allocation133_spill] sm:$0xff] }
 0x382   : > { %9133 = vst [vmem:[#allocation62_spill] sm:$0xff] %v6787_v44  ;;  %v1439_v3 = vsel %vm1407_vm5, %v1406_v52, %v9137_v0  ;;  %v6804_v44 = vld [vmem:[%s5509_s28 + $0x80] sm:$0xff] }
 0x383   : > { %9134 = vst [vmem:[#allocation169_spill] sm:$0xff] %v6789_v51  ;;  %3787 = vmatmul.msk.f32.gmra.mxu3 %vm2927_vm11, %v1603_v7  ;;  %v1472_v53 = vsel %vm1440_vm7, %v1439_v3, %v9138_v18  ;;  %v9140_v3 = vld [vmem:[#allocation21_spill] sm:$0xff] }
 0x384   : > { %v1505_v59 = vsel %vm1473_vm6, %v1472_v53, %v9139_v11  ;;  %v6834_v11 = vld [vmem:[%s5509_s28 + $0xa8] sm:$0xff] }
 0x385   : > { %v1538_v0 = vsel %vm1506_vm8, %v1505_v59, %v9140_v3  ;;  %9145 = vst [vmem:[#allocation14_spill] sm:$0xff] %v6834_v11  ;;  %v6839_v59 = vld [vmem:[%s5509_s28 + $0x98] sm:$0xff]  ;;  %v6844_v3 = vld [vmem:[%s5509_s28 + $0x90] sm:$0xff] }
 0x386   : > { %2084 = vrot.lane.b32.xlu2 %v6804_v44, %s3992_s16  ;;  %v1571_v43 = vsel %vm1539_vm10, %v1538_v0, %v9142_v49  ;;  %9146 = vst [vmem:[#allocation28_spill] sm:$0xff] %v6844_v3 }
 0x387   : > { %2082 = vrot.lane.b32.xlu1 %v6811_v12, %s3992_s16  ;;  %2080 = vrot.lane.b32.xlu0 %v6816_v29, %s3992_s16  ;;  %v1604_v53 = vsel %vm1572_vm9, %v1571_v43, %v6338_v20  ;;  %v6855_v43 = vld [vmem:[%s5509_s28 + $0xc8] sm:$0xff] }
 0x388   : > { %v6822_v7 = vpop.permute.xlu2 %1984  ;;  %9149 = vst [vmem:[#allocation49_spill] sm:$0xff] %v6855_v43 }
 0x389   : > { %9141 = vst [vmem:[#allocation175_spill] sm:$0xff] %v6822_v7  ;;  %v6826_v52 = vpop.permute.xlu1 %1852  ;;  %v6828_v18 = vpop.permute.xlu0 %1850  ;;  %v6878_v7 = vld [vmem:[%s5509_s28 + $0xe0] sm:$0xff] }
 0x38a   : > { %9143 = vst [vmem:[#allocation192_spill] sm:$0xff] %v6826_v52  ;;  %v6865_v52 = vld [vmem:[%s5509_s28 + $0xb0] sm:$0xff] }
 0x38b   : > { %9144 = vst [vmem:[#allocation204_spill] sm:$0xff] %v6828_v18  ;;  %3788 = vmatmul.msk.f32.gmra.mxu3 %vm2927_vm11, %v1604_v53  ;;  %v6860_v53 = vld [vmem:[%s5509_s28 + $0xc0] sm:$0xff] }
 0x38c   : > { %9150 = vst [vmem:[#allocation45_spill] sm:$0xff] %v6860_v53 }
 0x38d   : > { %9151 = vst [vmem:[#allocation41_spill] sm:$0xff] %v6865_v52 }
 0x38e   : > { %2090 = vrot.lane.b32.xlu2 %v6834_v11, %s3992_s16  ;;  %9155 = vst [vmem:[#allocation127_spill] sm:$0xff] %v6878_v7  ;;  %v6894_v11 = vld [vmem:[%s5509_s28 + $0x110] sm:$0xff] }
 0x38f   : > { %2088 = vrot.lane.b32.xlu1 %v6839_v59, %s3992_s16  ;;  %2086 = vrot.lane.b32.xlu0 %v6844_v3, %s3992_s16 }
 0x390   : > { %v6848_v20 = vpop.permute.xlu2 %1990 }
 0x391   : > { %9147 = vst [vmem:[#allocation191_spill] sm:$0xff] %v6848_v20  ;;  %v6850_v0 = vpop.permute.xlu1 %1970  ;;  %v6852_v49 = vpop.permute.xlu0 %1968 }
 0x392   : > { %9148 = vst [vmem:[#allocation194_spill] sm:$0xff] %v6850_v0 }
 0x396   : > { %2096 = vrot.lane.b32.xlu2 %v6855_v43, %s3992_s16  ;;  %v6883_v43 = vld [vmem:[%s5509_s28 + $0xd8] sm:$0xff] }
 0x397   : > { %2094 = vrot.lane.b32.xlu1 %v6860_v53, %s3992_s16  ;;  %2092 = vrot.lane.b32.xlu0 %v6865_v52, %s3992_s16  ;;  %9156 = vst [vmem:[#allocation134_spill] sm:$0xff] %v6883_v43 }
 0x398   : > { %v6869_v18 = vpop.permute.xlu2 %1996 }
 0x399   : > { %9152 = vst [vmem:[#allocation77_spill] sm:$0xff] %v6869_v18  ;;  %v6871_v51 = vpop.permute.xlu1 %1976  ;;  %v6873_v20 = vpop.permute.xlu0 %1974 }
 0x39a   : > { %9153 = vst [vmem:[#allocation97_spill] sm:$0xff] %v6871_v51 }
 0x39b   : > { %9154 = vst [vmem:[#allocation96_spill] sm:$0xff] %v6873_v20 }
 0x39e   : > { %2102 = vrot.lane.b32.xlu2 %v5834_v22, %s3992_s16  ;;  %v6899_v22 = vld [vmem:[%s5509_s28 + $0x108] sm:$0xff] }
 0x39f   : > { %2100 = vrot.lane.b32.xlu1 %v6878_v7, %s3992_s16  ;;  %2098 = vrot.lane.b32.xlu0 %v6883_v43, %s3992_s16  ;;  %v6904_v7 = vld [vmem:[%s5509_s28 + $0xf8] sm:$0xff] }
 0x3a0   : > { %v6887_v52 = vpop.permute.xlu2 %2002 }
 0x3a1   : > { %9157 = vst [vmem:[#allocation142_spill] sm:$0xff] %v6887_v52  ;;  %v6889_v18 = vpop.permute.xlu1 %1982  ;;  %v6891_v51 = vpop.permute.xlu0 %1980 }
 0x3a2   : > { %9158 = vst [vmem:[#allocation157_spill] sm:$0xff] %v6889_v18 }
 0x3a3   : > { %9159 = vst [vmem:[#allocation168_spill] sm:$0xff] %v6891_v51 }
 0x3a6   : > { %2108 = vrot.lane.b32.xlu2 %v6894_v11, %s3992_s16 }
 0x3a7   : > { %2106 = vrot.lane.b32.xlu1 %v6899_v22, %s3992_s16  ;;  %2104 = vrot.lane.b32.xlu0 %v6904_v7, %s3992_s16 }
 0x3a8   : > { %v6908_v43 = vpop.permute.xlu2 %2008 }
 0x3a9   : > { %9160 = vst [vmem:[#allocation167_spill] sm:$0xff] %v6908_v43  ;;  %v6910_v18 = vpop.permute.xlu1 %1988  ;;  %v6912_v51 = vpop.permute.xlu0 %1986 }
 0x3aa   : > { %9161 = vst [vmem:[#allocation15_spill] sm:$0xff] %v6910_v18  ;;  %v9177_v18 = vld [vmem:[#allocation189_spill] sm:$0xff] }
 0x3ab   : > { %9162 = vst [vmem:[#allocation22_spill] sm:$0xff] %v6912_v51  ;;  %v9178_v51 = vld [vmem:[#allocation190_spill] sm:$0xff] }
 0x3ae   : > { %2114 = vrot.lane.b32.xlu2 %v9058_v41, %s3992_s16 }
 0x3af   : > { %2112 = vrot.lane.b32.xlu1 %v9062_v57, %s3992_s16  ;;  %2110 = vrot.lane.b32.xlu0 %v9064_v32, %s3992_s16 }
 0x3b0   : > { %v6920_v52 = vpop.permute.xlu2 %2014 }
 0x3b1   : > { %9163 = vst [vmem:[#allocation201_spill] sm:$0xff] %v6920_v52  ;;  %v6922_v42 = vpop.permute.xlu1 %1994  ;;  %v6924_v20 = vpop.permute.xlu0 %1992  ;;  %v6939_v52 = vld [vmem:[%s5509_s28 + $0x180] sm:$0xff] }
 0x3b2   : > { %9164 = vst [vmem:[#allocation202_spill] sm:$0xff] %v6924_v20  ;;  %v9174_v20 = vld [vmem:[#allocation182_spill] sm:$0xff] }
 0x3b3   : > { %9168 = vst [vmem:[#allocation65_spill] sm:$0xff] %v6939_v52 }
 0x3b6   : > { %2120 = vrot.lane.b32.xlu2 %v9078_v1, %s3992_s16 }
 0x3b7   : > { %2118 = vrot.lane.b32.xlu1 %v9081_v58, %s3992_s16  ;;  %2116 = vrot.lane.b32.xlu0 %v9059_v21, %s3992_s16 }
 0x3b8   : > { %v6932_v41 = vpop.permute.xlu2 %2020 }
 0x3b9   : > { %9165 = vst [vmem:[#allocation203_spill] sm:$0xff] %v6932_v41  ;;  %v6934_v57 = vpop.permute.xlu1 %2000  ;;  %v6936_v32 = vpop.permute.xlu0 %1998  ;;  %v6954_v41 = vld [vmem:[%s5509_s28 + $0x188] sm:$0xff] }
 0x3ba   : > { %9166 = vst [vmem:[#allocation38_spill] sm:$0xff] %v6934_v57 }
 0x3bb   : > { %9167 = vst [vmem:[#allocation115_spill] sm:$0xff] %v6936_v32  ;;  %v9173_v32 = vld [vmem:[#allocation181_spill] sm:$0xff] }
 0x3bc   : > { %9172 = vst [vmem:[#allocation126_spill] sm:$0xff] %v6954_v41 }
 0x3be   : > { %2126 = vrot.lane.b32.xlu2 %v6939_v52, %s3992_s16 }
 0x3bf   : > { %2124 = vrot.lane.b32.xlu1 %v5997_v26, %s3992_s16  ;;  %2122 = vrot.lane.b32.xlu0 %v9096_v40, %s3992_s16 }
 0x3c0   : > { %v6947_v1 = vpop.permute.xlu2 %2026 }
 0x3c1   : > { %9169 = vst [vmem:[#allocation76_spill] sm:$0xff] %v6947_v1  ;;  %v6949_v21 = vpop.permute.xlu1 %2006  ;;  %v6951_v58 = vpop.permute.xlu0 %2004 }
 0x3c2   : > { %9170 = vst [vmem:[#allocation87_spill] sm:$0xff] %v6949_v21 }
 0x3c3   : > { %9171 = vst [vmem:[#allocation110_spill] sm:$0xff] %v6951_v58  ;;  %v9183_v58 = vld [vmem:[#allocation199_spill] sm:$0xff] }
 0x3c6   : > { %2170 = vrot.lane.b32.xlu2 %v9173_v32, %s3993_s17  ;;  %v9179_v32 = vld [vmem:[#allocation144_spill] sm:$0xff] }
 0x3c7   : > { %2168 = vrot.lane.b32.xlu1 %v9174_v20, %s3993_s17  ;;  %2128 = vrot.lane.b32.xlu0 %v6954_v41, %s3992_s16 }
 0x3c8   : > { %v6962_v26 = vpop.permute.xlu2 %2066 }
 0x3c9   : > { %v6964_v40 = vpop.permute.xlu1 %2012  ;;  %v6966_v1 = vpop.permute.xlu0 %2010 }
 0x3ca   : > { %9175 = vst [vmem:[#allocation23_spill] sm:$0xff] %v6964_v40  ;;  %v9184_v40 = vld [vmem:[#allocation200_spill] sm:$0xff] }
 0x3cb   : > { %9176 = vst [vmem:[#allocation151_spill] sm:$0xff] %v6966_v1  ;;  %v9185_v1 = vld [vmem:[#allocation188_spill] sm:$0xff] }
 0x3ce   : > { %2176 = vrot.lane.b32.xlu2 %v9177_v18, %s3993_s17 }
 0x3cf   : > { %2174 = vrot.lane.b32.xlu1 %v9178_v51, %s3993_s17  ;;  %2172 = vrot.lane.b32.xlu0 %v9179_v32, %s3993_s17 }
 0x3d0   : > { %v6974_v43 = vpop.permute.xlu2 %2072 }
 0x3d1   : > { %9180 = vst [vmem:[#allocation156_spill] sm:$0xff] %v6974_v43  ;;  %v6976_v20 = vpop.permute.xlu1 %2018  ;;  %v6978_v21 = vpop.permute.xlu0 %2016  ;;  %v9189_v43 = vld [vmem:[#allocation89_spill] sm:$0xff] }
 0x3d2   : > { %9181 = vst [vmem:[#allocation165_spill] sm:$0xff] %v6976_v20  ;;  %v9190_v20 = vld [vmem:[#allocation208_spill] sm:$0xff] }
 0x3d3   : > { %9182 = vst [vmem:[#allocation177_spill] sm:$0xff] %v6978_v21  ;;  %v9191_v21 = vld [vmem:[#allocation198_spill] sm:$0xff] }
 0x3d6   : > { %2182 = vrot.lane.b32.xlu2 %v9183_v58, %s3993_s17 }
 0x3d7   : > { %2180 = vrot.lane.b32.xlu1 %v9184_v40, %s3993_s17  ;;  %2178 = vrot.lane.b32.xlu0 %v9185_v1, %s3993_s17 }
 0x3d8   : > { %v6986_v57 = vpop.permute.xlu2 %2078 }
 0x3d9   : > { %9186 = vst [vmem:[#allocation210_spill] sm:$0xff] %v6986_v57  ;;  %v6988_v37 = vpop.permute.xlu1 %2024  ;;  %v6990_v45 = vpop.permute.xlu0 %2022  ;;  %v9195_v57 = vld [vmem:[#allocation88_spill] sm:$0xff] }
 0x3da   : > { %9187 = vst [vmem:[#allocation20_spill] sm:$0xff] %v6988_v37  ;;  %v9196_v37 = vld [vmem:[#allocation211_spill] sm:$0xff] }
 0x3db   : > { %9188 = vst [vmem:[#allocation13_spill] sm:$0xff] %v6990_v45  ;;  %v9197_v45 = vld [vmem:[#allocation48_spill] sm:$0xff] }
 0x3de   : > { %2188 = vrot.lane.b32.xlu2 %v9189_v43, %s3993_s17 }
 0x3df   : > { %2186 = vrot.lane.b32.xlu1 %v9190_v20, %s3993_s17  ;;  %2184 = vrot.lane.b32.xlu0 %v9191_v21, %s3993_s17 }
 0x3e0   : > { %v6998_v53 = vpop.permute.xlu2 %2084 }
 0x3e1   : > { %9192 = vst [vmem:[#allocation209_spill] sm:$0xff] %v6998_v53  ;;  %v7000_v55 = vpop.permute.xlu1 %2030  ;;  %v7002_v16 = vpop.permute.xlu0 %2028  ;;  %v9201_v53 = vld [vmem:[#allocation78_spill] sm:$0xff] }
 0x3e2   : > { %9193 = vst [vmem:[#allocation108_spill] sm:$0xff] %v7000_v55  ;;  %v9202_v55 = vld [vmem:[#allocation214_spill] sm:$0xff] }
 0x3e3   : > { %9194 = vst [vmem:[#allocation66_spill] sm:$0xff] %v7002_v16  ;;  %v9203_v16 = vld [vmem:[#allocation42_spill] sm:$0xff] }
 0x3e6   : > { %2194 = vrot.lane.b32.xlu2 %v9195_v57, %s3993_s17 }
 0x3e7   : > { %2192 = vrot.lane.b32.xlu1 %v9196_v37, %s3993_s17  ;;  %2190 = vrot.lane.b32.xlu0 %v9197_v45, %s3993_s17 }
 0x3e8   : > { %v7010_v46 = vpop.permute.xlu2 %2090 }
 0x3e9   : > { %9198 = vst [vmem:[#allocation75_spill] sm:$0xff] %v7010_v46  ;;  %v7012_v56 = vpop.permute.xlu1 %2070  ;;  %v7014_v35 = vpop.permute.xlu0 %2068  ;;  %v9207_v46 = vld [vmem:[#allocation30_spill] sm:$0xff] }
 0x3ea   : > { %9199 = vst [vmem:[#allocation64_spill] sm:$0xff] %v7012_v56  ;;  %v9208_v56 = vld [vmem:[#allocation92_spill] sm:$0xff] }
 0x3eb   : > { %9200 = vst [vmem:[#allocation143_spill] sm:$0xff] %v7014_v35 }
 0x3ee   : > { %2200 = vrot.lane.b32.xlu2 %v9201_v53, %s3993_s17  ;;  %v9209_v53 = vld [vmem:[#allocation47_spill] sm:$0xff] }
 0x3ef   : > { %2198 = vrot.lane.b32.xlu1 %v9202_v55, %s3993_s17  ;;  %2196 = vrot.lane.b32.xlu0 %v9203_v16, %s3993_s17 }
 0x3f0   : > { %v7022_v57 = vpop.permute.xlu2 %2096 }
 0x3f1   : > { %9204 = vst [vmem:[#allocation63_spill] sm:$0xff] %v7022_v57  ;;  %v7024_v37 = vpop.permute.xlu1 %2076  ;;  %v7026_v45 = vpop.permute.xlu0 %2074  ;;  %v9213_v57 = vld [vmem:[#allocation33_spill] sm:$0xff] }
 0x3f2   : > { %9205 = vst [vmem:[#allocation101_spill] sm:$0xff] %v7024_v37  ;;  %v9214_v37 = vld [vmem:[#allocation91_spill] sm:$0xff] }
 0x3f3   : > { %9206 = vst [vmem:[#allocation109_spill] sm:$0xff] %v7026_v45  ;;  %v9215_v45 = vld [vmem:[#allocation145_spill] sm:$0xff] }
 0x3f6   : > { %2206 = vrot.lane.b32.xlu2 %v9207_v46, %s3993_s17 }
 0x3f7   : > { %2204 = vrot.lane.b32.xlu1 %v9208_v56, %s3993_s17  ;;  %2202 = vrot.lane.b32.xlu0 %v9209_v53, %s3993_s17 }
 0x3f8   : > { %v7034_v55 = vpop.permute.xlu2 %2102 }
 0x3f9   : > { %9210 = vst [vmem:[#allocation117_spill] sm:$0xff] %v7034_v55  ;;  %v7036_v43 = vpop.permute.xlu1 %2082  ;;  %v7038_v16 = vpop.permute.xlu0 %2080  ;;  %v9219_v55 = vld [vmem:[#allocation69_spill] sm:$0xff] }
 0x3fa   : > { %9211 = vst [vmem:[#allocation137_spill] sm:$0xff] %v7036_v43  ;;  %v9220_v43 = vld [vmem:[#allocation81_spill] sm:$0xff] }
 0x3fb   : > { %9212 = vst [vmem:[#allocation150_spill] sm:$0xff] %v7038_v16  ;;  %v9221_v16 = vld [vmem:[#allocation44_spill] sm:$0xff] }
 0x3fe   : > { %2212 = vrot.lane.b32.xlu2 %v9213_v57, %s3993_s17 }
 0x3ff   : > { %2210 = vrot.lane.b32.xlu1 %v9214_v37, %s3993_s17  ;;  %2208 = vrot.lane.b32.xlu0 %v9215_v45, %s3993_s17 }
 0x400   : > { %v7046_v35 = vpop.permute.xlu2 %2108 }
 0x401   : > { %9216 = vst [vmem:[#allocation60_spill] sm:$0xff] %v7046_v35  ;;  %v7048_v0 = vpop.permute.xlu1 %2088  ;;  %v7050_v53 = vpop.permute.xlu0 %2086  ;;  %v7065_v35 = vld [vmem:[%s5509_s28 + $0x190] sm:$0x3] }
 0x402   : > { %9217 = vst [vmem:[#allocation172_spill] sm:$0xff] %v7048_v0  ;;  %v2164_v0 = vrot.slane %v6954_v41, 1 }
 0x403   : > { %9218 = vst [vmem:[#allocation176_spill] sm:$0xff] %v7050_v53  ;;  %v9225_v53 = vld [vmem:[#allocation54_spill] sm:$0xff] }
 0x404   : > { %9224 = vst [vmem:[#allocation212_spill] sm:$0xff] %v7065_v35 }
 0x406   : > { %2218 = vrot.lane.b32.xlu2 %v9219_v55, %s3993_s17  ;;  %v2166_v55 = vrot.slane %v7065_v35, 1 }
 0x407   : > { %2216 = vrot.lane.b32.xlu1 %v9220_v43, %s3993_s17  ;;  %2214 = vrot.lane.b32.xlu0 %v9221_v16, %s3993_s17 }
 0x408   : > { %v7058_v39 = vpop.permute.xlu2 %2114 }
 0x409   : > { %9222 = vst [vmem:[#allocation10_spill] sm:$0xff] %v7058_v39  ;;  %v7060_v36 = vpop.permute.xlu1 %2094  ;;  %v7062_v3 = vpop.permute.xlu0 %2092  ;;  %v2163_v39 = vrot.slane %v6939_v52, 1 }
 0x40a   : > { %9223 = vst [vmem:[#allocation27_spill] sm:$0xff] %v7060_v36 }
 0x40b   : > { %v7086_v41 = vsel %vm385_vm0, %v2163_v39, %v2164_v0 }
 0x40c   : > { %9228 = vst [vmem:[#allocation61_spill] sm:$0xff] %v7086_v41 }
 0x40e   : > { %2224 = vrot.lane.b32.xlu2 %v6061_v24, %s3993_s17  ;;  %v7083_v24 = vsel %vm385_vm0, %v2164_v0, %v2166_v55 }
 0x40f   : > { %2222 = vrot.lane.b32.xlu1 %v6064_v50, %s3993_s17  ;;  %2220 = vrot.lane.b32.xlu0 %v9225_v53, %s3993_s17  ;;  %9227 = vst [vmem:[#allocation119_spill] sm:$0xff] %v7083_v24 }
 0x410   : > { %v7076_v36 = vpop.permute.xlu2 %2120 }
 0x411   : > { %9226 = vst [vmem:[#allocation213_spill] sm:$0xff] %v7076_v36  ;;  %v7078_v43 = vpop.permute.xlu1 %2100  ;;  %v7080_v16 = vpop.permute.xlu0 %2098 }
 0x416   : > { %2230 = vrot.lane.b32.xlu2 %v7083_v24, %s3993_s17 }
 0x417   : > { %2228 = vrot.lane.b32.xlu1 %v7086_v41, %s3993_s17  ;;  %2226 = vrot.lane.b32.xlu0 %v6054_v14, %s3993_s17 }
 0x418   : > { %v7094_v36 = vpop.permute.xlu2 %2126 }
 0x419   : > { %9229 = vst [vmem:[#allocation56_spill] sm:$0xff] %v7094_v36  ;;  %v7096_v35 = vpop.permute.xlu1 %2106  ;;  %v7098_v52 = vpop.permute.xlu0 %2104 }
 0x41a   : > { %9230 = vst [vmem:[#allocation46_spill] sm:$0xff] %v7096_v35 }
 0x41e   : > { %2273 = vrot.lane.b32.xlu2 %v6177_v13, %s3994_s18 }
 0x41f   : > { %2271 = vrot.lane.b32.xlu1 %v6180_v33, %s3994_s18  ;;  %2269 = vrot.lane.b32.xlu0 %v6113_v38, %s3994_s18 }
 0x420   : > { %v7106_v39 = vpop.permute.xlu2 %2170 }
 0x421   : > { %v7108_v55 = vpop.permute.xlu1 %2112  ;;  %v7110_v0 = vpop.permute.xlu0 %2110 }
 0x422   : > { %9231 = vst [vmem:[#allocation80_spill] sm:$0xff] %v7108_v55 }
 0x423   : > { %9232 = vst [vmem:[#allocation100_spill] sm:$0xff] %v7110_v0 }
 0x426   : > { %2279 = vrot.lane.b32.xlu2 %v6237_v5, %s3994_s18 }
 0x427   : > { %2277 = vrot.lane.b32.xlu1 %v6240_v60, %s3994_s18  ;;  %2275 = vrot.lane.b32.xlu0 %v6170_v34, %s3994_s18 }
 0x428   : > { %v7118_v36 = vpop.permute.xlu2 %2176 }
 0x429   : > { %v7120_v33 = vpop.permute.xlu1 %2118  ;;  %v7122_v38 = vpop.permute.xlu0 %2116 }
 0x42a   : > { %9233 = vst [vmem:[#allocation99_spill] sm:$0xff] %v7120_v33 }
 0x42b   : > { %9234 = vst [vmem:[#allocation130_spill] sm:$0xff] %v7122_v38 }
 0x42e   : > { %2285 = vrot.lane.b32.xlu2 %v6300_v6, %s3994_s18 }
 0x42f   : > { %2283 = vrot.lane.b32.xlu1 %v6303_v54, %s3994_s18  ;;  %2281 = vrot.lane.b32.xlu0 %v6230_v48, %s3994_s18 }
 0x430   : > { %v7130_v55 = vpop.permute.xlu2 %2182 }
 0x431   : > { %9235 = vst [vmem:[#allocation136_spill] sm:$0xff] %v7130_v55  ;;  %v7132_v24 = vpop.permute.xlu1 %2124  ;;  %v7134_v41 = vpop.permute.xlu0 %2122 }
 0x432   : > { %9236 = vst [vmem:[#allocation51_spill] sm:$0xff] %v7132_v24 }
 0x433   : > { %9237 = vst [vmem:[#allocation159_spill] sm:$0xff] %v7134_v41 }
 0x436   : > { %2291 = vrot.lane.b32.xlu2 %v6360_v28, %s3994_s18 }
 0x437   : > { %2289 = vrot.lane.b32.xlu1 %v6363_v25, %s3994_s18  ;;  %2287 = vrot.lane.b32.xlu0 %v6293_v23, %s3994_s18 }
 0x438   : > { %v7142_v33 = vpop.permute.xlu2 %2188 }
 0x439   : > { %9238 = vst [vmem:[#allocation171_spill] sm:$0xff] %v7142_v33  ;;  %v7144_v38 = vpop.permute.xlu1 %2168  ;;  %v7146_v0 = vpop.permute.xlu0 %2128 }
 0x43a   : > { %9239 = vst [vmem:[#allocation170_spill] sm:$0xff] %v7146_v0 }
 0x43e   : > { %2367 = vrot.lane.b32.xlu2 %v6733_v17, %s9240_s10 }
 0x43f   : > { %2295 = vrot.lane.b32.xlu1 %v6426_v27, %s3994_s18  ;;  %2293 = vrot.lane.b32.xlu0 %v6353_v63, %s3994_s18 }
 0x440   : > { %v7154_v24 = vpop.permute.xlu2 %2194 }
 0x441   : > { %v7156_v41 = vpop.permute.xlu1 %2174  ;;  %v7158_v14 = vpop.permute.xlu0 %2172 }
 0x446   : > { %2369 = vrot.lane.b32.xlu2 %v6726_v15, %s9240_s10 }
 0x447   : > { %2570 = vrot.lane.b32.xlu1 %v6177_v13, %s3997_s26  ;;  %2469 = vrot.lane.b32.xlu0 %v9179_v32, %s9241_s13 }
 0x448   : > { %v7166_v0 = vpop.permute.xlu2 %2200 }
 0x449   : > { %v7168_v33 = vpop.permute.xlu1 %2180  ;;  %v7170_v35 = vpop.permute.xlu0 %2178 }
 0x44a   : > { %9242 = vst [vmem:[#allocation216_spill] sm:$0xff] %v7168_v33  ;;  %v7197_v33 = vld [vmem:[%s5509_s28 + $0xf0] sm:$0xff] }
 0x44e   : > { %2371 = vrot.lane.b32.xlu2 %v6777_v19, %s9240_s10 }
 0x44f   : > { %2572 = vrot.lane.b32.xlu1 %v6170_v34, %s3997_s26  ;;  %2471 = vrot.lane.b32.xlu0 %v9178_v51, %s9241_s13 }
 0x450   : > { %v7178_v13 = vpop.permute.xlu2 %2206 }
 0x451   : > { %v7180_v55 = vpop.permute.xlu1 %2186  ;;  %v7182_v32 = vpop.permute.xlu0 %2184 }
 0x452   : > { %9243 = vst [vmem:[#allocation19_spill] sm:$0xff] %v7180_v55 }
 0x456   : > { %2373 = vrot.lane.b32.xlu2 %v6772_v30, %s9240_s10 }
 0x457   : > { %2574 = vrot.lane.b32.xlu1 %v6240_v60, %s3997_s26  ;;  %2473 = vrot.lane.b32.xlu0 %v9177_v18, %s9241_s13 }
 0x458   : > { %v7190_v50 = vpop.permute.xlu2 %2212 }
 0x459   : > { %v7192_v34 = vpop.permute.xlu1 %2192  ;;  %v7194_v51 = vpop.permute.xlu0 %2190 }
 0x45a   : > { %9244 = vst [vmem:[#allocation25_spill] sm:$0xff] %v7192_v34 }
 0x45b   : > { %9245 = vst [vmem:[#allocation215_spill] sm:$0xff] %v7194_v51 }
 0x45e   : > { %2399 = vrot.lane.b32.xlu2 %v7197_v33, %s9240_s10 }
 0x45f   : > { %2475 = vrot.lane.b32.xlu1 %v9185_v1, %s9241_s13  ;;  %2301 = vrot.lane.b32.xlu0 %v6486_v47, %s3994_s18 }
 0x460   : > { %v7205_v60 = vpop.permute.xlu2 %2218 }
 0x461   : > { %9246 = vst [vmem:[#allocation118_spill] sm:$0xff] %v7205_v60  ;;  %v7207_v18 = vpop.permute.xlu1 %2198  ;;  %v7209_v55 = vpop.permute.xlu0 %2196 }
 0x462   : > { %9247 = vst [vmem:[#allocation39_spill] sm:$0xff] %v7207_v18 }
 0x463   : > { %9248 = vst [vmem:[#allocation187_spill] sm:$0xff] %v7209_v55 }
 0x466   : > { %2602 = vrot.lane.b32.xlu2 %v6476_v62, %s3997_s26 }
 0x467   : > { %2501 = vrot.lane.b32.xlu1 %v9208_v56, %s9241_s13  ;;  %2576 = vrot.lane.b32.xlu0 %v6237_v5, %s3997_s26 }
 0x468   : > { %v7217_v34 = vpop.permute.xlu2 %2224 }
 0x469   : > { %9249 = vst [vmem:[#allocation79_spill] sm:$0xff] %v7217_v34  ;;  %v7219_v1 = vpop.permute.xlu1 %2204  ;;  %v7221_v51 = vpop.permute.xlu0 %2202 }
 0x46e   : > { %2477 = vrot.lane.b32.xlu2 %v9184_v40, %s9241_s13 }
 0x46f   : > { %2303 = vrot.lane.b32.xlu1 %v6483_v10, %s3994_s18  ;;  %2375 = vrot.lane.b32.xlu0 %v6765_v2, %s9240_s10 }
 0x470   : > { %v7229_v18 = vpop.permute.xlu2 %2230 }
 0x471   : > { %9250 = vst [vmem:[#allocation138_spill] sm:$0xff] %v7229_v18  ;;  %v7231_v56 = vpop.permute.xlu1 %2210  ;;  %v7233_v5 = vpop.permute.xlu0 %2208 }
 0x476   : > { %2503 = vrot.lane.b32.xlu2 %v9207_v46, %s9241_s13 }
 0x477   : > { %2578 = vrot.lane.b32.xlu1 %v6230_v48, %s3997_s26  ;;  %2401 = vrot.lane.b32.xlu0 %v6904_v7, %s9240_s10 }
 0x478   : > { %v7241_v40 = vpop.permute.xlu2 %2273 }
 0x479   : > { %v7243_v34 = vpop.permute.xlu1 %2216  ;;  %v7245_v55 = vpop.permute.xlu0 %2214 }
 0x47a   : > { %9251 = vst [vmem:[#allocation70_spill] sm:$0xff] %v7243_v34 }
 0x47e   : > { %2305 = vrot.lane.b32.xlu2 %v6476_v62, %s3994_s18 }
 0x47f   : > { %2377 = vrot.lane.b32.xlu1 %v6816_v29, %s9240_s10  ;;  %2604 = vrot.lane.b32.xlu0 %v6549_v9, %s3997_s26 }
 0x480   : > { %v7253_v46 = vpop.permute.xlu2 %2279 }
 0x481   : > { %v7255_v48 = vpop.permute.xlu1 %2222  ;;  %v7257_v18 = vpop.permute.xlu0 %2220 }
 0x482   : > { %9252 = vst [vmem:[#allocation113_spill] sm:$0xff] %v7255_v48 }
 0x483   : > { %9253 = vst [vmem:[#allocation90_spill] sm:$0xff] %v7257_v18 }
 0x486   : > { %2580 = vrot.lane.b32.xlu2 %v6303_v54, %s3997_s26 }
 0x487   : > { %2403 = vrot.lane.b32.xlu1 %v6899_v22, %s9240_s10  ;;  %2479 = vrot.lane.b32.xlu0 %v9183_v58, %s9241_s13 }
 0x488   : > { %v7265_v62 = vpop.permute.xlu2 %2285 }
 0x489   : > { %v7267_v29 = vpop.permute.xlu1 %2228  ;;  %v7269_v60 = vpop.permute.xlu0 %2226 }
 0x48a   : > { %9254 = vst [vmem:[#allocation128_spill] sm:$0xff] %v7267_v29  ;;  %v2926_v29 = vld [vmem:[%s8292_s3 + $0x20] sm:$0xf] }
 0x48b   : > { %9255 = vst [vmem:[#allocation129_spill] sm:$0xff] %v7269_v60  ;;  %v2925_v60 = vld [vmem:[%s8292_s3 + $0x18] sm:$0xff]  ;;  %3723 = vmatpush.msk.msra.mxu0 %vm3024_vm2, %v2926_v29  ;;  %3794 = vmatpush.msk.msra.mxu2 %vm3024_vm2, %v2926_v29 }
 0x48d   : > { %3040 = vmatpush.msra.mxu0 %v2925_v60  ;;  %3795 = vmatpush.msra.mxu2 %v2925_v60 }
 0x48e   : > { %2379 = vrot.lane.b32.xlu2 %v6811_v12, %s9240_s10  ;;  %v2923_v12 = vld [vmem:[%s8292_s3 + $0x8] sm:$0xff] }
 0x48f   : > { %2606 = vrot.lane.b32.xlu1 %v6546_v4, %s3997_s26  ;;  %2505 = vrot.lane.b32.xlu0 %v9215_v45, %s9241_s13  ;;  %v2924_v45 = vld [vmem:[%s8292_s3 + $0x10] sm:$0xff] }
 0x490   : > { %v7277_v54 = vpop.permute.xlu2 %2291  ;;  %3041 = vmatpush.msra.mxu0 %v2924_v45  ;;  %3796 = vmatpush.msra.mxu2 %v2924_v45 }
 0x491   : > { %9256 = vst [vmem:[#allocation158_spill] sm:$0xff] %v7277_v54  ;;  %v7279_v48 = vpop.permute.xlu1 %2271  ;;  %v2270_v58 = vpop.permute.xlu0 %2269 }
 0x492   : > { %3042 = vmatpush.msra.mxu0 %v2923_v12  ;;  %3797 = vmatpush.msra.mxu2 %v2923_v12 }
 0x496   : > { %2405 = vrot.lane.b32.xlu2 %v6894_v11, %s9240_s10  ;;  %v2922_v11 = vld [vmem:[%s8292_s3] sm:$0xff] }
 0x497   : > { %2481 = vrot.lane.b32.xlu1 %v9191_v21, %s9241_s13  ;;  %2307 = vrot.lane.b32.xlu0 %v6549_v9, %s3994_s18 }
 0x498   : > { %v2368_v29 = vpop.permute.xlu2 %2367  ;;  %3043 = vmatpush.msra.mxu0 %v2922_v11  ;;  %3798 = vmatpush.msra.mxu2 %v2922_v11 }
 0x499   : > { %v7301_v18 = vpop.permute.xlu1 %2277  ;;  %v7303_v34 = vpop.permute.xlu0 %2275 }
 0x49e   : > { %2608 = vrot.lane.b32.xlu2 %v6539_v8, %s3997_s26 }
 0x49f   : > { %2507 = vrot.lane.b32.xlu1 %v9214_v37, %s9241_s13  ;;  %2582 = vrot.lane.b32.xlu0 %v6300_v6, %s3997_s26  ;;  %v2679_v6 = vsel %vm1341_vm3, %v6839_v59, %v6389_v31 }
 0x4a0   : > { %v2370_v9 = vpop.permute.xlu2 %2369 }
 0x4a1   : > { %v7314_v21 = vpop.permute.xlu1 %2283  ;;  %v7316_v60 = vpop.permute.xlu0 %2281 }
 0x4a6   : > { %2483 = vrot.lane.b32.xlu2 %v9190_v20, %s9241_s13  ;;  %v2711_v20 = vsel %vm1374_vm4, %v2679_v6, %v6922_v42 }
 0x4a7   : > { %2309 = vrot.lane.b32.xlu1 %v6546_v4, %s3994_s18  ;;  %2381 = vrot.lane.b32.xlu0 %v6804_v44, %s9240_s10  ;;  %v7338_v4 = vld [vmem:[%s5509_s28 + $0x120] sm:$0xff]  ;;  %v2743_v44 = vsel %vm1407_vm5, %v2711_v20, %v7062_v3 }
 0x4a8   : > { %v2372_v45 = vpop.permute.xlu2 %2371  ;;  %9257 = vst [vmem:[#allocation154_spill] sm:$0xff] %v7338_v4  ;;  %v2775_v31 = vsel %vm1440_vm7, %v2743_v44, %v7154_v24  ;;  %v9258_v20 = vld [vmem:[#allocation28_spill] sm:$0xff]  ;;  %v9259_v44 = vld [vmem:[#allocation123_spill] sm:$0xff] }
 0x4a9   : > { %v7324_v37 = vpop.permute.xlu1 %2289  ;;  %v7326_v12 = vpop.permute.xlu0 %2287 }
 0x4ae   : > { %2509 = vrot.lane.b32.xlu2 %v9213_v57, %s9241_s13 }
 0x4af   : > { %2584 = vrot.lane.b32.xlu1 %v6293_v23, %s3997_s26  ;;  %2407 = vrot.lane.b32.xlu0 %v7338_v4, %s9240_s10  ;;  %v3908_v23 = vld [vmem:[%s5509_s28] sm:$0xff] }
 0x4b0   : > { %v7344_v11 = vpop.permute.xlu2 %2373  ;;  %v2666_v6 = vsel %vm1341_vm3, %v3908_v23, %v6336_v61  ;;  %v9260_v23 = vld [vmem:[#allocation53_spill] sm:$0xff] }
 0x4b1   : > { %v2296_v57 = vpop.permute.xlu1 %2295  ;;  %v7348_v54 = vpop.permute.xlu0 %2293  ;;  %v2698_v4 = vsel %vm1374_vm4, %v2666_v6, %v6852_v49 }
 0x4b2   : > { %v7351_v42 = vsel %vm1473_vm6, %v2775_v31, %v2296_v57  ;;  %v2730_v3 = vsel %vm1407_vm5, %v2698_v4, %v6962_v26 }
 0x4b3   : > { %v2762_v24 = vsel %vm1440_vm7, %v2730_v3, %v7144_v38  ;;  %v3909_v38 = vld [vmem:[%s5509_s28 + $0x8] sm:$0xff] }
 0x4b4   : > { %v2794_v61 = vsel %vm1473_vm6, %v2762_v24, %v2270_v58  ;;  %v2667_v6 = vsel %vm1341_vm3, %v3909_v38, %v9260_v23  ;;  %v9261_v3 = vld [vmem:[#allocation194_spill] sm:$0xff]  ;;  %v9262_v58 = vld [vmem:[#allocation143_spill] sm:$0xff]  ;;  %v9264_v23 = vld [vmem:[#allocation132_spill] sm:$0xff] }
 0x4b5   : > { %v2826_v49 = vsel %vm1506_vm8, %v2794_v61, %v2368_v29  ;;  %v7387_v61 = vld [vmem:[%s5509_s28 + $0x128] sm:$0xff] }
 0x4b6   : > { %2311 = vrot.lane.b32.xlu2 %v6539_v8, %s3994_s18 }
 0x4b7   : > { %2383 = vrot.lane.b32.xlu1 %v9258_v20, %s9240_s10  ;;  %2610 = vrot.lane.b32.xlu0 %v9259_v44, %s3997_s26  ;;  %v2699_v20 = vsel %vm1374_vm4, %v2667_v6, %v9261_v3  ;;  %v9265_v6 = vld [vmem:[#allocation43_spill] sm:$0xff] }
 0x4b8   : > { %v7369_v31 = vpop.permute.xlu2 %2399  ;;  %v2731_v24 = vsel %vm1407_vm5, %v2699_v20, %v9262_v58  ;;  %v2668_v3 = vsel %vm1341_vm3, %v9265_v6, %v9264_v23  ;;  %v9266_v20 = vld [vmem:[#allocation106_spill] sm:$0xff]  ;;  %v9270_v23 = vld [vmem:[#allocation48_spill] sm:$0xff] }
 0x4b9   : > { %v2571_v26 = vpop.permute.xlu1 %2570  ;;  %v2470_v4 = vpop.permute.xlu0 %2469  ;;  %v2763_v29 = vsel %vm1440_vm7, %v2731_v24, %v7106_v39  ;;  %v2700_v58 = vsel %vm1374_vm4, %v2668_v3, %v9266_v20  ;;  %v9271_v3 = vld [vmem:[#allocation37_spill] sm:$0xff] }
 0x4ba   : > { %v2858_v8 = vsel %vm1539_vm10, %v2826_v49, %v2470_v4  ;;  %v9263_v49 = vld [vmem:[#allocation89_spill] sm:$0xff] }
 0x4bb   : > { %v2890_v57 = vsel %vm1572_vm9, %v2858_v8, %v2571_v26  ;;  %v2795_v26 = vsel %vm1473_vm6, %v2763_v29, %v7279_v48  ;;  %v9267_v48 = vld [vmem:[#allocation64_spill] sm:$0xff]  ;;  %v9272_v20 = vld [vmem:[#allocation45_spill] sm:$0xff] }
 0x4bc   : > { %3724 = vmatmul.msk.f32.vlgmr.msra.gmra.mxu0 %vm2927_vm11, %v2890_v57  ;;  %v2827_v8 = vsel %vm1506_vm8, %v2795_v26, %v2370_v9  ;;  %v2732_v24 = vsel %vm1407_vm5, %v2700_v58, %v9267_v48  ;;  %v9268_v29 = vld [vmem:[#allocation84_spill] sm:$0xff]  ;;  %v2682_v58 = vsel %vm1341_vm3, %v9272_v20, %v9271_v3 }
 0x4bd   : > { %v2764_v9 = vsel %vm1440_vm7, %v2732_v24, %v7158_v14  ;;  %v7421_v14 = vld [vmem:[%s5509_s28 + $0x138] sm:$0xff]  ;;  %v9274_v24 = vld [vmem:[#allocation98_spill] sm:$0xff] }
 0x4be   : > { %2586 = vrot.lane.b32.xlu2 %v6363_v25, %s3997_s26  ;;  %v2796_v26 = vsel %vm1473_vm6, %v2764_v9, %v7241_v40  ;;  %v9273_v48 = vld [vmem:[#allocation8_spill] sm:$0xff] }
 0x4bf   : > { %2409 = vrot.lane.b32.xlu1 %v7387_v61, %s9240_s10  ;;  %2485 = vrot.lane.b32.xlu0 %v9263_v49, %s9241_s13  ;;  %v9269_v49 = vld [vmem:[#allocation44_spill] sm:$0xff]  ;;  %v2669_v9 = vsel %vm1341_vm3, %v9274_v24, %v9273_v48  ;;  %v9278_v48 = vld [vmem:[#allocation107_spill] sm:$0xff]  ;;  %v9279_v24 = vld [vmem:[#allocation81_spill] sm:$0xff] }
 0x4c0   : > { %v2603_v4 = vpop.permute.xlu2 %2602 }
 0x4c1   : > { %v2573_v57 = vpop.permute.xlu1 %2572  ;;  %v2472_v38 = vpop.permute.xlu0 %2471 }
 0x4c2   : > { %v2859_v25 = vsel %vm1539_vm10, %v2827_v8, %v2472_v38 }
 0x4c3   : > { %v2891_v39 = vsel %vm1572_vm9, %v2859_v25, %v2573_v57  ;;  %v2828_v57 = vsel %vm1506_vm8, %v2796_v26, %v2372_v45 }
 0x4c4   : > { %3725 = vmatmul.msk.f32.gmra.mxu0 %vm2927_vm11, %v2891_v39 }
 0x4c6   : > { %2385 = vrot.lane.b32.xlu2 %v6839_v59, %s9240_s10 }
 0x4c7   : > { %2612 = vrot.lane.b32.xlu1 %v9268_v29, %s3997_s26  ;;  %2511 = vrot.lane.b32.xlu0 %v9269_v49, %s9241_s13  ;;  %v9275_v49 = vld [vmem:[#allocation38_spill] sm:$0xff] }
 0x4c8   : > { %v2478_v8 = vpop.permute.xlu2 %2477  ;;  %v2714_v26 = vsel %vm1374_vm4, %v2682_v58, %v9275_v49 }
 0x4c9   : > { %v2575_v38 = vpop.permute.xlu1 %2574  ;;  %v2474_v25 = vpop.permute.xlu0 %2473 }
 0x4ca   : > { %v2860_v39 = vsel %vm1539_vm10, %v2828_v57, %v2474_v25  ;;  %v9276_v57 = vld [vmem:[#allocation96_spill] sm:$0xff] }
 0x4cb   : > { %v2892_v59 = vsel %vm1572_vm9, %v2860_v39, %v2575_v38  ;;  %v2701_v38 = vsel %vm1374_vm4, %v2669_v9, %v9276_v57  ;;  %v9277_v25 = vld [vmem:[#allocation156_spill] sm:$0xff] }
 0x4cc   : > { %3726 = vmatmul.msk.f32.gmra.mxu0 %vm2927_vm11, %v2892_v59  ;;  %v2733_v39 = vsel %vm1407_vm5, %v2701_v38, %v9277_v25  ;;  %v9282_v57 = vld [vmem:[#allocation52_spill] sm:$0xff] }
 0x4cd   : > { %v2670_v38 = vsel %vm1341_vm3, %v6733_v17, %v9282_v57  ;;  %v7491_v17 = vld [vmem:[%s5509_s28 + $0x140] sm:$0xff] }
 0x4ce   : > { %2411 = vrot.lane.b32.xlu2 %v7421_v14, %s9240_s10 }
 0x4cf   : > { %2487 = vrot.lane.b32.xlu1 %v9270_v23, %s9241_s13  ;;  %2313 = vrot.lane.b32.xlu0 %v9259_v44, %s3994_s18  ;;  %v2746_v44 = vsel %vm1407_vm5, %v2714_v26, %v7080_v16  ;;  %v2765_v23 = vsel %vm1440_vm7, %v2733_v39, %v7156_v41 }
 0x4d0   : > { %v2504_v40 = vpop.permute.xlu2 %2503  ;;  %v2778_v59 = vsel %vm1440_vm7, %v2746_v44, %v7166_v0  ;;  %v2797_v58 = vsel %vm1473_vm6, %v2765_v23, %v7303_v34 }
 0x4d1   : > { %v2476_v45 = vpop.permute.xlu1 %2475  ;;  %v2302_v6 = vpop.permute.xlu0 %2301  ;;  %v2829_v16 = vsel %vm1506_vm8, %v2797_v58, %v7344_v11  ;;  %v9280_v11 = vld [vmem:[#allocation211_spill] sm:$0xff] }
 0x4d2   : > { %v2810_v3 = vsel %vm1473_vm6, %v2778_v59, %v2302_v6  ;;  %v2861_v41 = vsel %vm1539_vm10, %v2829_v16, %v2476_v45  ;;  %v9284_v59 = vld [vmem:[#allocation109_spill] sm:$0xff] }
 0x4d3   : > { %v2842_v9 = vsel %vm1506_vm8, %v2810_v3, %v7369_v31  ;;  %v9281_v31 = vld [vmem:[#allocation14_spill] sm:$0xff] }
 0x4d6   : > { %2614 = vrot.lane.b32.xlu2 %v9278_v48, %s3997_s26 }
 0x4d7   : > { %2513 = vrot.lane.b32.xlu1 %v9279_v24, %s9241_s13  ;;  %2588 = vrot.lane.b32.xlu0 %v6360_v28, %s3997_s26  ;;  %v9285_v24 = vld [vmem:[#allocation69_spill] sm:$0xff] }
 0x4d8   : > { %v7458_v0 = vpop.permute.xlu2 %2305 }
 0x4d9   : > { %v2502_v6 = vpop.permute.xlu1 %2501  ;;  %v2577_v49 = vpop.permute.xlu0 %2576 }
 0x4da   : > { %v2874_v34 = vsel %vm1539_vm10, %v2842_v9, %v2502_v6  ;;  %v2893_v26 = vsel %vm1572_vm9, %v2861_v41, %v2577_v49  ;;  %v9286_v41 = vld [vmem:[#allocation184_spill] sm:$0xff] }
 0x4db   : > { %3727 = vmatmul.msk.f32.gmra.mxu0 %vm2927_vm11, %v2893_v26  ;;  %v2906_v28 = vsel %vm1572_vm9, %v2874_v34, %v2603_v4  ;;  %v9283_v4 = vld [vmem:[#allocation97_spill] sm:$0xff]  ;;  %v9288_v34 = vld [vmem:[#allocation142_spill] sm:$0xff] }
 0x4dc   : > { %3740 = vmatmul.msk.f32.vlgmr.msra.gmra.mxu2 %vm2927_vm11, %v2906_v28  ;;  %v2702_v39 = vsel %vm1374_vm4, %v2670_v38, %v9283_v4  ;;  %v9290_v38 = vld [vmem:[#allocation193_spill] sm:$0xff] }
 0x4dd   : > { %v2734_v23 = vsel %vm1407_vm5, %v2702_v39, %v9284_v59 }
 0x4de   : > { %2489 = vrot.lane.b32.xlu2 %v9280_v11, %s9241_s13  ;;  %v2766_v3 = vsel %vm1440_vm7, %v2734_v23, %v7118_v36  ;;  %v9287_v36 = vld [vmem:[#allocation49_spill] sm:$0xff] }
 0x4df   : > { %2315 = vrot.lane.b32.xlu1 %v9268_v29, %s3994_s18  ;;  %2387 = vrot.lane.b32.xlu0 %v9281_v31, %s9240_s10  ;;  %v2798_v29 = vsel %vm1473_vm6, %v2766_v3, %v7301_v18  ;;  %v2683_v6 = vsel %vm1341_vm3, %v9287_v36, %v9286_v41  ;;  %v9293_v3 = vld [vmem:[#allocation101_spill] sm:$0xff] }
 0x4e0   : > { %v2581_v45 = vpop.permute.xlu2 %2580  ;;  %v2715_v26 = vsel %vm1374_vm4, %v2683_v6, %v9288_v34  ;;  %v9296_v34 = vld [vmem:[#allocation134_spill] sm:$0xff] }
 0x4e1   : > { %v2304_v44 = vpop.permute.xlu1 %2303  ;;  %v2376_v25 = vpop.permute.xlu0 %2375  ;;  %v2747_v28 = vsel %vm1407_vm5, %v2715_v26, %v7078_v43 }
 0x4e2   : > { %v2830_v58 = vsel %vm1506_vm8, %v2798_v29, %v2376_v25  ;;  %v2779_v11 = vsel %vm1440_vm7, %v2747_v28, %v7221_v51 }
 0x4e3   : > { %v2862_v49 = vsel %vm1539_vm10, %v2830_v58, %v2478_v8  ;;  %v2811_v31 = vsel %vm1473_vm6, %v2779_v11, %v2304_v44  ;;  %v9289_v8 = vld [vmem:[#allocation41_spill] sm:$0xff]  ;;  %v9291_v44 = vld [vmem:[#allocation94_spill] sm:$0xff] }
 0x4e4   : > { %v2671_v59 = vsel %vm1341_vm3, %v6726_v15, %v9291_v44  ;;  %v7532_v58 = vld [vmem:[%s5509_s28 + $0x150] sm:$0xff] }
 0x4e6   : > { %2515 = vrot.lane.b32.xlu2 %v9285_v24, %s9241_s13  ;;  %v9294_v24 = vld [vmem:[#allocation88_spill] sm:$0xff] }
 0x4e7   : > { %2590 = vrot.lane.b32.xlu1 %v6353_v63, %s3997_s26  ;;  %2413 = vrot.lane.b32.xlu0 %v7491_v17, %s9240_s10 }
 0x4e8   : > { %v7495_v16 = vpop.permute.xlu2 %2379 }
 0x4e9   : > { %v2579_v18 = vpop.permute.xlu1 %2578  ;;  %v2402_v9 = vpop.permute.xlu0 %2401 }
 0x4ea   : > { %v2894_v63 = vsel %vm1572_vm9, %v2862_v49, %v2579_v18  ;;  %v2843_v57 = vsel %vm1506_vm8, %v2811_v31, %v2402_v9  ;;  %v9295_v49 = vld [vmem:[#allocation183_spill] sm:$0xff] }
 0x4eb   : > { %3728 = vmatmul.msk.f32.gmra.mxu0 %vm2927_vm11, %v2894_v63  ;;  %v2875_v39 = vsel %vm1539_vm10, %v2843_v57, %v2504_v40  ;;  %v2684_v26 = vsel %vm1341_vm3, %v9296_v34, %v9295_v49  ;;  %v9297_v63 = vld [vmem:[#allocation110_spill] sm:$0xff]  ;;  %v9307_v49 = vld [vmem:[#allocation216_spill] sm:$0xff] }
 0x4ec   : > { %v2716_v28 = vsel %vm1374_vm4, %v2684_v26, %v9297_v63  ;;  %v9308_v63 = vld [vmem:[#allocation17_spill] sm:$0xff] }
 0x4ee   : > { %2317 = vrot.lane.b32.xlu2 %v9278_v48, %s3994_s18  ;;  %v9292_v48 = vld [vmem:[#allocation55_spill] sm:$0xff] }
 0x4ef   : > { %2389 = vrot.lane.b32.xlu1 %v9289_v8, %s9240_s10  ;;  %2616 = vrot.lane.b32.xlu0 %v9290_v38, %s3997_s26  ;;  %v2703_v23 = vsel %vm1374_vm4, %v2671_v59, %v9292_v48  ;;  %v9301_v48 = vld [vmem:[#allocation93_spill] sm:$0xff] }
 0x4f0   : > { %v2406_v43 = vpop.permute.xlu2 %2405  ;;  %v2735_v29 = vsel %vm1407_vm5, %v2703_v23, %v9293_v3  ;;  %v9302_v23 = vld [vmem:[#allocation127_spill] sm:$0xff] }
 0x4f1   : > { %v2378_v25 = vpop.permute.xlu1 %2377  ;;  %v2605_v4 = vpop.permute.xlu0 %2604  ;;  %v2767_v40 = vsel %vm1440_vm7, %v2735_v29, %v7170_v35  ;;  %v2685_v3 = vsel %vm1341_vm3, %v9302_v23, %v9301_v48  ;;  %v9303_v29 = vld [vmem:[#allocation74_spill] sm:$0xff] }
 0x4f2   : > { %v2907_v51 = vsel %vm1572_vm9, %v2875_v39, %v2605_v4  ;;  %v2799_v15 = vsel %vm1473_vm6, %v2767_v40, %v7253_v46  ;;  %v9298_v46 = vld [vmem:[#allocation117_spill] sm:$0xff]  ;;  %v2672_v40 = vsel %vm1341_vm3, %v6777_v19, %v9303_v29 }
 0x4f3   : > { %3741 = vmatmul.msk.f32.gmra.mxu2 %vm2927_vm11, %v2907_v51  ;;  %v2831_v6 = vsel %vm1506_vm8, %v2799_v15, %v2378_v25  ;;  %v2748_v11 = vsel %vm1407_vm5, %v2716_v28, %v9298_v46  ;;  %v9309_v46 = vld [vmem:[#allocation153_spill] sm:$0xff] }
 0x4f4   : > { %v2780_v31 = vsel %vm1440_vm7, %v2748_v11, %v7219_v1  ;;  %v7566_v1 = vld [vmem:[%s5509_s28 + $0x158] sm:$0xff] }
 0x4f5   : > { %v2812_v57 = vsel %vm1473_vm6, %v2780_v31, %v7458_v0 }
 0x4f6   : > { %2592 = vrot.lane.b32.xlu2 %v6426_v27, %s3997_s26 }
 0x4f7   : > { %2415 = vrot.lane.b32.xlu1 %v7532_v58, %s9240_s10  ;;  %2491 = vrot.lane.b32.xlu0 %v9294_v24, %s9241_s13  ;;  %v9304_v24 = vld [vmem:[#allocation87_spill] sm:$0xff] }
 0x4f8   : > { %v2609_v41 = vpop.permute.xlu2 %2608  ;;  %v2717_v15 = vsel %vm1374_vm4, %v2685_v3, %v9304_v24  ;;  %v9314_v3 = vld [vmem:[#allocation150_spill] sm:$0xff] }
 0x4f9   : > { %v2404_v18 = vpop.permute.xlu1 %2403  ;;  %v2480_v9 = vpop.permute.xlu0 %2479 }
 0x4fa   : > { %v2863_v27 = vsel %vm1539_vm10, %v2831_v6, %v2480_v9  ;;  %v2844_v25 = vsel %vm1506_vm8, %v2812_v57, %v2404_v18  ;;  %v9305_v6 = vld [vmem:[#allocation168_spill] sm:$0xff]  ;;  %v9306_v9 = vld [vmem:[#allocation210_spill] sm:$0xff] }
 0x4fb   : > { %v2895_v35 = vsel %vm1572_vm9, %v2863_v27, %v2581_v45  ;;  %v9299_v45 = vld [vmem:[#allocation195_spill] sm:$0xff]  ;;  %v2704_v18 = vsel %vm1374_vm4, %v2672_v40, %v9305_v6  ;;  %v9315_v40 = vld [vmem:[#allocation136_spill] sm:$0xff]  ;;  %v7635_v6 = vld [vmem:[%s5509_s28 + $0x168] sm:$0xff] }
 0x4fc   : > { %3729 = vmatmul.msk.f32.gmra.mxu0 %vm2927_vm11, %v2895_v35  ;;  %v2736_v27 = vsel %vm1407_vm5, %v2704_v18, %v9306_v9 }
 0x4fd   : > { %v2768_v26 = vsel %vm1440_vm7, %v2736_v27, %v9307_v49  ;;  %v9319_v49 = vld [vmem:[#allocation167_spill] sm:$0xff] }
 0x4fe   : > { %2391 = vrot.lane.b32.xlu2 %v9272_v20, %s9240_s10  ;;  %v2800_v28 = vsel %vm1473_vm6, %v2768_v26, %v7316_v60 }
 0x4ff   : > { %2618 = vrot.lane.b32.xlu1 %v9299_v45, %s3997_s26  ;;  %2517 = vrot.lane.b32.xlu0 %v9225_v53, %s9241_s13  ;;  %v9300_v53 = vld [vmem:[#allocation42_spill] sm:$0xff] }
 0x500   : > { %v2484_v8 = vpop.permute.xlu2 %2483 }
 0x501   : > { %v2607_v4 = vpop.permute.xlu1 %2606  ;;  %v2506_v39 = vpop.permute.xlu0 %2505 }
 0x502   : > { %v2876_v51 = vsel %vm1539_vm10, %v2844_v25, %v2506_v39 }
 0x503   : > { %v2908_v20 = vsel %vm1572_vm9, %v2876_v51, %v2607_v4 }
 0x504   : > { %3742 = vmatmul.msk.f32.gmra.mxu2 %vm2927_vm11, %v2908_v20  ;;  %v9312_v20 = vld [vmem:[#allocation95_spill] sm:$0xff] }
 0x506   : > { %2417 = vrot.lane.b32.xlu2 %v7566_v1, %s9240_s10 }
 0x507   : > { %2493 = vrot.lane.b32.xlu1 %v9300_v53, %s9241_s13  ;;  %2319 = vrot.lane.b32.xlu0 %v9290_v38, %s3994_s18  ;;  %v2749_v38 = vsel %vm1407_vm5, %v2717_v15, %v7098_v52  ;;  %v9310_v52 = vld [vmem:[#allocation146_spill] sm:$0xff]  ;;  %v2673_v53 = vsel %vm1341_vm3, %v6772_v30, %v9312_v20  ;;  %v9316_v15 = vld [vmem:[#allocation148_spill] sm:$0xff]  ;;  %v9317_v30 = vld [vmem:[#allocation147_spill] sm:$0xff] }
 0x508   : > { %v2510_v0 = vpop.permute.xlu2 %2509  ;;  %v2781_v35 = vsel %vm1440_vm7, %v2749_v38, %v7178_v13  ;;  %v2832_v13 = vsel %vm1506_vm8, %v2800_v28, %v7495_v16  ;;  %v9311_v16 = vld [vmem:[#allocation214_spill] sm:$0xff] }
 0x509   : > { %v2482_v44 = vpop.permute.xlu1 %2481  ;;  %v2308_v59 = vpop.permute.xlu0 %2307  ;;  %v9318_v38 = vld [vmem:[#allocation58_spill] sm:$0xff] }
 0x50a   : > { %v2813_v19 = vsel %vm1473_vm6, %v2781_v35, %v2308_v59  ;;  %v2864_v31 = vsel %vm1539_vm10, %v2832_v13, %v2482_v44  ;;  %v2686_v9 = vsel %vm1341_vm3, %v7197_v33, %v9318_v38  ;;  %v9320_v28 = vld [vmem:[#allocation46_spill] sm:$0xff] }
 0x50b   : > { %v2845_v25 = vsel %vm1506_vm8, %v2813_v19, %v2406_v43  ;;  %v2718_v26 = vsel %vm1374_vm4, %v2686_v9, %v9319_v49  ;;  %v9330_v9 = vld [vmem:[#allocation120_spill] sm:$0xff] }
 0x50e   : > { %2620 = vrot.lane.b32.xlu2 %v9308_v63, %s3997_s26 }
 0x50f   : > { %2519 = vrot.lane.b32.xlu1 %v9309_v46, %s9241_s13  ;;  %2594 = vrot.lane.b32.xlu0 %v9310_v52, %s3997_s26  ;;  %v2750_v46 = vsel %vm1407_vm5, %v2718_v26, %v9320_v28 }
 0x510   : > { %v7603_v11 = vpop.permute.xlu2 %2311  ;;  %v2782_v13 = vsel %vm1440_vm7, %v2750_v46, %v7233_v5 }
 0x511   : > { %v2508_v57 = vpop.permute.xlu1 %2507  ;;  %v2583_v4 = vpop.permute.xlu0 %2582 }
 0x512   : > { %v2877_v39 = vsel %vm1539_vm10, %v2845_v25, %v2508_v57  ;;  %v2896_v60 = vsel %vm1572_vm9, %v2864_v31, %v2583_v4 }
 0x513   : > { %3730 = vmatmul.msk.f32.gmra.mxu0 %vm2927_vm11, %v2896_v60  ;;  %v2909_v51 = vsel %vm1572_vm9, %v2877_v39, %v2609_v41  ;;  %v9313_v41 = vld [vmem:[#allocation157_spill] sm:$0xff]  ;;  %v9322_v60 = vld [vmem:[#allocation131_spill] sm:$0xff] }
 0x514   : > { %3743 = vmatmul.msk.f32.gmra.mxu2 %vm2927_vm11, %v2909_v51  ;;  %v2705_v48 = vsel %vm1374_vm4, %v2673_v53, %v9313_v41  ;;  %v9323_v51 = vld [vmem:[#allocation175_spill] sm:$0xff] }
 0x515   : > { %v2737_v29 = vsel %vm1407_vm5, %v2705_v48, %v9314_v3  ;;  %v7674_v53 = vld [vmem:[%s5509_s28 + $0x170] sm:$0xff] }
 0x516   : > { %2495 = vrot.lane.b32.xlu2 %v9311_v16, %s9241_s13  ;;  %v2769_v24 = vsel %vm1440_vm7, %v2737_v29, %v9315_v40  ;;  %v9324_v16 = vld [vmem:[#allocation137_spill] sm:$0xff] }
 0x517   : > { %2321 = vrot.lane.b32.xlu1 %v9299_v45, %s3994_s18  ;;  %2393 = vrot.lane.b32.xlu0 %v9287_v36, %s9240_s10  ;;  %v2801_v45 = vsel %vm1473_vm6, %v2769_v24, %v7314_v21  ;;  %v9326_v40 = vld [vmem:[#allocation57_spill] sm:$0xff]  ;;  %v3257_v24 = vpop.f32.mrf.mxu1 }
 0x518   : > { %v2587_v43 = vpop.permute.xlu2 %2586 }
 0x519   : > { %v2310_v44 = vpop.permute.xlu1 %2309  ;;  %v2382_v59 = vpop.permute.xlu0 %2381 }
 0x51a   : > { %v2833_v36 = vsel %vm1506_vm8, %v2801_v45, %v2382_v59  ;;  %v2814_v33 = vsel %vm1473_vm6, %v2782_v13, %v2310_v44  ;;  %v9325_v44 = vld [vmem:[#allocation78_spill] sm:$0xff]  ;;  %v9327_v45 = vld [vmem:[#allocation151_spill] sm:$0xff] }
 0x51b   : > { %v2865_v35 = vsel %vm1539_vm10, %v2833_v36, %v2484_v8  ;;  %v9321_v8 = vld [vmem:[#allocation50_spill] sm:$0xff]  ;;  %v9328_v36 = vld [vmem:[#allocation185_spill] sm:$0xff] }
 0x51e   : > { %2521 = vrot.lane.b32.xlu2 %v9316_v15, %s9241_s13  ;;  %v9329_v15 = vld [vmem:[#allocation60_spill] sm:$0xff] }
 0x51f   : > { %2596 = vrot.lane.b32.xlu1 %v9317_v30, %s3997_s26  ;;  %2419 = vrot.lane.b32.xlu0 %v7635_v6, %s9240_s10 }
 0x520   : > { %v7639_v18 = vpop.permute.xlu2 %2385 }
 0x521   : > { %v2585_v21 = vpop.permute.xlu1 %2584  ;;  %v2408_v27 = vpop.permute.xlu0 %2407 }
 0x522   : > { %v2897_v19 = vsel %vm1572_vm9, %v2865_v35, %v2585_v21  ;;  %v2846_v31 = vsel %vm1506_vm8, %v2814_v33, %v2408_v27  ;;  %v7713_v21 = vld [vmem:[%s8293_s4] ss:$0 sm:$0xff] }
 0x523   : > { %3731 = vmatmul.msk.f32.gmra.mxu0 %vm2927_vm11, %v2897_v19  ;;  %v2878_v39 = vsel %vm1539_vm10, %v2846_v31, %v2510_v0 }
 0x526   : > { %2395 = vrot.lane.b32.xlu2 %v9296_v34, %s9240_s10  ;;  %v2674_v34 = vsel %vm1341_vm3, %v6765_v2, %v9322_v60  ;;  %v3917_v60 = vld [vmem:[%s5509_s28 + $0x68] sm:$0xff] }
 0x527   : > { %2297 = vrot.lane.b32.xlu1 %v9310_v52, %s3994_s18  ;;  %2622 = vrot.lane.b32.xlu0 %v9321_v8, %s3997_s26  ;;  %v2706_v52 = vsel %vm1374_vm4, %v2674_v34, %v9323_v51  ;;  %v9332_v34 = vld [vmem:[#allocation125_spill] sm:$0xff]  ;;  %v9333_v51 = vld [vmem:[#allocation23_spill] sm:$0xff] }
 0x528   : > { %v7661_v57 = vpop.permute.xlu2 %2411  ;;  %v2738_v20 = vsel %vm1407_vm5, %v2706_v52, %v9324_v16  ;;  %v9334_v52 = vld [vmem:[#allocation22_spill] sm:$0xff]  ;;  %v9335_v16 = vld [vmem:[#allocation100_spill] sm:$0xff] }
 0x529   : > { %v2384_v25 = vpop.permute.xlu1 %2383  ;;  %v2611_v4 = vpop.permute.xlu0 %2610  ;;  %v2770_v0 = vsel %vm1440_vm7, %v2738_v20, %v7182_v32 }
 0x52a   : > { %v2910_v5 = vsel %vm1572_vm9, %v2878_v39, %v2611_v4  ;;  %v2802_v2 = vsel %vm1473_vm6, %v2770_v0, %v7265_v62 }
 0x52b   : > { %3744 = vmatmul.msk.f32.gmra.mxu2 %vm2927_vm11, %v2910_v5  ;;  %v2834_v41 = vsel %vm1506_vm8, %v2802_v2, %v2384_v25  ;;  %v9331_v25 = vld [vmem:[#allocation40_spill] sm:$0xff]  ;;  %v9336_v2 = vld [vmem:[#allocation209_spill] sm:$0xff] }
 0x52c   : > { %v2688_v4 = vsel %vm1341_vm3, %v6899_v22, %v9331_v25 }
 0x52e   : > { %2421 = vrot.lane.b32.xlu2 %v7674_v53, %s9240_s10 }
 0x52f   : > { %2497 = vrot.lane.b32.xlu1 %v9325_v44, %s9241_s13  ;;  %2323 = vrot.lane.b32.xlu0 %v9308_v63, %s3994_s18  ;;  %v2687_v63 = vsel %vm1341_vm3, %v6904_v7, %v9326_v40  ;;  %v9337_v40 = vld [vmem:[#allocation65_spill] sm:$0xff] }
 0x530   : > { %v7686_v59 = vpop.permute.xlu2 %2614  ;;  %v2719_v62 = vsel %vm1374_vm4, %v2687_v63, %v9327_v45  ;;  %v2264_v63 = vrot.slane %v9337_v40, 2 }
 0x531   : > { %v2410_v48 = vpop.permute.xlu1 %2409  ;;  %v2486_v3 = vpop.permute.xlu0 %2485  ;;  %v2751_v38 = vsel %vm1407_vm5, %v2719_v62, %v9329_v15 }
 0x532   : > { %v2866_v29 = vsel %vm1539_vm10, %v2834_v41, %v2486_v3 }
 0x533   : > { %v2898_v32 = vsel %vm1572_vm9, %v2866_v29, %v2587_v43  ;;  %v2783_v43 = vsel %vm1440_vm7, %v2751_v38, %v7231_v56  ;;  %v9340_v38 = vld [vmem:[#allocation126_spill] sm:$0xff] }
 0x534   : > { %3732 = vmatmul.msk.f32.gmra.mxu0 %vm2927_vm11, %v2898_v32  ;;  %v2815_v27 = vsel %vm1473_vm6, %v2783_v43, %v7603_v11  ;;  %v3260_v11 = vpop.f32.mrf.mxu1 }
 0x535   : > { %v2847_v26 = vsel %vm1506_vm8, %v2815_v27, %v2410_v48 }
 0x536   : > { %2624 = vrot.lane.b32.xlu2 %v9328_v36, %s3997_s26 }
 0x537   : > { %2523 = vrot.lane.b32.xlu1 %v9330_v9, %s9241_s13  ;;  %2598 = vrot.lane.b32.xlu0 %v6486_v47, %s3997_s26  ;;  %v2265_v9 = vrot.slane %v9340_v38, 2 }
 0x538   : > { %v7707_v7 = vpop.permute.xlu2 %2489 }
 0x539   : > { %v2613_v35 = vpop.permute.xlu1 %2612  ;;  %v3045_v49 = vpop.f32.mrf.mxu0 }
 0x53a   : > { %v3258_v19 = vadd.f32 %v3257_v24, %v3045_v49  ;;  %v2512_v47 = vpop.permute.xlu0 %2511  ;;  %v9338_v24 = vld [vmem:[#allocation19_spill] sm:$0xff] }
 0x53b   : > { %v2879_v56 = vsel %vm1539_vm10, %v2847_v26, %v2512_v47 }
 0x53c   : > { %v3357_v28 = vadd.f32 %v7713_v21, %v3258_v19  ;;  %v2911_v46 = vsel %vm1572_vm9, %v2879_v56, %v2613_v35  ;;  %v3263_v15 = vpop.f32.mrf.mxu1 }
 0x53d   : > { %3745 = vmatmul.msk.f32.gmra.mxu2 %vm2927_vm11, %v2911_v46 }
 0x53e   : > { %3389 = vst.msk [vmem:[%s7721_s20] sm:$0xff] %vm1341_vm3, %v3357_v28  ;;  %2325 = vrot.lane.b32.xlu2 %v9321_v8, %s3994_s18  ;;  %v2675_v8 = vsel %vm1341_vm3, %v3917_v60, %v9332_v34  ;;  %v3492_v0 = vmul.f32 %v3357_v28, %v3357_v28  ;;  %v3421_v48 = vsel %vm1341_vm3, %v3357_v28, 0.0  ;;  %v3918_v60 = vld [vmem:[%s5509_s28 + $0x78] sm:$0xff] }
 0x53f   : > { %2397 = vrot.lane.b32.xlu1 %v9302_v23, %s9240_s10  ;;  %2299 = vrot.lane.b32.xlu0 %v9317_v30, %s3994_s18  ;;  %v2720_v23 = vsel %vm1374_vm4, %v2688_v4, %v9333_v51  ;;  %v2707_v30 = vsel %vm1374_vm4, %v2675_v8, %v9334_v52  ;;  %v9342_v34 = vld [vmem:[#allocation103_spill] sm:$0xff]  ;;  %v9343_v52 = vld [vmem:[#allocation212_spill] sm:$0xff] }
 0x540   : > { %v7735_v13 = vpop.permute.xlu2 %2515  ;;  %v2752_v20 = vsel %vm1407_vm5, %v2720_v23, %v9335_v16  ;;  %v2739_v22 = vsel %vm1407_vm5, %v2707_v30, %v9336_v2  ;;  %v2676_v8 = vsel %vm1341_vm3, %v3918_v60, %v9342_v34  ;;  %v2267_v30 = vrot.slane %v9343_v52, 2  ;;  %v9344_v16 = vld [vmem:[#allocation15_spill] sm:$0xff] }
 0x541   : > { %v2488_v33 = vpop.permute.xlu1 %2487  ;;  %v3048_v31 = vpop.f32.mrf.mxu0  ;;  %v2784_v41 = vsel %vm1440_vm7, %v2752_v20, %v7190_v50  ;;  %v2771_v45 = vsel %vm1440_vm7, %v2739_v22, %v9338_v24  ;;  %v9339_v50 = vld [vmem:[#allocation47_spill] sm:$0xff] }
 0x542   : > { %v3261_v39 = vadd.f32 %v3260_v11, %v3048_v31  ;;  %v2314_v5 = vpop.permute.xlu0 %2313  ;;  %v2803_v43 = vsel %vm1473_vm6, %v2771_v45, %v7326_v12  ;;  %v9346_v2 = vld [vmem:[#allocation171_spill] sm:$0xff] }
 0x543   : > { %v2816_v32 = vsel %vm1473_vm6, %v2784_v41, %v2314_v5  ;;  %v2835_v35 = vsel %vm1506_vm8, %v2803_v43, %v7639_v18  ;;  %v3920_v43 = vld [vmem:[%s5509_s28 + $0x110] sm:$0xff] }
 0x544   : > { %v3358_v44 = vadd.f32 %v7713_v21, %v3261_v39  ;;  %v2848_v19 = vsel %vm1506_vm8, %v2816_v32, %v7661_v57  ;;  %v2867_v56 = vsel %vm1539_vm10, %v2835_v35, %v2488_v33  ;;  %v2266_v57 = vsel %vm562_vm1, %v2264_v63, %v2265_v9  ;;  %v1661_v32 = vld [vmem:[%s5509_s28 + $0x198] sm:$0xff]  ;;  %v3919_v63 = vld [vmem:[%s5509_s28 + $0x188] sm:$0xff]  ;;  %v3266_v45 = vpop.f32.mrf.mxu1 }
 0x545   : > { %v2464_v24 = vrot.slane %v1661_v32, 1  ;;  %v2565_v34 = vrot.slane %v1661_v32, 2 }
 0x546   : > { %3390 = vst.msk [vmem:[%s7721_s20 + $0x8] sm:$0xff] %vm1341_vm3, %v3358_v44  ;;  %v3422_v3 = vsel %vm1341_vm3, %v3358_v44, 0.0  ;;  %v3493_v29 = vmul.f32 %v3358_v44, %v3358_v44  ;;  %2600 = vrot.lane.b32.xlu2 %v6483_v10, %s3997_s26  ;;  %v3524_v10 = vsel %vm1341_vm3, %v3492_v0, 0.0  ;;  %v9345_v0 = vld [vmem:[#allocation176_spill] sm:$0xff] }
 0x547   : > { %v3423_v62 = vadd.f32 %v3422_v3, %v3421_v48  ;;  %2423 = vrot.lane.b32.xlu1 %v9337_v40, %s9240_s10  ;;  %2499 = vrot.lane.b32.xlu0 %v9339_v50, %s9241_s13  ;;  %v2268_v3 = vsel %vm562_vm1, %v2265_v9, %v2267_v30  ;;  %v9347_v40 = vld [vmem:[#allocation119_spill] sm:$0xff]  ;;  %v7820_v50 = vld [vmem:[%s5509_s28 + $0x1a0] sm:$0xff] }
 0x548   : > { %v3525_v27 = vsel %vm1341_vm3, %v3493_v29, 0.0  ;;  %v7779_v46 = vpop.permute.xlu2 %2317  ;;  %v2465_v9 = vrot.slane %v7820_v50, 1 }
 0x549   : > { %v3526_v49 = vadd.f32 %v3525_v27, %v3524_v10  ;;  %v2514_v26 = vpop.permute.xlu1 %2513  ;;  %v3051_v47 = vpop.f32.mrf.mxu0  ;;  %v9348_v10 = vld [vmem:[#allocation135_spill] sm:$0xff] }
 0x54a   : > { %v2880_v28 = vsel %vm1539_vm10, %v2848_v19, %v2514_v26  ;;  %v3264_v12 = vadd.f32 %v3263_v15, %v3051_v47  ;;  %v2589_v11 = vpop.permute.xlu0 %2588  ;;  %v2689_v27 = vsel %vm1341_vm3, %v3920_v43, %v9348_v10  ;;  %v9349_v26 = vld [vmem:[#allocation201_spill] sm:$0xff] }
 0x54b   : > { %v2899_v31 = vsel %vm1572_vm9, %v2867_v56, %v2589_v11  ;;  %v2912_v18 = vsel %vm1572_vm9, %v2880_v28, %v7686_v59  ;;  %v9341_v59 = vld [vmem:[#allocation61_spill] sm:$0xff]  ;;  %v2721_v19 = vsel %vm1374_vm4, %v2689_v27, %v9349_v26  ;;  %v2466_v56 = vsel %vm385_vm0, %v2464_v24, %v2465_v9  ;;  %v9350_v28 = vld [vmem:[#allocation80_spill] sm:$0xff] }
 0x54c   : > { %v3359_v25 = vadd.f32 %v7713_v21, %v3264_v12  ;;  %3733 = vmatmul.msk.f32.gmra.mxu0 %vm2927_vm11, %v2899_v31  ;;  %3746 = vmatmul.msk.f32.gmra.mxu2 %vm2927_vm11, %v2912_v18 }
 0x54e   : > { %3391 = vst.msk [vmem:[%s7721_s20 + $0x10] sm:$0xff] %vm1341_vm3, %v3359_v25  ;;  %v3424_v33 = vsel %vm1341_vm3, %v3359_v25, 0.0  ;;  %v3494_v4 = vmul.f32 %v3359_v25, %v3359_v25  ;;  %2327 = vrot.lane.b32.xlu2 %v9328_v36, %s3994_s18  ;;  %v2708_v36 = vsel %vm1374_vm4, %v2676_v8, %v9344_v16  ;;  %v2566_v8 = vrot.slane %v7820_v50, 2 }
 0x54f   : > { %v3425_v39 = vadd.f32 %v3424_v33, %v3423_v62  ;;  %2626 = vrot.lane.b32.xlu1 %v2266_v57, %s3997_s26  ;;  %2525 = vrot.lane.b32.xlu0 %v9341_v59, %s9241_s13  ;;  %v2740_v44 = vsel %vm1407_vm5, %v2708_v36, %v9345_v0 }
 0x550   : > { %v3527_v5 = vsel %vm1341_vm3, %v3494_v4, 0.0  ;;  %v2772_v22 = vsel %vm1440_vm7, %v2740_v44, %v9346_v2  ;;  %v7807_v41 = vpop.permute.xlu2 %2592  ;;  %v3305_v4 = vpop.f32.mrf.mxu3  ;;  %v1663_v44 = vld [vmem:[%s5509_s28 + $0x1a8] sm:$0x3]  ;;  %v9352_v2 = vld [vmem:[#allocation191_spill] sm:$0xff] }
 0x551   : > { %v3528_v51 = vadd.f32 %v3527_v5, %v3526_v49  ;;  %v2316_v23 = vpop.permute.xlu1 %2315  ;;  %v2804_v48 = vsel %vm1473_vm6, %v2772_v22, %v7324_v37 }
 0x552   : > { %v2388_v20 = vpop.permute.xlu0 %2387 }
 0x553   : > { %v2836_v29 = vsel %vm1506_vm8, %v2804_v48, %v2388_v20  ;;  %v9351_v20 = vld [vmem:[#allocation59_spill] sm:$0xff]  ;;  %v9353_v48 = vld [vmem:[#allocation172_spill] sm:$0xff] }
 0x554   : > { %v2868_v38 = vsel %vm1539_vm10, %v2836_v29, %v7707_v7  ;;  %v2753_v7 = vsel %vm1407_vm5, %v2721_v19, %v9350_v28  ;;  %v9356_v19 = vld [vmem:[#allocation11_spill] sm:$0xff] }
 0x555   : > { %v2785_v12 = vsel %vm1440_vm7, %v2753_v7, %v7245_v55 }
 0x556   : > { %2628 = vrot.lane.b32.xlu2 %v2268_v3, %s3997_s26  ;;  %v2817_v18 = vsel %vm1473_vm6, %v2785_v12, %v2316_v23  ;;  %v9358_v12 = vld [vmem:[#allocation177_spill] sm:$0xff] }
 0x557   : > { %2527 = vrot.lane.b32.xlu1 %v9347_v40, %s9241_s13  ;;  %2425 = vrot.lane.b32.xlu0 %v3919_v63, %s9240_s10 }
 0x558   : > { %v3054_v62 = vpop.f32.mrf.mxu0  ;;  %v7842_v33 = vpop.permute.xlu2 %2391 }
 0x559   : > { %v3267_v37 = vadd.f32 %v3266_v45, %v3054_v62  ;;  %v2591_v15 = vpop.permute.xlu1 %2590  ;;  %v2467_v45 = vrot.slane %v1663_v44, 1  ;;  %v2568_v62 = vrot.slane %v1663_v44, 2 }
 0x55a   : > { %v2414_v35 = vpop.permute.xlu0 %2413  ;;  %v2900_v49 = vsel %vm1572_vm9, %v2868_v38, %v2591_v15 }
 0x55b   : > { %v3360_v47 = vadd.f32 %v7713_v21, %v3267_v37  ;;  %3734 = vmatmul.msk.f32.gmra.mxu0 %vm2927_vm11, %v2900_v49  ;;  %v2849_v5 = vsel %vm1506_vm8, %v2817_v18, %v2414_v35  ;;  %v9355_v37 = vld [vmem:[#allocation158_spill] sm:$0xff]  ;;  %v2468_v49 = vsel %vm385_vm0, %v2465_v9, %v2467_v45  ;;  %v2569_v26 = vsel %vm562_vm1, %v2566_v8, %v2568_v62 }
 0x55c   : > { %v2881_v16 = vsel %vm1539_vm10, %v2849_v5, %v7735_v13  ;;  %v3269_v13 = vpop.f32.mrf.mxu1 }
 0x55d   : > { %3392 = vst.msk [vmem:[%s7721_s20 + $0x18] sm:$0xff] %vm1341_vm3, %v3360_v47  ;;  %v3426_v11 = vsel %vm1341_vm3, %v3360_v47, 0.0  ;;  %v3495_v31 = vmul.f32 %v3360_v47, %v3360_v47  ;;  %v9357_v47 = vld [vmem:[#allocation154_spill] sm:$0xff] }
 0x55e   : > { %v3427_v25 = vadd.f32 %v3426_v11, %v3425_v39  ;;  %2529 = vrot.lane.b32.xlu2 %v2466_v56, %s9241_s13  ;;  %v2690_v56 = vsel %vm1341_vm3, %v9357_v47, %v9356_v19 }
 0x55f   : > { %v3529_v59 = vsel %vm1341_vm3, %v3495_v31, 0.0  ;;  %2427 = vrot.lane.b32.xlu1 %v1661_v32, %s9240_s10  ;;  %2329 = vrot.lane.b32.xlu0 %v2266_v57, %s3994_s18  ;;  %v3093_v55 = vpop.f32.mrf.mxu2  ;;  %v2567_v57 = vsel %vm562_vm1, %v2565_v34, %v2566_v8  ;;  %v9354_v32 = vld [vmem:[#allocation215_spill] sm:$0xff]  ;;  %v2722_v11 = vsel %vm1374_vm4, %v2690_v56, %v9358_v12 }
 0x560   : > { %v3530_v60 = vadd.f32 %v3529_v59, %v3528_v51  ;;  %v3306_v39 = vadd.f32 %v3305_v4, %v3093_v55  ;;  %v3921_v51 = vld [vmem:[%s5509_s28 + $0x80] sm:$0xff]  ;;  %v7875_v63 = vpop.permute.xlu2 %2417  ;;  %v9360_v4 = vld [vmem:[#allocation70_spill] sm:$0xff] }
 0x561   : > { %v2390_v23 = vpop.permute.xlu1 %2389  ;;  %v2677_v0 = vsel %vm1341_vm3, %v3921_v51, %v9351_v20 }
 0x562   : > { %v7851_v52 = vadd.f32 %v7713_v21, %v3306_v39  ;;  %v2617_v30 = vpop.permute.xlu0 %2616  ;;  %v2709_v22 = vsel %vm1374_vm4, %v2677_v0, %v9352_v2  ;;  %v9361_v0 = vld [vmem:[#allocation124_spill] sm:$0xff] }
 0x563   : > { %v2913_v36 = vsel %vm1572_vm9, %v2881_v16, %v2617_v30  ;;  %v2741_v29 = vsel %vm1407_vm5, %v2709_v22, %v9353_v48  ;;  %v3308_v16 = vpop.f32.mrf.mxu3  ;;  %v2691_v44 = vsel %vm1341_vm3, %v7387_v61, %v9361_v0  ;;  %v9370_v0 = vld [vmem:[#allocation203_spill] sm:$0xff] }
 0x564   : > { %3405 = vst.msk [vmem:[%s7721_s20 + $0x80] sm:$0xff] %vm1341_vm3, %v7851_v52  ;;  %3747 = vmatmul.msk.f32.gmra.mxu2 %vm2927_vm11, %v2913_v36  ;;  %v2773_v40 = vsel %vm1440_vm7, %v2741_v29, %v9354_v32  ;;  %v3922_v29 = vld [vmem:[%s5509_s28 + $0x90] sm:$0xff]  ;;  %v9363_v32 = vld [vmem:[#allocation73_spill] sm:$0xff] }
 0x566   : > { %2429 = vrot.lane.b32.xlu2 %v7820_v50, %s9240_s10  ;;  %v2805_v50 = vsel %vm1473_vm6, %v2773_v40, %v9355_v37  ;;  %v2678_v40 = vsel %vm1341_vm3, %v3922_v29, %v9363_v32  ;;  %s3790_s10 = sshll.u32 %s4054_s25, 1 }
 0x567   : > { %2331 = vrot.lane.b32.xlu1 %v2268_v3, %s3994_s18  ;;  %2630 = vrot.lane.b32.xlu0 %v2567_v57, %s3997_s26  ;;  %v2837_v43 = vsel %vm1506_vm8, %v2805_v50, %v2390_v23  ;;  %v9365_v50 = vld [vmem:[#allocation202_spill] sm:$0xff]  ;;  %s3613_s12 = scalar_lea.hbm %s8295_s6, %s3790_s10 }
 0x568   : > { %v3057_v24 = vpop.f32.mrf.mxu0  ;;  %v2710_v61 = vsel %vm1374_vm4, %v2678_v40, %v9365_v50  ;;  %s3617_s16 = sshll.u32 %s3613_s12, 4  ;;  %s3618_s16 = int_to_ptr.hbm [resolvable:$true] %s3617_s16 }
 0x569   : > { %v3270_v15 = vadd.f32 %v3269_v13, %v3057_v24  ;;  %v2416_v38 = vpop.permute.xlu1 %2415  ;;  %v9362_v13 = vld [vmem:[#allocation165_spill] sm:$0xff]  ;;  %v9364_v24 = vld [vmem:[#allocation130_spill] sm:$0xff]  ;;  %s3940_s17 = sshra.s32 %s3618_s16, 4  ;;  %s3941_s17 = int_to_ptr.hbm [resolvable:$true] %s3940_s17 }
 0x56a   : > { %v2492_v10 = vpop.permute.xlu0 %2491  ;;  %v2723_v48 = vsel %vm1374_vm4, %v2691_v44, %v9362_v13  ;;  %v9372_v13 = vld [vmem:[#allocation90_spill] sm:$0xff]  ;;  %s3942_s29 = scalar_lea.hbm %s3941_s17, 2  ;;  %p3947_p0 = scmp.lt.s32.totalorder %s3941_s17, %s8295_s6 }
 0x56b   : > { %v3361_v3 = vadd.f32 %v7713_v21, %v3270_v15  ;;  %v2869_v27 = vsel %vm1539_vm10, %v2837_v43, %v2492_v10  ;;  %v2755_v45 = vsel %vm1407_vm5, %v2723_v48, %v9364_v24  ;;  %v9366_v15 = vld [vmem:[#allocation118_spill] sm:$0xff]  ;;  %v9367_v43 = vld [vmem:[#allocation75_spill] sm:$0xff]  ;;  %p3943_p11 = scmp.ne.s32.totalorder %s3941_s17, %s3942_s29  ;;  %p3948_p1 = scmp.lt.s32.totalorder %s3946_s9, %s3942_s29 }
 0x56c   : > { %v2901_v35 = vsel %vm1572_vm9, %v2869_v27, %v7807_v41  ;;  %v9359_v41 = vld [vmem:[#allocation10_spill] sm:$0xff]  ;;  %v2742_v10 = vsel %vm1407_vm5, %v2710_v61, %v9367_v43 }
 0x56d   : > { %3393 = vst.msk [vmem:[%s7721_s20 + $0x20] sm:$0xff] %vm1341_vm3, %v3361_v3  ;;  %v3428_v28 = vsel %vm1341_vm3, %v3361_v3, 0.0  ;;  %v3496_v7 = vmul.f32 %v3361_v3, %v3361_v3  ;;  %3735 = vmatmul.msk.f32.gmra.mxu0 %vm2927_vm11, %v2901_v35  ;;  %v2754_v9 = vsel %vm1407_vm5, %v2722_v11, %v9359_v41  ;;  %p3944_p12 = pnand %p3943_p11, %p4071_p5  ;;  %p3949_p2 = por %p3948_p1, %p3947_p0 }
 0x56e   : > { %v3429_v31 = vadd.f32 %v3428_v28, %v3427_v25  ;;  %v2786_v59 = vsel %vm1440_vm7, %v2754_v9, %v9360_v4  ;;  %v2621_v25 = vpop.permute.xlu2 %2620  ;;  %v3311_v4 = vpop.f32.mrf.mxu3 }
 0x56f   : > { %v3531_v18 = vsel %vm1341_vm3, %v3496_v7, 0.0  ;;  %2531 = vrot.lane.b32.xlu0 %v2468_v49, %s9241_s13  ;;  %2632 = vrot.lane.b32.xlu1 %v2569_v26, %s3997_s26  ;;  %v2818_v55 = vsel %vm1473_vm6, %v2786_v59, %v7779_v46  ;;  %v9368_v49 = vld [vmem:[#allocation25_spill] sm:$0xff]  ;;  %s265_s26 = sand.u32 1, %s3980_s22   ;;  %p3945_p13 = pneg %p3944_p12 }
 0x570   : > { %v3532_v5 = vadd.f32 %v3531_v18, %v3530_v60  ;;  %v2850_v39 = vsel %vm1506_vm8, %v2818_v55, %v2416_v38  ;;  %v3272_v60 = vpop.f32.mrf.mxu1  ;;  %v2787_v38 = vsel %vm1440_vm7, %v2755_v45, %v9366_v15  ;;  %v2774_v26 = vsel %vm1440_vm7, %v2742_v10, %v9368_v49  ;;  %s3600_s25 = scalar_lea.sflag [#allocation3], %s265_s26 }
 0x571   : > { %v2619_v34 = vpop.permute.xlu1 %2618  ;;  %v2806_v47 = vsel %vm1473_vm6, %v2774_v26, %v7348_v54  ;;  %p3950_p3 = pnand %p3949_p2, %p3945_p13 }
 0x572   : > { %v2518_v8 = vpop.permute.xlu0 %2517  ;;  %v2838_v28 = vsel %vm1506_vm8, %v2806_v47, %v7842_v33  ;;  %v3923_v47 = vld [vmem:[%s5509_s28 + $0xa8] sm:$0xff] }
 0x573   : > { %v2882_v23 = vsel %vm1539_vm10, %v2850_v39, %v2518_v8 }
 0x574   : > { %v2914_v30 = vsel %vm1572_vm9, %v2882_v23, %v2619_v34 }
 0x575   : > { %3748 = vmatmul.msk.f32.gmra.mxu2 %vm2927_vm11, %v2914_v30 }
 0x576   : > { %v3096_v36 = vpop.f32.mrf.mxu2  ;;  %v2496_v62 = vpop.permute.xlu2 %2495 }
 0x577   : > { %v3309_v57 = vadd.f32 %v3308_v16, %v3096_v36  ;;  %v3314_v24 = vpop.f32.mrf.mxu3 }
 0x579   : > { %v7909_v51 = vadd.f32 %v7713_v21, %v3309_v57  ;;  %v2494_v46 = vpop.permute.xlu1 %2493  ;;  %v3060_v20 = vpop.f32.mrf.mxu0  ;;  %v9369_v57 = vld [vmem:[#allocation169_spill] sm:$0xff] }
 0x57a   : > { %v3273_v2 = vadd.f32 %v3272_v60, %v3060_v20  ;;  %v2320_v22 = vpop.permute.xlu0 %2319  ;;  %v2870_v41 = vsel %vm1539_vm10, %v2838_v28, %v2494_v46  ;;  %v2692_v60 = vsel %vm1341_vm3, %v7421_v14, %v9369_v57 }
 0x57b   : > { %3406 = vst.msk [vmem:[%s7721_s20 + $0x88] sm:$0xff] %vm1341_vm3, %v7909_v51  ;;  %v2819_v35 = vsel %vm1473_vm6, %v2787_v38, %v2320_v22  ;;  %v2724_v44 = vsel %vm1374_vm4, %v2692_v60, %v9370_v0 }
 0x57c   : > { %v3362_v37 = vadd.f32 %v7713_v21, %v3273_v2  ;;  %v2851_v11 = vsel %vm1506_vm8, %v2819_v35, %v7875_v63 }
 0x57e   : > { %3394 = vst.msk [vmem:[%s7721_s20 + $0x28] sm:$0xff] %vm1341_vm3, %v3362_v37  ;;  %v3430_v3 = vsel %vm1341_vm3, %v3362_v37, 0.0  ;;  %v3497_v27 = vmul.f32 %v3362_v37, %v3362_v37  ;;  %v2522_v33 = vpop.permute.xlu2 %2521 }
 0x57f   : > { %v3431_v19 = vadd.f32 %v3430_v3, %v3429_v31 }
 0x580   : > { %v3533_v56 = vsel %vm1341_vm3, %v3497_v27, 0.0 }
 0x581   : > { %v3534_v7 = vadd.f32 %v3533_v56, %v3532_v5  ;;  %v2520_v12 = vpop.permute.xlu1 %2519  ;;  %v9373_v56 = vld [vmem:[#allocation162_spill] sm:$0xff] }
 0x582   : > { %v2883_v9 = vsel %vm1539_vm10, %v2851_v11, %v2520_v12  ;;  %v2595_v18 = vpop.permute.xlu0 %2594  ;;  %v2680_v28 = vsel %vm1341_vm3, %v3923_v47, %v9373_v56 }
 0x583   : > { %v2902_v31 = vsel %vm1572_vm9, %v2870_v41, %v2595_v18  ;;  %v2915_v54 = vsel %vm1572_vm9, %v2883_v9, %v2621_v25  ;;  %v3275_v25 = vpop.f32.mrf.mxu1  ;;  %v9375_v41 = vld [vmem:[#allocation77_spill] sm:$0xff] }
 0x584   : > { %3736 = vmatmul.msk.f32.gmra.mxu0 %vm2927_vm11, %v2902_v31  ;;  %3749 = vmatmul.msk.f32.gmra.mxu2 %vm2927_vm11, %v2915_v54  ;;  %v2712_v9 = vsel %vm1374_vm4, %v2680_v28, %v9375_v41  ;;  %v9376_v18 = vld [vmem:[#allocation13_spill] sm:$0xff] }
 0x586   : > { %v2396_v8 = vpop.permute.xlu2 %2395 }
 0x587   : > { %v3099_v59 = vpop.f32.mrf.mxu2 }
 0x588   : > { %v3312_v5 = vadd.f32 %v3311_v4, %v3099_v59  ;;  %v9378_v59 = vld [vmem:[#allocation213_spill] sm:$0xff] }
 0x589   : > { %v2322_v55 = vpop.permute.xlu1 %2321 }
 0x58a   : > { %v7951_v63 = vadd.f32 %v7713_v21, %v3312_v5  ;;  %v2394_v34 = vpop.permute.xlu0 %2393 }
 0x58b   : > { %v2839_v39 = vsel %vm1506_vm8, %v7351_v42, %v2394_v34  ;;  %v9371_v42 = vld [vmem:[#allocation99_spill] sm:$0xff]  ;;  %v3278_v35 = vpop.f32.mrf.mxu1 }
 0x58c   : > { %3407 = vst.msk [vmem:[%s7721_s20 + $0x90] sm:$0xff] %vm1341_vm3, %v7951_v63  ;;  %v2871_v36 = vsel %vm1539_vm10, %v2839_v39, %v2496_v62  ;;  %v2756_v22 = vsel %vm1407_vm5, %v2724_v44, %v9371_v42  ;;  %v9379_v34 = vld [vmem:[#allocation187_spill] sm:$0xff] }
 0x58d   : > { %v2788_v48 = vsel %vm1440_vm7, %v2756_v22, %v9372_v13 }
 0x58e   : > { %v2820_v32 = vsel %vm1473_vm6, %v2788_v48, %v2322_v55  ;;  %v2422_v38 = vpop.permute.xlu2 %2421 }
 0x590   : > { %v3063_v23 = vpop.f32.mrf.mxu0 }
 0x591   : > { %v3276_v30 = vadd.f32 %v3275_v25, %v3063_v23  ;;  %v2597_v16 = vpop.permute.xlu1 %2596 }
 0x592   : > { %v2420_v46 = vpop.permute.xlu0 %2419  ;;  %v2903_v20 = vsel %vm1572_vm9, %v2871_v36, %v2597_v16 }
 0x593   : > { %v3363_v2 = vadd.f32 %v7713_v21, %v3276_v30  ;;  %3737 = vmatmul.msk.f32.gmra.mxu0 %vm2927_vm11, %v2903_v20  ;;  %v2852_v62 = vsel %vm1506_vm8, %v2820_v32, %v2420_v46 }
 0x594   : > { %v2884_v3 = vsel %vm1539_vm10, %v2852_v62, %v2522_v33  ;;  %v9377_v33 = vld [vmem:[#allocation27_spill] sm:$0xff] }
 0x595   : > { %3395 = vst.msk [vmem:[%s7721_s20 + $0x30] sm:$0xff] %vm1341_vm3, %v3363_v2  ;;  %v3432_v14 = vsel %vm1341_vm3, %v3363_v2, 0.0  ;;  %v3498_v29 = vmul.f32 %v3363_v2, %v3363_v2  ;;  %v2744_v4 = vsel %vm1407_vm5, %v2712_v9, %v9377_v33 }
 0x596   : > { %v3433_v40 = vadd.f32 %v3432_v14, %v3431_v19  ;;  %v2625_v55 = vpop.permute.xlu2 %2624  ;;  %v2776_v39 = vsel %vm1440_vm7, %v2744_v4, %v9379_v34  ;;  %v3317_v14 = vpop.f32.mrf.mxu3  ;;  %v9385_v4 = vld [vmem:[#allocation12_spill] sm:$0xff]  ;;  %v9387_v34 = vld [vmem:[#allocation159_spill] sm:$0xff] }
 0x597   : > { %v3535_v45 = vsel %vm1341_vm3, %v3498_v29, 0.0  ;;  %v3102_v37 = vpop.f32.mrf.mxu2 }
 0x598   : > { %v3536_v50 = vadd.f32 %v3535_v45, %v3534_v7  ;;  %v3315_v61 = vadd.f32 %v3314_v24, %v3102_v37  ;;  %v9374_v7 = vld [vmem:[#allocation62_spill] sm:$0xff] }
 0x599   : > { %v2298_v15 = vpop.permute.xlu1 %2297  ;;  %v2693_v12 = vsel %vm1341_vm3, %v7491_v17, %v9374_v7  ;;  %v9380_v17 = vld [vmem:[#allocation113_spill] sm:$0xff] }
 0x59a   : > { %v7978_v43 = vadd.f32 %v7713_v21, %v3315_v61  ;;  %v2623_v10 = vpop.permute.xlu0 %2622  ;;  %v2725_v31 = vsel %vm1374_vm4, %v2693_v12, %v9376_v18  ;;  %v2808_v16 = vsel %vm1473_vm6, %v2776_v39, %v2298_v15  ;;  %v3924_v61 = vld [vmem:[%s5509_s28 + $0xb0] sm:$0xff]  ;;  %v9381_v15 = vld [vmem:[#allocation149_spill] sm:$0xff]  ;;  %s3718_s28 = sshll.u32 %s265_s26, 1 }
 0x59b   : > { %v2916_v27 = vsel %vm1572_vm9, %v2884_v3, %v2623_v10  ;;  %v2757_v5 = vsel %vm1407_vm5, %v2725_v31, %v9378_v59  ;;  %v2840_v20 = vsel %vm1506_vm8, %v2808_v16, %v2396_v8  ;;  %v9382_v10 = vld [vmem:[#allocation115_spill] sm:$0xff]  ;;  %v2694_v59 = vsel %vm1341_vm3, %v7532_v58, %v9385_v4  ;;  %v9396_v4 = vld [vmem:[#allocation128_spill] sm:$0xff]  ;;  %s267_s14 = scalar_lea.vmem [#allocation2], %s3718_s28 }
 0x59c   : > { %3408 = vst.msk [vmem:[%s7721_s20 + $0x98] sm:$0xff] %vm1341_vm3, %v7978_v43  ;;  %3750 = vmatmul.msk.f32.gmra.mxu2 %vm2927_vm11, %v2916_v27  ;;  %v2789_v25 = vsel %vm1440_vm7, %v2757_v5, %v9380_v17  ;;  %v9386_v5 = vld [vmem:[#allocation20_spill] sm:$0xff]  ;;  %s3615_s15 = sshll.u32 %s267_s14, 4  ;;  %s3616_s15 = int_to_ptr.vmem [resolvable:$true] %s3615_s15 }
 0x59e   : > { %v2326_v8 = vpop.permute.xlu2 %2325  ;;  %v3320_v17 = vpop.f32.mrf.mxu3 }
 0x5a0   : > { %v3066_v49 = vpop.f32.mrf.mxu0 }
 0x5a1   : > { %v3279_v26 = vadd.f32 %v3278_v35, %v3066_v49  ;;  %v2498_v19 = vpop.permute.xlu1 %2497  ;;  %v9383_v35 = vld [vmem:[#allocation63_spill] sm:$0xff] }
 0x5a2   : > { %v2324_v11 = vpop.permute.xlu0 %2323  ;;  %v2872_v2 = vsel %vm1539_vm10, %v2840_v20, %v2498_v19 }
 0x5a3   : > { %v3364_v54 = vadd.f32 %v7713_v21, %v3279_v26  ;;  %v2821_v57 = vsel %vm1473_vm6, %v2789_v25, %v2324_v11  ;;  %v9384_v26 = vld [vmem:[#allocation39_spill] sm:$0xff] }
 0x5a4   : > { %v2853_v44 = vsel %vm1506_vm8, %v2821_v57, %v2422_v38  ;;  %v2681_v38 = vsel %vm1341_vm3, %v3924_v61, %v9381_v15  ;;  %v9388_v25 = vld [vmem:[#allocation79_spill] sm:$0xff] }
 0x5a5   : > { %3396 = vst.msk [vmem:[%s7721_s20 + $0x38] sm:$0xff] %vm1341_vm3, %v3364_v54  ;;  %v3434_v23 = vsel %vm1341_vm3, %v3364_v54, 0.0  ;;  %v3499_v30 = vmul.f32 %v3364_v54, %v3364_v54  ;;  %v2713_v3 = vsel %vm1374_vm4, %v2681_v38, %v9382_v10 }
 0x5a6   : > { %v3435_v36 = vadd.f32 %v3434_v23, %v3433_v40  ;;  %v3281_v40 = vpop.f32.mrf.mxu1  ;;  %v2745_v49 = vsel %vm1407_vm5, %v2713_v3, %v9383_v35  ;;  %v2601_v12 = vpop.permute.xlu2 %2600 }
 0x5a7   : > { %v3537_v60 = vsel %vm1341_vm3, %v3499_v30, 0.0  ;;  %v2777_v19 = vsel %vm1440_vm7, %v2745_v49, %v9384_v26  ;;  %v3323_v35 = vpop.f32.mrf.mxu3 }
 0x5a8   : > { %v3538_v46 = vadd.f32 %v3537_v60, %v3536_v50 }
 0x5a9   : > { %v2524_v0 = vpop.permute.xlu1 %2523 }
 0x5aa   : > { %v2885_v42 = vsel %vm1539_vm10, %v2853_v44, %v2524_v0  ;;  %v2599_v22 = vpop.permute.xlu0 %2598 }
 0x5ab   : > { %v2904_v13 = vsel %vm1572_vm9, %v2872_v2, %v2599_v22  ;;  %v2917_v48 = vsel %vm1572_vm9, %v2885_v42, %v2625_v55  ;;  %v2726_v55 = vsel %vm1374_vm4, %v2694_v59, %v9386_v5  ;;  %v9389_v2 = vld [vmem:[#allocation204_spill] sm:$0xff] }
 0x5ac   : > { %3738 = vmatmul.msk.f32.gmra.mxu0 %vm2927_vm11, %v2904_v13  ;;  %3751 = vmatmul.msk.f32.gmra.mxu2 %vm2927_vm11, %v2917_v48  ;;  %v2758_v39 = vsel %vm1407_vm5, %v2726_v55, %v9387_v34  ;;  %v2695_v42 = vsel %vm1341_vm3, %v7566_v1, %v9389_v2  ;;  %v9390_v22 = vld [vmem:[#allocation76_spill] sm:$0xff] }
 0x5ad   : > { %v2790_v23 = vsel %vm1440_vm7, %v2758_v39, %v9388_v25  ;;  %v2727_v13 = vsel %vm1374_vm4, %v2695_v42, %v9390_v22  ;;  %v9400_v42 = vld [vmem:[#allocation138_spill] sm:$0xff] }
 0x5ae   : > { %v3105_v29 = vpop.f32.mrf.mxu2  ;;  %v2822_v16 = vsel %vm1473_vm6, %v2790_v23, %v2326_v8  ;;  %v2328_v60 = vpop.permute.xlu2 %2327 }
 0x5af   : > { %v3318_v32 = vadd.f32 %v3317_v14, %v3105_v29  ;;  %v3284_v48 = vpop.f32.mrf.mxu1  ;;  %v9391_v14 = vld [vmem:[#allocation51_spill] sm:$0xff]  ;;  %v9392_v29 = vld [vmem:[#allocation129_spill] sm:$0xff] }
 0x5b0   : > { %v2759_v8 = vsel %vm1407_vm5, %v2727_v13, %v9391_v14 }
 0x5b1   : > { %v8020_v24 = vadd.f32 %v7713_v21, %v3318_v32  ;;  %v2398_v45 = vpop.permute.xlu1 %2397  ;;  %v3069_v62 = vpop.f32.mrf.mxu0  ;;  %v2791_v32 = vsel %vm1440_vm7, %v2759_v8, %v9392_v29 }
 0x5b2   : > { %v3282_v37 = vadd.f32 %v3281_v40, %v3069_v62  ;;  %v2300_v50 = vpop.permute.xlu0 %2299  ;;  %v2823_v62 = vsel %vm1473_vm6, %v2791_v32, %v2328_v60  ;;  %v9398_v60 = vld [vmem:[#allocation108_spill] sm:$0xff] }
 0x5b3   : > { %3409 = vst.msk [vmem:[%s7721_s20 + $0xa0] sm:$0xff] %vm1341_vm3, %v8020_v24  ;;  %v2809_v7 = vsel %vm1473_vm6, %v2777_v19, %v2300_v50  ;;  %v9393_v19 = vld [vmem:[#allocation192_spill] sm:$0xff] }
 0x5b4   : > { %v3365_v27 = vadd.f32 %v7713_v21, %v3282_v37  ;;  %v2841_v18 = vsel %vm1506_vm8, %v2809_v7, %v2398_v45 }
 0x5b6   : > { %3397 = vst.msk [vmem:[%s7721_s20 + $0x40] sm:$0xff] %vm1341_vm3, %v3365_v27  ;;  %v3436_v47 = vsel %vm1341_vm3, %v3365_v27, 0.0  ;;  %v3500_v56 = vmul.f32 %v3365_v27, %v3365_v27  ;;  %v2629_v61 = vpop.permute.xlu2 %2628 }
 0x5b7   : > { %v3437_v28 = vadd.f32 %v3436_v47, %v3435_v36  ;;  %v2696_v47 = vsel %vm1341_vm3, %v7635_v6, %v9393_v19  ;;  %v3287_v55 = vpop.f32.mrf.mxu1 }
 0x5b8   : > { %v3539_v11 = vsel %vm1341_vm3, %v3500_v56, 0.0 }
 0x5b9   : > { %v3540_v41 = vadd.f32 %v3539_v11, %v3538_v46  ;;  %v2424_v9 = vpop.permute.xlu1 %2423 }
 0x5ba   : > { %v2500_v31 = vpop.permute.xlu0 %2499  ;;  %v2854_v58 = vsel %vm1506_vm8, %v2822_v16, %v2424_v9 }
 0x5bb   : > { %v2873_v54 = vsel %vm1539_vm10, %v2841_v18, %v2500_v31  ;;  %v9395_v31 = vld [vmem:[#allocation56_spill] sm:$0xff] }
 0x5bc   : > { %v2905_v33 = vsel %vm1572_vm9, %v2873_v54, %v2601_v12  ;;  %v9394_v12 = vld [vmem:[#allocation66_spill] sm:$0xff] }
 0x5bd   : > { %3739 = vmatmul.msk.f32.gmra.mxu0 %vm2927_vm11, %v2905_v33  ;;  %v2728_v11 = vsel %vm1374_vm4, %v2696_v47, %v9394_v12 }
 0x5be   : > { %v2760_v54 = vsel %vm1407_vm5, %v2728_v11, %v9395_v31  ;;  %v2530_v5 = vpop.permute.xlu2 %2529 }
 0x5bf   : > { %v2792_v59 = vsel %vm1440_vm7, %v2760_v54, %v9396_v4 }
 0x5c0   : > { %v3108_v30 = vpop.f32.mrf.mxu2 }
 0x5c1   : > { %v3321_v36 = vadd.f32 %v3320_v17, %v3108_v30  ;;  %v2627_v57 = vpop.permute.xlu1 %2626  ;;  %v9397_v30 = vld [vmem:[#allocation205_spill] sm:$0xff] }
 0x5c2   : > { %v2526_v46 = vpop.permute.xlu0 %2525  ;;  %v2697_v16 = vsel %vm1341_vm3, %v7674_v53, %v9397_v30 }
 0x5c3   : > { %v8056_v20 = vadd.f32 %v7713_v21, %v3321_v36  ;;  %v2886_v0 = vsel %vm1539_vm10, %v2854_v58, %v2526_v46  ;;  %v2729_v58 = vsel %vm1374_vm4, %v2697_v16, %v9398_v60  ;;  %v9399_v46 = vld [vmem:[#allocation170_spill] sm:$0xff] }
 0x5c4   : > { %v2918_v44 = vsel %vm1572_vm9, %v2886_v0, %v2627_v57  ;;  %v2761_v0 = vsel %vm1407_vm5, %v2729_v58, %v9399_v46 }
 0x5c5   : > { %3410 = vst.msk [vmem:[%s7721_s20 + $0xa8] sm:$0xff] %vm1341_vm3, %v8056_v20  ;;  %3752 = vmatmul.msk.f32.gmra.mxu2 %vm2927_vm11, %v2918_v44  ;;  %v2793_v53 = vsel %vm1440_vm7, %v2761_v0, %v9400_v42 }
 0x5c6   : > { %v2430_v14 = vpop.permute.xlu2 %2429 }
 0x5c9   : > { %v3072_v40 = vpop.f32.mrf.mxu0  ;;  %v2528_v45 = vpop.permute.xlu1 %2527 }
 0x5ca   : > { %v3285_v37 = vadd.f32 %v3284_v48, %v3072_v40  ;;  %v2426_v50 = vpop.permute.xlu0 %2425 }
 0x5cb   : > { %v2855_v15 = vsel %vm1506_vm8, %v2823_v62, %v2426_v50 }
 0x5cc   : > { %v3366_v1 = vadd.f32 %v7713_v21, %v3285_v37  ;;  %v2887_v38 = vsel %vm1539_vm10, %v2855_v15, %v2528_v45  ;;  %v3326_v37 = vpop.f32.mrf.mxu3  ;;  %v3290_v15 = vpop.f32.mrf.mxu1 }
 0x5cd   : > { %v2919_v10 = vsel %vm1572_vm9, %v2887_v38, %v2629_v61 }
 0x5ce   : > { %3398 = vst.msk [vmem:[%s7721_s20 + $0x48] sm:$0xff] %vm1341_vm3, %v3366_v1  ;;  %v3438_v3 = vsel %vm1341_vm3, %v3366_v1, 0.0  ;;  %v3501_v27 = vmul.f32 %v3366_v1, %v3366_v1  ;;  %3753 = vmatmul.msk.f32.gmra.mxu2 %vm2927_vm11, %v2919_v10 }
 0x5cf   : > { %v3439_v49 = vadd.f32 %v3438_v3, %v3437_v28  ;;  %v3111_v26 = vpop.f32.mrf.mxu2 }
 0x5d0   : > { %v3541_v56 = vsel %vm1341_vm3, %v3501_v27, 0.0  ;;  %v3324_v7 = vadd.f32 %v3323_v35, %v3111_v26 }
 0x5d1   : > { %v3542_v9 = vadd.f32 %v3541_v56, %v3540_v41  ;;  %v2428_v18 = vpop.permute.xlu1 %2427 }
 0x5d2   : > { %v8091_v33 = vadd.f32 %v7713_v21, %v3324_v7  ;;  %v2330_v28 = vpop.permute.xlu0 %2329 }
 0x5d3   : > { %v2824_v6 = vsel %vm1473_vm6, %v2792_v59, %v2330_v28 }
 0x5d4   : > { %3411 = vst.msk [vmem:[%s7721_s20 + $0xb0] sm:$0xff] %vm1341_vm3, %v8091_v33  ;;  %v2856_v41 = vsel %vm1506_vm8, %v2824_v6, %v2428_v18  ;;  %v3329_v47 = vpop.f32.mrf.mxu3  ;;  %v3293_v11 = vpop.f32.mrf.mxu1 }
 0x5d5   : > { %v2888_v25 = vsel %vm1539_vm10, %v2856_v41, %v2530_v5 }
 0x5d8   : > { %v3075_v34 = vpop.f32.mrf.mxu0 }
 0x5d9   : > { %v3288_v39 = vadd.f32 %v3287_v55, %v3075_v34  ;;  %v2332_v17 = vpop.permute.xlu1 %2331 }
 0x5da   : > { %v2631_v23 = vpop.permute.xlu0 %2630  ;;  %v2825_v48 = vsel %vm1473_vm6, %v2793_v53, %v2332_v17 }
 0x5db   : > { %v3367_v36 = vadd.f32 %v7713_v21, %v3288_v39  ;;  %v2920_v57 = vsel %vm1572_vm9, %v2888_v25, %v2631_v23  ;;  %v2857_v32 = vsel %vm1506_vm8, %v2825_v48, %v2430_v14 }
 0x5dc   : > { %3754 = vmatmul.msk.f32.gmra.mxu2 %vm2927_vm11, %v2920_v57  ;;  %v3332_v4 = vpop.f32.mrf.mxu3  ;;  %v3296_v39 = vpop.f32.mrf.mxu1 }
 0x5dd   : > { %3399 = vst.msk [vmem:[%s7721_s20 + $0x50] sm:$0xff] %vm1341_vm3, %v3367_v36  ;;  %v3440_v44 = vsel %vm1341_vm3, %v3367_v36, 0.0  ;;  %v3502_v2 = vmul.f32 %v3367_v36, %v3367_v36 }
 0x5de   : > { %v3441_v22 = vadd.f32 %v3440_v44, %v3439_v49 }
 0x5df   : > { %v3543_v13 = vsel %vm1341_vm3, %v3502_v2, 0.0 }
 0x5e0   : > { %v3544_v8 = vadd.f32 %v3543_v13, %v3542_v9 }
 0x5e1   : > { %v2633_v29 = vpop.permute.xlu1 %2632 }
 0x5e2   : > { %v2532_v40 = vpop.permute.xlu0 %2531 }
 0x5e3   : > { %v2889_v45 = vsel %vm1539_vm10, %v2857_v32, %v2532_v40 }
 0x5e4   : > { %v2921_v62 = vsel %vm1572_vm9, %v2889_v45, %v2633_v29  ;;  %v3335_v30 = vpop.f32.mrf.mxu3  ;;  %v3299_v60 = vpop.f32.mrf.mxu1 }
 0x5e5   : > { %3755 = vmatmul.msk.f32.gmra.mxu2 %vm2927_vm11, %v2921_v62 }
 0x5e7   : > { %v3114_v50 = vpop.f32.mrf.mxu2 }
 0x5e8   : > { %v3327_v61 = vadd.f32 %v3326_v37, %v3114_v50 }
 0x5ea   : > { %v8123_v1 = vadd.f32 %v7713_v21, %v3327_v61  ;;  %v3078_v38 = vpop.f32.mrf.mxu0 }
 0x5eb   : > { %v3291_v10 = vadd.f32 %v3290_v15, %v3078_v38  ;;  %v3508_v15 = vmul.f32 %v7851_v52, %v7851_v52 }
 0x5ec   : > { %3412 = vst.msk [vmem:[%s7721_s20 + $0xb8] sm:$0xff] %vm1341_vm3, %v8123_v1  ;;  %v3338_v44 = vpop.f32.mrf.mxu3  ;;  %v3302_v14 = vpop.f32.mrf.mxu1 }
 0x5ed   : > { %v3368_v3 = vadd.f32 %v7713_v21, %v3291_v10 }
 0x5ef   : > { %3400 = vst.msk [vmem:[%s7721_s20 + $0x58] sm:$0xff] %vm1341_vm3, %v3368_v3  ;;  %v3442_v27 = vsel %vm1341_vm3, %v3368_v3, 0.0  ;;  %v3503_v35 = vmul.f32 %v3368_v3, %v3368_v3 }
 0x5f0   : > { %v3443_v49 = vadd.f32 %v3442_v27, %v3441_v22 }
 0x5f1   : > { %v3545_v26 = vsel %vm1341_vm3, %v3503_v35, 0.0  ;;  %v3452_v35 = vsel %vm1341_vm3, %v7851_v52, 0.0  ;;  %v3456_v52 = vsel %vm1341_vm3, %v7951_v63, 0.0 }
 0x5f2   : > { %v3546_v19 = vadd.f32 %v3545_v26, %v3544_v8 }
 0x5f8   : > { %v3117_v56 = vpop.f32.mrf.mxu2 }
 0x5f9   : > { %v3330_v7 = vadd.f32 %v3329_v47, %v3117_v56  ;;  %v3555_v56 = vsel %vm1341_vm3, %v3508_v15, 0.0 }
 0x5fb   : > { %v8134_v12 = vadd.f32 %v7713_v21, %v3330_v7  ;;  %v3454_v7 = vsel %vm1341_vm3, %v7909_v51, 0.0 }
 0x5fd   : > { %3413 = vst.msk [vmem:[%s7721_s20 + $0xc0] sm:$0xff] %vm1341_vm3, %v8134_v12 }
 0x601   : > { %v3081_v9 = vpop.f32.mrf.mxu0 }
 0x602   : > { %v3294_v18 = vadd.f32 %v3293_v11, %v3081_v9  ;;  %v3510_v11 = vmul.f32 %v7951_v63, %v7951_v63 }
 0x604   : > { %v3369_v31 = vadd.f32 %v7713_v21, %v3294_v18 }
 0x606   : > { %3401 = vst.msk [vmem:[%s7721_s20 + $0x60] sm:$0xff] %vm1341_vm3, %v3369_v31  ;;  %v3444_v54 = vsel %vm1341_vm3, %v3369_v31, 0.0  ;;  %v3504_v28 = vmul.f32 %v3369_v31, %v3369_v31 }
 0x607   : > { %v3445_v59 = vadd.f32 %v3444_v54, %v3443_v49  ;;  %v3120_v6 = vpop.f32.mrf.mxu2  ;;  %v3509_v49 = vmul.f32 %v7909_v51, %v7909_v51  ;;  %v3511_v54 = vmul.f32 %v7978_v43, %v7978_v43  ;;  %v3458_v51 = vsel %vm1341_vm3, %v7978_v43, 0.0 }
 0x608   : > { %v3547_v5 = vsel %vm1341_vm3, %v3504_v28, 0.0  ;;  %v3333_v41 = vadd.f32 %v3332_v4, %v3120_v6  ;;  %v3559_v6 = vsel %vm1341_vm3, %v3510_v11, 0.0 }
 0x609   : > { %v3548_v55 = vadd.f32 %v3547_v5, %v3546_v19  ;;  %v3557_v31 = vsel %vm1341_vm3, %v3509_v49, 0.0  ;;  %v3512_v5 = vmul.f32 %v8020_v24, %v8020_v24  ;;  %v3561_v63 = vsel %vm1341_vm3, %v3511_v54, 0.0 }
 0x60a   : > { %v8145_v34 = vadd.f32 %v7713_v21, %v3333_v41 }
 0x60b   : > { %v3563_v43 = vsel %vm1341_vm3, %v3512_v5, 0.0 }
 0x60c   : > { %3414 = vst.msk [vmem:[%s7721_s20 + $0xc8] sm:$0xff] %vm1341_vm3, %v8145_v34 }
 0x610   : > { %v3084_v17 = vpop.f32.mrf.mxu0 }
 0x611   : > { %v3297_v25 = vadd.f32 %v3296_v39, %v3084_v17  ;;  %v3460_v17 = vsel %vm1341_vm3, %v8020_v24, 0.0 }
 0x613   : > { %v3370_v23 = vadd.f32 %v7713_v21, %v3297_v25  ;;  %v3513_v25 = vmul.f32 %v8056_v20, %v8056_v20 }
 0x615   : > { %3402 = vst.msk [vmem:[%s7721_s20 + $0x68] sm:$0xff] %vm1341_vm3, %v3370_v23  ;;  %v3505_v22 = vmul.f32 %v3370_v23, %v3370_v23  ;;  %v3446_v13 = vsel %vm1341_vm3, %v3370_v23, 0.0  ;;  %v3565_v24 = vsel %vm1341_vm3, %v3513_v25, 0.0 }
 0x616   : > { %v3447_v45 = vadd.f32 %v3446_v13, %v3445_v59  ;;  %v3341_v59 = vpop.f32.mrf.mxu3  ;;  %v3466_v13 = vsel %vm1341_vm3, %v8123_v1, 0.0 }
 0x617   : > { %v3549_v29 = vsel %vm1341_vm3, %v3505_v22, 0.0 }
 0x618   : > { %v3550_v50 = vadd.f32 %v3549_v29, %v3548_v55  ;;  %v3468_v29 = vsel %vm1341_vm3, %v8134_v12, 0.0 }
 0x61f   : > { %v3123_v16 = vpop.f32.mrf.mxu2 }
 0x620   : > { %v3336_v36 = vadd.f32 %v3335_v30, %v3123_v16 }
 0x622   : > { %v8154_v57 = vadd.f32 %v7713_v21, %v3336_v36  ;;  %v3462_v36 = vsel %vm1341_vm3, %v8056_v20, 0.0 }
 0x624   : > { %3415 = vst.msk [vmem:[%s7721_s20 + $0xd0] sm:$0xff] %vm1341_vm3, %v8154_v57 }
 0x629   : > { %v3087_v58 = vpop.f32.mrf.mxu0 }
 0x62a   : > { %v3300_v46 = vadd.f32 %v3299_v60, %v3087_v58  ;;  %v3514_v60 = vmul.f32 %v8091_v33, %v8091_v33 }
 0x62c   : > { %v3371_v0 = vadd.f32 %v7713_v21, %v3300_v46  ;;  %v3567_v20 = vsel %vm1341_vm3, %v3514_v60, 0.0 }
 0x62e   : > { %3403 = vst.msk [vmem:[%s7721_s20 + $0x70] sm:$0xff] %vm1341_vm3, %v3371_v0  ;;  %v3506_v48 = vmul.f32 %v3371_v0, %v3371_v0  ;;  %v3448_v32 = vsel %vm1341_vm3, %v3371_v0, 0.0 }
 0x62f   : > { %v3126_v2 = vpop.f32.mrf.mxu2  ;;  %v3449_v61 = vadd.f32 %v3448_v32, %v3447_v45  ;;  %v3517_v32 = vmul.f32 %v8145_v34, %v8145_v34 }
 0x630   : > { %v3339_v42 = vadd.f32 %v3338_v44, %v3126_v2  ;;  %v3551_v62 = vsel %vm1341_vm3, %v3506_v48, 0.0  ;;  %v3464_v44 = vsel %vm1341_vm3, %v8091_v33, 0.0  ;;  %v3515_v2 = vmul.f32 %v8123_v1, %v8123_v1 }
 0x631   : > { %v3552_v3 = vadd.f32 %v3551_v62, %v3550_v50  ;;  %v3470_v50 = vsel %vm1341_vm3, %v8145_v34, 0.0 }
 0x632   : > { %v8163_v53 = vadd.f32 %v7713_v21, %v3339_v42  ;;  %v3569_v33 = vsel %vm1341_vm3, %v3515_v2, 0.0 }
 0x634   : > { %3416 = vst.msk [vmem:[%s7721_s20 + $0xd8] sm:$0xff] %vm1341_vm3, %v8163_v53  ;;  %v3474_v11 = vsel %vm1341_vm3, %v8163_v53, 0.0 }
 0x63a   : > { %v3090_v8 = vpop.f32.mrf.mxu0 }
 0x63b   : > { %v3303_v40 = vadd.f32 %v3302_v14, %v3090_v8  ;;  %v3344_v8 = vpop.f32.mrf.mxu3 }
 0x63d   : > { %v3372_v37 = vadd.f32 %v7713_v21, %v3303_v40 }
 0x63f   : > { %3404 = vst.msk [vmem:[%s7721_s20 + $0x78] sm:$0xff] %vm1341_vm3, %v3372_v37  ;;  %v3450_v38 = vsel %vm1341_vm3, %v3372_v37, 0.0  ;;  %v3507_v10 = vmul.f32 %v3372_v37, %v3372_v37 }
 0x640   : > { %v3451_v27 = vadd.f32 %v3450_v38, %v3449_v61  ;;  %v3518_v61 = vmul.f32 %v8154_v57, %v8154_v57 }
 0x641   : > { %v3553_v26 = vsel %vm1341_vm3, %v3507_v10, 0.0 }
 0x642   : > { %v3453_v19 = vadd.f32 %v3452_v35, %v3451_v27  ;;  %v3554_v47 = vadd.f32 %v3553_v26, %v3552_v3  ;;  %v3573_v3 = vsel %vm1341_vm3, %v3517_v32, 0.0  ;;  %v3472_v27 = vsel %vm1341_vm3, %v8154_v57, 0.0 }
 0x643   : > { %v3575_v34 = vsel %vm1341_vm3, %v3518_v61, 0.0 }
 0x644   : > { %v3455_v9 = vadd.f32 %v3454_v7, %v3453_v19  ;;  %v3556_v18 = vadd.f32 %v3555_v56, %v3554_v47  ;;  %v3347_v19 = vpop.f32.mrf.mxu3  ;;  %v3519_v47 = vmul.f32 %v8163_v53, %v8163_v53 }
 0x646   : > { %v3457_v28 = vadd.f32 %v3456_v52, %v3455_v9  ;;  %v3558_v4 = vadd.f32 %v3557_v31, %v3556_v18  ;;  %v3577_v57 = vsel %vm1341_vm3, %v3519_v47, 0.0 }
 0x648   : > { %v3459_v41 = vadd.f32 %v3458_v51, %v3457_v28  ;;  %v3560_v55 = vadd.f32 %v3559_v6, %v3558_v4  ;;  %v3129_v39 = vpop.f32.mrf.mxu2 }
 0x649   : > { %v3342_v23 = vadd.f32 %v3341_v59, %v3129_v39 }
 0x64a   : > { %v3461_v30 = vadd.f32 %v3460_v17, %v3459_v41  ;;  %v3562_v16 = vadd.f32 %v3561_v63, %v3560_v55 }
 0x64b   : > { %v3385_v58 = vadd.f32 %v7713_v21, %v3342_v23  ;;  %v3516_v21 = vmul.f32 %v8134_v12, %v8134_v12  ;;  %v3925_v12 = vld [vmem:[%s8293_s4] ss:$0 sm:$0xff] }
 0x64c   : > { %v3463_v46 = vadd.f32 %v3462_v36, %v3461_v30  ;;  %v3564_v0 = vadd.f32 %v3563_v43, %v3562_v16  ;;  %v3350_v51 = vpop.f32.mrf.mxu3 }
 0x64d   : > { %3417 = vst.msk [vmem:[%s7721_s20 + $0xe0] sm:$0xff] %vm1341_vm3, %v3385_v58  ;;  %v3571_v1 = vsel %vm1341_vm3, %v3516_v21, 0.0  ;;  %v3520_v31 = vmul.f32 %v3385_v58, %v3385_v58  ;;  %v3476_v54 = vsel %vm1341_vm3, %v3385_v58, 0.0 }
 0x64e   : > { %v3566_v42 = vadd.f32 %v3565_v24, %v3564_v0  ;;  %v3465_v22 = vadd.f32 %v3464_v44, %v3463_v46 }
 0x64f   : > { %v3579_v4 = vsel %vm1341_vm3, %v3520_v31, 0.0 }
 0x650   : > { %v3467_v48 = vadd.f32 %v3466_v13, %v3465_v22  ;;  %v3568_v14 = vadd.f32 %v3567_v20, %v3566_v42 }
 0x651   : > { %v3132_v40 = vpop.f32.mrf.mxu2 }
 0x652   : > { %v3469_v45 = vadd.f32 %v3468_v29, %v3467_v48  ;;  %v3570_v62 = vadd.f32 %v3569_v33, %v3568_v14  ;;  %v3345_v37 = vadd.f32 %v3344_v8, %v3132_v40 }
 0x654   : > { %v3471_v15 = vadd.f32 %v3470_v50, %v3469_v45  ;;  %v3572_v38 = vadd.f32 %v3571_v1, %v3570_v62  ;;  %v3386_v10 = vadd.f32 %v3925_v12, %v3345_v37 }
 0x656   : > { %v3473_v35 = vadd.f32 %v3472_v27, %v3471_v15  ;;  %v3574_v49 = vadd.f32 %v3573_v3, %v3572_v38  ;;  %3418 = vst.msk [vmem:[%s7721_s20 + $0xe8] sm:$0xff] %vm1341_vm3, %v3386_v10  ;;  %v3521_v59 = vmul.f32 %v3386_v10, %v3386_v10  ;;  %v3478_v53 = vsel %vm1341_vm3, %v3386_v10, 0.0 }
 0x658   : > { %v3576_v26 = vadd.f32 %v3575_v34, %v3574_v49  ;;  %v3475_v9 = vadd.f32 %v3474_v11, %v3473_v35  ;;  %v3581_v17 = vsel %vm1341_vm3, %v3521_v59, 0.0 }
 0x65a   : > { %v3578_v52 = vadd.f32 %v3577_v57, %v3576_v26  ;;  %v3477_v28 = vadd.f32 %v3476_v54, %v3475_v9 }
 0x65c   : > { %v3580_v5 = vadd.f32 %v3579_v4, %v3578_v52  ;;  %v3479_v63 = vadd.f32 %v3478_v53, %v3477_v28 }
 0x65e   : > { %v3582_v30 = vadd.f32 %v3581_v17, %v3580_v5 }
 0x65f   : > { %v3135_v56 = vpop.f32.mrf.mxu2 }
 0x660   : > { %v3348_v7 = vadd.f32 %v3347_v19, %v3135_v56 }
 0x662   : > { %v3387_v18 = vadd.f32 %v3925_v12, %v3348_v7 }
 0x664   : > { %3419 = vst.msk [vmem:[%s7721_s20 + $0xf0] sm:$0xff] %vm1341_vm3, %v3387_v18  ;;  %v3522_v6 = vmul.f32 %v3387_v18, %v3387_v18  ;;  %v3480_v55 = vsel %vm1341_vm3, %v3387_v18, 0.0 }
 0x665   : > { %v3481_v16 = vadd.f32 %v3480_v55, %v3479_v63 }
 0x666   : > { %v3583_v25 = vsel %vm1341_vm3, %v3522_v6, 0.0 }
 0x667   : > { %v3584_v60 = vadd.f32 %v3583_v25, %v3582_v30 }
 0x668   : > { %v3138_v41 = vpop.f32.mrf.mxu2 }
 0x669   : > { %v3351_v39 = vadd.f32 %v3350_v51, %v3138_v41 }
 0x66b   : > { %v3388_v23 = vadd.f32 %v3925_v12, %v3351_v39 }
 0x66d   : > { %3420 = vst.msk [vmem:[%s7721_s20 + $0xf8] sm:$0xff] %vm1341_vm3, %v3388_v23  ;;  %v3482_v43 = vsel %vm1341_vm3, %v3388_v23, 0.0  ;;  %v3523_v36 = vmul.f32 %v3388_v23, %v3388_v23 }
 0x66e   : > { %v3483_v58 = vadd.f32 %v3482_v43, %v3481_v16 }
 0x66f   : > { %v3585_v46 = vsel %vm1341_vm3, %v3523_v36, 0.0 }
 0x670   : > { %v3484_v0 = vrot.slane %v3483_v58, 4  ;;  %v3586_v24 = vadd.f32 %v3585_v46, %v3584_v60 }
 0x672   : > { %v3485_v44 = vadd.f32 %v3484_v0, %v3483_v58  ;;  %v3587_v2 = vrot.slane %v3586_v24, 4 }
 0x674   : > { %v3486_v42 = vrot.slane %v3485_v44, 2  ;;  %v3588_v22 = vadd.f32 %v3587_v2, %v3586_v24 }
 0x676   : > { %v3487_v20 = vadd.f32 %v3486_v42, %v3485_v44  ;;  %v3589_v13 = vrot.slane %v3588_v22, 2 }
 0x678   : > { %v3488_v21 = vrot.slane %v3487_v20, 1  ;;  %v3590_v48 = vadd.f32 %v3589_v13, %v3588_v22 }
 0x67a   : > { %v3489_v14 = vadd.f32 %v3488_v21, %v3487_v20  ;;  %v3591_v8 = vrot.slane %v3590_v48, 1 }
 0x67c   : > { %3491 = vst.msk [vmem:[%s267_s14] sm:$0x1] %vm3490_vm12, %v3489_v14  ;;  %v3592_v33 = vadd.f32 %v3591_v8, %v3590_v48 }
 0x67e   : > { %3593 = vst.msk [vmem:[%s267_s14 + $0x1] sm:$0x1] %vm3490_vm12, %v3592_v33 }
 0x67f   : > { %3953 = shalt.err (!%p3950_p3)
}
 0x680   : > { %3805 = dma.vmem_to_hbm [thread:$0]  (%p4071_p5), %s3616_s15, 32, %s3618_s16, %s3600_s25  }
 0x681 PF: > { %p3811_p4 = scmp.ge.s32.totalorder %s3988_s24, 2  ;;  %s3637_s26 = sand.u32 1, %s3976_s21  }
 0x682   : > { %s3638_s10 = scalar_lea.sflag [#allocation3], %s3637_s26 }
 0x683   : > { %p3808_p7 = pnand %p3811_p4, %p4075_p6 }
 0x685   : > { %p3809_p8 = pneg %p3808_p7 }
 0x687   : > { %3971 = dma.done.wait (%p3809_p8), %s3638_s10, 32  }
 0x688   : > { %3973 = vsyncadd (%p3809_p8), %s3638_s10, 4294967264  ;;  %p17_p9 = scmp.ge.s32.totalorder %s4058_s27, 4   ;;  %s9401_s21 = smov %s3980_s22 }
 0x689   : > { %s9402_s22 = smov %s3984_s23  ;;  %s9403_s23 = smov %s4069_s30 }
 0x68a   : > { %s9404_s24 = smov %s4058_s27  ;;  %19 = sbr.rel (!%p17_p9) target bundleno = 3 (0x3), region = 90 }
 0x68f   :  { %3644 = vsyncpa [#allocation3], 1 }
 0x690   :  { %3646 = vsyncpa [#allocation3 + $0x1], 1 }

</bundles_post_ra>
